<compile_context>
chip_gen: v7x
topology: tpu7x:2x2x1
jax: 0.10.0
libtpu: 0.0.40
codegen_flags: <defaults>
</compile_context>

<pallas_src>
import math

import jax
import jax.numpy as jnp
from jax.experimental import pallas as pl
from jax.experimental.pallas import tpu as pltpu


# ----------------------------------------------------------------------------
# In-kernel GRU cell (PyTorch gate order [r, z, n], h0 = 0).
#   r = sigmoid(W_ir x + b_ir + W_hr h + b_hr)
#   z = sigmoid(W_iz x + b_iz + W_hz h + b_hz)
#   n = tanh  (W_in x + b_in + r * (W_hn h + b_hn))
#   h = (1 - z) * n + z * h
# `gx` already contains W_i* x + b_i* with b_hr/b_hz folded in; only b_hn is applied here
# (it must stay inside the r*(.) term), which matches PyTorch exactly.
# ----------------------------------------------------------------------------
def _gru_cell(gx, h, whh, b_hn, H):
    gh = jnp.dot(h, whh, preferred_element_type=jnp.float32)          # (B, 3H)
    r = jax.nn.sigmoid(gx[:, :H] + gh[:, :H])
    z = jax.nn.sigmoid(gx[:, H:2 * H] + gh[:, H:2 * H])
    n = jnp.tanh(gx[:, 2 * H:] + r * (gh[:, 2 * H:] + b_hn))
    return (1.0 - z) * n + z * h


# ----------------------------------------------------------------------------
# Fused whole-model kernel (single pallas_call, everything resident in VMEM/vregs).
# ----------------------------------------------------------------------------
def _make_fused_kernel(n_enc, n_dec, T, B, F):
    n_gru = n_enc + n_dec

    def kernel(*refs):
        x_ref = refs[0]                                   # (B, T*F), caller layout
        gru_refs = refs[1:1 + 4 * n_gru]                  # per layer: wih, whh, b_x, b_hn
        w_out_ref = refs[1 + 4 * n_gru]                   # (H_last, F)
        b_out_ref = refs[2 + 4 * n_gru]                   # (1, F)
        out_ref = refs[3 + 4 * n_gru]                     # (B, T*F), caller layout

        def gp(i):
            b = 4 * i
            return (gru_refs[b][...], gru_refs[b + 1][...],
                    gru_refs[b + 2][...], gru_refs[b + 3][...])

        enc_p = [gp(i) for i in range(n_enc)]
        dec_p = [gp(n_enc + i) for i in range(n_dec)]
        w_out = w_out_ref[...]
        b_out = b_out_ref[...]

        xall = x_ref[...]                                 # single (B, T*F) tile load

        # ---- encoder: all stacked layers advance together, one timestep at a time ----
        h_enc = [jnp.zeros((B, p[1].shape[0]), jnp.float32) for p in enc_p]
        for t in range(T):                                # static unroll (T known at trace)
            inp = xall[:, t * F:(t + 1) * F]              # (B, F) static lane slice
            for li, (wih, whh, b_x, b_hn) in enumerate(enc_p):
                H = whh.shape[0]
                gx = jnp.dot(inp, wih, preferred_element_type=jnp.float32) + b_x
                h_enc[li] = _gru_cell(gx, h_enc[li], whh, b_hn, H)
                inp = h_enc[li]

        enc_last = h_enc[-1]                              # (B, H_enc_last)

        # ---- bridge + decoder layer 0: constant input -> one shared input projection ----
        wih0, whh0, b_x0, b_hn0 = dec_p[0]
        H0 = whh0.shape[0]
        gx_d0 = jnp.dot(enc_last, wih0, preferred_element_type=jnp.float32) + b_x0

        # ---- decoder (+ TimeDistributed head), all layers per timestep ----
        h_dec = [jnp.zeros((B, p[1].shape[0]), jnp.float32) for p in dec_p]
        for t in range(T):                                # static unroll
            h_dec[0] = _gru_cell(gx_d0, h_dec[0], whh0, b_hn0, H0)
            inp = h_dec[0]
            for li in range(1, n_dec):
                wih, whh, b_x, b_hn = dec_p[li]
                H = whh.shape[0]
                gx = jnp.dot(inp, wih, preferred_element_type=jnp.float32) + b_x
                h_dec[li] = _gru_cell(gx, h_dec[li], whh, b_hn, H)
                inp = h_dec[li]
            # TimeDistributed(Linear) + Sigmoid, written directly in caller layout.
            y_t = jax.nn.sigmoid(
                jnp.dot(inp, w_out, preferred_element_type=jnp.float32) + b_out)
            out_ref[:, t * F:(t + 1) * F] = y_t           # store into the single output tile

    return kernel


# ----------------------------------------------------------------------------
# Parameter prep (done ONCE, outside the jitted forward): fold b_hr/b_hz into the
# input-projection bias, keep b_hn separate, flatten to the kernel's argument order.
# ----------------------------------------------------------------------------
def prepare_fused_params(params):
    flat = []
    for p in params["enc"] + params["dec"]:
        H = p["whh"].shape[0]
        b_x = p["bih"].at[:, :2 * H].add(p["bhh"][:, :2 * H])   # (1, 3H)
        b_hn = p["bhh"][:, 2 * H:]                              # (1, H)
        flat += [p["wih"], p["whh"], b_x, b_hn]
    flat += [params["out"]["w"], params["out"]["b"]]
    meta = dict(n_enc=len(params["enc"]), n_dec=len(params["dec"]),
                n_features=params["out"]["w"].shape[1])
    return flat, meta


def lstm_ae_v2_forward(flat, meta, x, seq_len):
    """x: (B, T, n_features) batch-major (PyTorch batch_first=True)."""
    B, T, F = x.shape
    assert T == seq_len and F == meta["n_features"]

    x2 = x.reshape(B, T * F)                              # free row-major bitcast, no relayout

    kernel = _make_fused_kernel(meta["n_enc"], meta["n_dec"], T, B, F)
    vmem = pltpu.MemorySpace.VMEM
    y2 = pl.pallas_call(
        kernel,
        out_shape=jax.ShapeDtypeStruct((B, T * F), jnp.float32),
        in_specs=[pl.BlockSpec(memory_space=vmem) for _ in range(1 + len(flat))],
        out_specs=pl.BlockSpec(memory_space=vmem),
    )(x2, *flat)

    return y2.reshape(B, T, F)                            # free bitcast back to caller layout


# ----------------------------------------------------------------------------
# Parameter construction (deterministic, PyTorch-style U(-1/sqrt(H), 1/sqrt(H))).
# Weights stored pre-transposed: wih (Din, 3H), whh (H, 3H); gate order [r, z, n].
# ----------------------------------------------------------------------------
def init_gru_params(key, in_dim, hidden):
    k = 1.0 / math.sqrt(hidden)
    k1, k2, k3, k4 = jax.random.split(key, 4)
    wih = jax.random.uniform(k1, (in_dim, 3 * hidden), jnp.float32, -k, k)
    whh = jax.random.uniform(k2, (hidden, 3 * hidden), jnp.float32, -k, k)
    bih = jax.random.uniform(k3, (1, 3 * hidden), jnp.float32, -k, k)
    bhh = jax.random.uniform(k4, (1, 3 * hidden), jnp.float32, -k, k)
    return dict(wih=wih, whh=whh, bih=bih, bhh=bhh)


def init_linear_params(key, in_dim, out_dim):
    k = 1.0 / math.sqrt(in_dim)
    k1, k2 = jax.random.split(key, 2)
    w = jax.random.uniform(k1, (in_dim, out_dim), jnp.float32, -k, k)  # W^T
    b = jax.random.uniform(k2, (1, out_dim), jnp.float32, -k, k)
    return dict(w=w, b=b)


def init_lstm_ae_v2_params(key, seq_len, n_features, hidden_layer_list):
    hiddens = list(hidden_layer_list)
    params = {"enc": [], "dec": []}

    in_dim = n_features
    for h in hiddens:
        key, sub = jax.random.split(key)
        params["enc"].append(init_gru_params(sub, in_dim, h))
        in_dim = h

    rev = list(reversed(hiddens))
    in_dim = rev[0]
    for h in rev:
        key, sub = jax.random.split(key)
        params["dec"].append(init_gru_params(sub, in_dim, h))
        in_dim = h

    key, sub = jax.random.split(key)
    params["out"] = init_linear_params(sub, rev[-1], n_features)
    return params


# ----------------------------------------------------------------------------
# Pure-JAX reference (mirrors PyTorch GRU + TimeDistributed(Linear) + Sigmoid).
# ----------------------------------------------------------------------------
def _gru_ref(x, wih, whh, bih, bhh):
    B, T, D = x.shape
    H = whh.shape[0]
    hi = jax.lax.Precision.HIGHEST

    def step(h, xt):
        gx = jnp.dot(xt, wih, precision=hi) + bih
        gh = jnp.dot(h, whh, precision=hi) + bhh
        r = jax.nn.sigmoid(gx[:, :H] + gh[:, :H])
        z = jax.nn.sigmoid(gx[:, H:2 * H] + gh[:, H:2 * H])
        n = jnp.tanh(gx[:, 2 * H:] + r * gh[:, 2 * H:])
        h_new = (1.0 - z) * n + z * h
        return h_new, h_new

    h0 = jnp.zeros((B, H), jnp.float32)
    _, ys = jax.lax.scan(step, h0, jnp.swapaxes(x, 0, 1))
    return jnp.swapaxes(ys, 0, 1)


def lstm_ae_v2_reference(params, x, seq_len):
    h = x
    for p in params["enc"]:
        h = _gru_ref(h, p["wih"], p["whh"], p["bih"], p["bhh"])
    last = h[:, -1:, :]
    h = jnp.broadcast_to(last, (h.shape[0], seq_len, h.shape[2]))
    for p in params["dec"]:
        h = _gru_ref(h, p["wih"], p["whh"], p["bih"], p["bhh"])
    y = jnp.dot(h, params["out"]["w"], precision=jax.lax.Precision.HIGHEST) + params["out"]["b"]
    return jax.nn.sigmoid(y)


if __name__ == "__main__":
    seq_len = 8
    n_features = 4
    hidden_layer_list = [32, 16]
    batch = 2

    key = jax.random.PRNGKey(0)
    pkey, xkey = jax.random.split(key)

    params = init_lstm_ae_v2_params(pkey, seq_len, n_features, hidden_layer_list)
    x = jax.random.normal(xkey, (batch, seq_len, n_features), dtype=jnp.float32)

    # Fold/flatten parameters ONCE, outside the jitted per-call graph.
    flat, meta = prepare_fused_params(params)
    flat = jax.block_until_ready(flat)

    fwd = jax.jit(lambda fp, xx: lstm_ae_v2_forward(fp, meta, xx, seq_len))
    y = fwd(flat, x)
    jax.block_until_ready(y)

    assert y.shape == (batch, seq_len, n_features), y.shape
    assert bool(jnp.all(jnp.isfinite(y)))
    assert bool(jnp.all((y >= 0.0) & (y <= 1.0)))  # sigmoid range

    # Semantics check against a plain-JAX PyTorch-equivalent reference.
    y_ref = lstm_ae_v2_reference(params, x, seq_len)
    assert bool(jnp.allclose(y, y_ref, atol=2e-3, rtol=2e-3)), float(jnp.max(jnp.abs(y - y_ref)))

    print("KERNEL_OK")
</pallas_src>

<mosaic_0001>
module attributes {stable_mosaic.version = 11 : i64} {
  func.func @kernel(%arg0: memref<2x32xf32, #tpu.memory_space<vmem>>, %arg1: memref<4x96xf32, #tpu.memory_space<vmem>>, %arg2: memref<32x96xf32, #tpu.memory_space<vmem>>, %arg3: memref<1x96xf32, #tpu.memory_space<vmem>>, %arg4: memref<1x32xf32, #tpu.memory_space<vmem>>, %arg5: memref<32x48xf32, #tpu.memory_space<vmem>>, %arg6: memref<16x48xf32, #tpu.memory_space<vmem>>, %arg7: memref<1x48xf32, #tpu.memory_space<vmem>>, %arg8: memref<1x16xf32, #tpu.memory_space<vmem>>, %arg9: memref<16x48xf32, #tpu.memory_space<vmem>>, %arg10: memref<16x48xf32, #tpu.memory_space<vmem>>, %arg11: memref<1x48xf32, #tpu.memory_space<vmem>>, %arg12: memref<1x16xf32, #tpu.memory_space<vmem>>, %arg13: memref<16x96xf32, #tpu.memory_space<vmem>>, %arg14: memref<32x96xf32, #tpu.memory_space<vmem>>, %arg15: memref<1x96xf32, #tpu.memory_space<vmem>>, %arg16: memref<1x32xf32, #tpu.memory_space<vmem>>, %arg17: memref<32x4xf32, #tpu.memory_space<vmem>>, %arg18: memref<1x4xf32, #tpu.memory_space<vmem>>, %arg19: memref<2x32xf32, #tpu.memory_space<vmem>>) attributes {dimension_semantics = [], scalar_prefetch = 0 : i64, scratch_operands = 0 : i64, tpu.core_type = #tpu.core_type<tc>} {
    %c0 = arith.constant 0 : index
    %c0_0 = arith.constant 0 : index
    %0 = vector.load %arg1[%c0, %c0_0] : memref<4x96xf32, #tpu.memory_space<vmem>>, vector<4x96xf32>
    %c0_1 = arith.constant 0 : index
    %c0_2 = arith.constant 0 : index
    %1 = vector.load %arg2[%c0_1, %c0_2] : memref<32x96xf32, #tpu.memory_space<vmem>>, vector<32x96xf32>
    %c0_3 = arith.constant 0 : index
    %c0_4 = arith.constant 0 : index
    %2 = vector.load %arg3[%c0_3, %c0_4] : memref<1x96xf32, #tpu.memory_space<vmem>>, vector<1x96xf32>
    %c0_5 = arith.constant 0 : index
    %c0_6 = arith.constant 0 : index
    %3 = vector.load %arg4[%c0_5, %c0_6] : memref<1x32xf32, #tpu.memory_space<vmem>>, vector<1x32xf32>
    %c0_7 = arith.constant 0 : index
    %c0_8 = arith.constant 0 : index
    %4 = vector.load %arg5[%c0_7, %c0_8] : memref<32x48xf32, #tpu.memory_space<vmem>>, vector<32x48xf32>
    %c0_9 = arith.constant 0 : index
    %c0_10 = arith.constant 0 : index
    %5 = vector.load %arg6[%c0_9, %c0_10] : memref<16x48xf32, #tpu.memory_space<vmem>>, vector<16x48xf32>
    %c0_11 = arith.constant 0 : index
    %c0_12 = arith.constant 0 : index
    %6 = vector.load %arg7[%c0_11, %c0_12] : memref<1x48xf32, #tpu.memory_space<vmem>>, vector<1x48xf32>
    %c0_13 = arith.constant 0 : index
    %c0_14 = arith.constant 0 : index
    %7 = vector.load %arg8[%c0_13, %c0_14] : memref<1x16xf32, #tpu.memory_space<vmem>>, vector<1x16xf32>
    %c0_15 = arith.constant 0 : index
    %c0_16 = arith.constant 0 : index
    %8 = vector.load %arg9[%c0_15, %c0_16] : memref<16x48xf32, #tpu.memory_space<vmem>>, vector<16x48xf32>
    %c0_17 = arith.constant 0 : index
    %c0_18 = arith.constant 0 : index
    %9 = vector.load %arg10[%c0_17, %c0_18] : memref<16x48xf32, #tpu.memory_space<vmem>>, vector<16x48xf32>
    %c0_19 = arith.constant 0 : index
    %c0_20 = arith.constant 0 : index
    %10 = vector.load %arg11[%c0_19, %c0_20] : memref<1x48xf32, #tpu.memory_space<vmem>>, vector<1x48xf32>
    %c0_21 = arith.constant 0 : index
    %c0_22 = arith.constant 0 : index
    %11 = vector.load %arg12[%c0_21, %c0_22] : memref<1x16xf32, #tpu.memory_space<vmem>>, vector<1x16xf32>
    %c0_23 = arith.constant 0 : index
    %c0_24 = arith.constant 0 : index
    %12 = vector.load %arg13[%c0_23, %c0_24] : memref<16x96xf32, #tpu.memory_space<vmem>>, vector<16x96xf32>
    %c0_25 = arith.constant 0 : index
    %c0_26 = arith.constant 0 : index
    %13 = vector.load %arg14[%c0_25, %c0_26] : memref<32x96xf32, #tpu.memory_space<vmem>>, vector<32x96xf32>
    %c0_27 = arith.constant 0 : index
    %c0_28 = arith.constant 0 : index
    %14 = vector.load %arg15[%c0_27, %c0_28] : memref<1x96xf32, #tpu.memory_space<vmem>>, vector<1x96xf32>
    %c0_29 = arith.constant 0 : index
    %c0_30 = arith.constant 0 : index
    %15 = vector.load %arg16[%c0_29, %c0_30] : memref<1x32xf32, #tpu.memory_space<vmem>>, vector<1x32xf32>
    %c0_31 = arith.constant 0 : index
    %c0_32 = arith.constant 0 : index
    %16 = vector.load %arg17[%c0_31, %c0_32] : memref<32x4xf32, #tpu.memory_space<vmem>>, vector<32x4xf32>
    %c0_33 = arith.constant 0 : index
    %c0_34 = arith.constant 0 : index
    %17 = vector.load %arg18[%c0_33, %c0_34] : memref<1x4xf32, #tpu.memory_space<vmem>>, vector<1x4xf32>
    %c0_35 = arith.constant 0 : index
    %c0_36 = arith.constant 0 : index
    %18 = vector.load %arg0[%c0_35, %c0_36] : memref<2x32xf32, #tpu.memory_space<vmem>>, vector<2x32xf32>
    %cst = arith.constant 0.000000e+00 : f32
    %19 = vector.broadcast %cst : f32 to vector<2x32xf32>
    %cst_37 = arith.constant 0.000000e+00 : f32
    %20 = vector.broadcast %cst_37 : f32 to vector<2x16xf32>
    %21 = vector.extract_strided_slice %18 {offsets = [0, 0], sizes = [2, 4], strides = [1, 1]} : vector<2x32xf32> to vector<2x4xf32>
    %cst_38 = arith.constant dense<0.000000e+00> : vector<2x96xf32>
    %22 = tpu.matmul %21, %0, %cst_38 {dimension_numbers = #tpu.dot_dimension_numbers<[1], [0], [0], [1], [0, 0, 1, 1], [], []>} : vector<2x4xf32>, vector<4x96xf32>, vector<2x96xf32> -> vector<2x96xf32>
    %23 = vector.broadcast %2 : vector<1x96xf32> to vector<2x96xf32>
    %24 = arith.addf %22, %23 : vector<2x96xf32>
    %cst_39 = arith.constant dense<0.000000e+00> : vector<2x96xf32>
    %25 = tpu.matmul %19, %1, %cst_39 {dimension_numbers = #tpu.dot_dimension_numbers<[1], [0], [0], [1], [0, 0, 1, 1], [], []>} : vector<2x32xf32>, vector<32x96xf32>, vector<2x96xf32> -> vector<2x96xf32>
    %26 = vector.extract_strided_slice %24 {offsets = [0, 0], sizes = [2, 32], strides = [1, 1]} : vector<2x96xf32> to vector<2x32xf32>
    %27 = vector.extract_strided_slice %25 {offsets = [0, 0], sizes = [2, 32], strides = [1, 1]} : vector<2x96xf32> to vector<2x32xf32>
    %28 = arith.addf %26, %27 : vector<2x32xf32>
    %29 = arith.negf %28 : vector<2x32xf32>
    %30 = math.exp %29 : vector<2x32xf32>
    %cst_40 = arith.constant 1.000000e+00 : f32
    %31 = vector.broadcast %cst_40 : f32 to vector<2x32xf32>
    %32 = arith.addf %31, %30 : vector<2x32xf32>
    %33 = arith.divf %31, %32 : vector<2x32xf32>
    %34 = vector.extract_strided_slice %24 {offsets = [0, 32], sizes = [2, 32], strides = [1, 1]} : vector<2x96xf32> to vector<2x32xf32>
    %35 = vector.extract_strided_slice %25 {offsets = [0, 32], sizes = [2, 32], strides = [1, 1]} : vector<2x96xf32> to vector<2x32xf32>
    %36 = arith.addf %34, %35 : vector<2x32xf32>
    %37 = arith.negf %36 : vector<2x32xf32>
    %38 = math.exp %37 : vector<2x32xf32>
    %cst_41 = arith.constant 1.000000e+00 : f32
    %39 = vector.broadcast %cst_41 : f32 to vector<2x32xf32>
    %40 = arith.addf %39, %38 : vector<2x32xf32>
    %41 = arith.divf %39, %40 : vector<2x32xf32>
    %42 = vector.extract_strided_slice %24 {offsets = [0, 64], sizes = [2, 32], strides = [1, 1]} : vector<2x96xf32> to vector<2x32xf32>
    %43 = vector.extract_strided_slice %25 {offsets = [0, 64], sizes = [2, 32], strides = [1, 1]} : vector<2x96xf32> to vector<2x32xf32>
    %44 = vector.broadcast %3 : vector<1x32xf32> to vector<2x32xf32>
    %45 = arith.addf %43, %44 : vector<2x32xf32>
    %46 = arith.mulf %33, %45 : vector<2x32xf32>
    %47 = arith.addf %42, %46 : vector<2x32xf32>
    %48 = math.tanh %47 : vector<2x32xf32>
    %cst_42 = arith.constant 1.000000e+00 : f32
    %49 = vector.broadcast %cst_42 : f32 to vector<2x32xf32>
    %50 = arith.subf %49, %41 : vector<2x32xf32>
    %51 = arith.mulf %50, %48 : vector<2x32xf32>
    %52 = arith.mulf %41, %19 : vector<2x32xf32>
    %53 = arith.addf %51, %52 : vector<2x32xf32>
    %cst_43 = arith.constant dense<0.000000e+00> : vector<2x48xf32>
    %54 = tpu.matmul %53, %4, %cst_43 {dimension_numbers = #tpu.dot_dimension_numbers<[1], [0], [0], [1], [0, 0, 1, 1], [], []>} : vector<2x32xf32>, vector<32x48xf32>, vector<2x48xf32> -> vector<2x48xf32>
    %55 = vector.broadcast %6 : vector<1x48xf32> to vector<2x48xf32>
    %56 = arith.addf %54, %55 : vector<2x48xf32>
    %cst_44 = arith.constant dense<0.000000e+00> : vector<2x48xf32>
    %57 = tpu.matmul %20, %5, %cst_44 {dimension_numbers = #tpu.dot_dimension_numbers<[1], [0], [0], [1], [0, 0, 1, 1], [], []>} : vector<2x16xf32>, vector<16x48xf32>, vector<2x48xf32> -> vector<2x48xf32>
    %58 = vector.extract_strided_slice %56 {offsets = [0, 0], sizes = [2, 16], strides = [1, 1]} : vector<2x48xf32> to vector<2x16xf32>
    %59 = vector.extract_strided_slice %57 {offsets = [0, 0], sizes = [2, 16], strides = [1, 1]} : vector<2x48xf32> to vector<2x16xf32>
    %60 = arith.addf %58, %59 : vector<2x16xf32>
    %61 = arith.negf %60 : vector<2x16xf32>
    %62 = math.exp %61 : vector<2x16xf32>
    %cst_45 = arith.constant 1.000000e+00 : f32
    %63 = vector.broadcast %cst_45 : f32 to vector<2x16xf32>
    %64 = arith.addf %63, %62 : vector<2x16xf32>
    %65 = arith.divf %63, %64 : vector<2x16xf32>
    %66 = vector.extract_strided_slice %56 {offsets = [0, 16], sizes = [2, 16], strides = [1, 1]} : vector<2x48xf32> to vector<2x16xf32>
    %67 = vector.extract_strided_slice %57 {offsets = [0, 16], sizes = [2, 16], strides = [1, 1]} : vector<2x48xf32> to vector<2x16xf32>
    %68 = arith.addf %66, %67 : vector<2x16xf32>
    %69 = arith.negf %68 : vector<2x16xf32>
    %70 = math.exp %69 : vector<2x16xf32>
    %cst_46 = arith.constant 1.000000e+00 : f32
    %71 = vector.broadcast %cst_46 : f32 to vector<2x16xf32>
    %72 = arith.addf %71, %70 : vector<2x16xf32>
    %73 = arith.divf %71, %72 : vector<2x16xf32>
    %74 = vector.extract_strided_slice %56 {offsets = [0, 32], sizes = [2, 16], strides = [1, 1]} : vector<2x48xf32> to vector<2x16xf32>
    %75 = vector.extract_strided_slice %57 {offsets = [0, 32], sizes = [2, 16], strides = [1, 1]} : vector<2x48xf32> to vector<2x16xf32>
    %76 = vector.broadcast %7 : vector<1x16xf32> to vector<2x16xf32>
    %77 = arith.addf %75, %76 : vector<2x16xf32>
    %78 = arith.mulf %65, %77 : vector<2x16xf32>
    %79 = arith.addf %74, %78 : vector<2x16xf32>
    %80 = math.tanh %79 : vector<2x16xf32>
    %cst_47 = arith.constant 1.000000e+00 : f32
    %81 = vector.broadcast %cst_47 : f32 to vector<2x16xf32>
    %82 = arith.subf %81, %73 : vector<2x16xf32>
    %83 = arith.mulf %82, %80 : vector<2x16xf32>
    %84 = arith.mulf %73, %20 : vector<2x16xf32>
    %85 = arith.addf %83, %84 : vector<2x16xf32>
    %86 = vector.extract_strided_slice %18 {offsets = [0, 4], sizes = [2, 4], strides = [1, 1]} : vector<2x32xf32> to vector<2x4xf32>
    %cst_48 = arith.constant dense<0.000000e+00> : vector<2x96xf32>
    %87 = tpu.matmul %86, %0, %cst_48 {dimension_numbers = #tpu.dot_dimension_numbers<[1], [0], [0], [1], [0, 0, 1, 1], [], []>} : vector<2x4xf32>, vector<4x96xf32>, vector<2x96xf32> -> vector<2x96xf32>
    %88 = vector.broadcast %2 : vector<1x96xf32> to vector<2x96xf32>
    %89 = arith.addf %87, %88 : vector<2x96xf32>
    %cst_49 = arith.constant dense<0.000000e+00> : vector<2x96xf32>
    %90 = tpu.matmul %53, %1, %cst_49 {dimension_numbers = #tpu.dot_dimension_numbers<[1], [0], [0], [1], [0, 0, 1, 1], [], []>} : vector<2x32xf32>, vector<32x96xf32>, vector<2x96xf32> -> vector<2x96xf32>
    %91 = vector.extract_strided_slice %89 {offsets = [0, 0], sizes = [2, 32], strides = [1, 1]} : vector<2x96xf32> to vector<2x32xf32>
    %92 = vector.extract_strided_slice %90 {offsets = [0, 0], sizes = [2, 32], strides = [1, 1]} : vector<2x96xf32> to vector<2x32xf32>
    %93 = arith.addf %91, %92 : vector<2x32xf32>
    %94 = arith.negf %93 : vector<2x32xf32>
    %95 = math.exp %94 : vector<2x32xf32>
    %cst_50 = arith.constant 1.000000e+00 : f32
    %96 = vector.broadcast %cst_50 : f32 to vector<2x32xf32>
    %97 = arith.addf %96, %95 : vector<2x32xf32>
    %98 = arith.divf %96, %97 : vector<2x32xf32>
    %99 = vector.extract_strided_slice %89 {offsets = [0, 32], sizes = [2, 32], strides = [1, 1]} : vector<2x96xf32> to vector<2x32xf32>
    %100 = vector.extract_strided_slice %90 {offsets = [0, 32], sizes = [2, 32], strides = [1, 1]} : vector<2x96xf32> to vector<2x32xf32>
    %101 = arith.addf %99, %100 : vector<2x32xf32>
    %102 = arith.negf %101 : vector<2x32xf32>
    %103 = math.exp %102 : vector<2x32xf32>
    %cst_51 = arith.constant 1.000000e+00 : f32
    %104 = vector.broadcast %cst_51 : f32 to vector<2x32xf32>
    %105 = arith.addf %104, %103 : vector<2x32xf32>
    %106 = arith.divf %104, %105 : vector<2x32xf32>
    %107 = vector.extract_strided_slice %89 {offsets = [0, 64], sizes = [2, 32], strides = [1, 1]} : vector<2x96xf32> to vector<2x32xf32>
    %108 = vector.extract_strided_slice %90 {offsets = [0, 64], sizes = [2, 32], strides = [1, 1]} : vector<2x96xf32> to vector<2x32xf32>
    %109 = vector.broadcast %3 : vector<1x32xf32> to vector<2x32xf32>
    %110 = arith.addf %108, %109 : vector<2x32xf32>
    %111 = arith.mulf %98, %110 : vector<2x32xf32>
    %112 = arith.addf %107, %111 : vector<2x32xf32>
    %113 = math.tanh %112 : vector<2x32xf32>
    %cst_52 = arith.constant 1.000000e+00 : f32
    %114 = vector.broadcast %cst_52 : f32 to vector<2x32xf32>
    %115 = arith.subf %114, %106 : vector<2x32xf32>
    %116 = arith.mulf %115, %113 : vector<2x32xf32>
    %117 = arith.mulf %106, %53 : vector<2x32xf32>
    %118 = arith.addf %116, %117 : vector<2x32xf32>
    %cst_53 = arith.constant dense<0.000000e+00> : vector<2x48xf32>
    %119 = tpu.matmul %118, %4, %cst_53 {dimension_numbers = #tpu.dot_dimension_numbers<[1], [0], [0], [1], [0, 0, 1, 1], [], []>} : vector<2x32xf32>, vector<32x48xf32>, vector<2x48xf32> -> vector<2x48xf32>
    %120 = vector.broadcast %6 : vector<1x48xf32> to vector<2x48xf32>
    %121 = arith.addf %119, %120 : vector<2x48xf32>
    %cst_54 = arith.constant dense<0.000000e+00> : vector<2x48xf32>
    %122 = tpu.matmul %85, %5, %cst_54 {dimension_numbers = #tpu.dot_dimension_numbers<[1], [0], [0], [1], [0, 0, 1, 1], [], []>} : vector<2x16xf32>, vector<16x48xf32>, vector<2x48xf32> -> vector<2x48xf32>
    %123 = vector.extract_strided_slice %121 {offsets = [0, 0], sizes = [2, 16], strides = [1, 1]} : vector<2x48xf32> to vector<2x16xf32>
    %124 = vector.extract_strided_slice %122 {offsets = [0, 0], sizes = [2, 16], strides = [1, 1]} : vector<2x48xf32> to vector<2x16xf32>
    %125 = arith.addf %123, %124 : vector<2x16xf32>
    %126 = arith.negf %125 : vector<2x16xf32>
    %127 = math.exp %126 : vector<2x16xf32>
    %cst_55 = arith.constant 1.000000e+00 : f32
    %128 = vector.broadcast %cst_55 : f32 to vector<2x16xf32>
    %129 = arith.addf %128, %127 : vector<2x16xf32>
    %130 = arith.divf %128, %129 : vector<2x16xf32>
    %131 = vector.extract_strided_slice %121 {offsets = [0, 16], sizes = [2, 16], strides = [1, 1]} : vector<2x48xf32> to vector<2x16xf32>
    %132 = vector.extract_strided_slice %122 {offsets = [0, 16], sizes = [2, 16], strides = [1, 1]} : vector<2x48xf32> to vector<2x16xf32>
    %133 = arith.addf %131, %132 : vector<2x16xf32>
    %134 = arith.negf %133 : vector<2x16xf32>
    %135 = math.exp %134 : vector<2x16xf32>
    %cst_56 = arith.constant 1.000000e+00 : f32
    %136 = vector.broadcast %cst_56 : f32 to vector<2x16xf32>
    %137 = arith.addf %136, %135 : vector<2x16xf32>
    %138 = arith.divf %136, %137 : vector<2x16xf32>
    %139 = vector.extract_strided_slice %121 {offsets = [0, 32], sizes = [2, 16], strides = [1, 1]} : vector<2x48xf32> to vector<2x16xf32>
    %140 = vector.extract_strided_slice %122 {offsets = [0, 32], sizes = [2, 16], strides = [1, 1]} : vector<2x48xf32> to vector<2x16xf32>
    %141 = vector.broadcast %7 : vector<1x16xf32> to vector<2x16xf32>
    %142 = arith.addf %140, %141 : vector<2x16xf32>
    %143 = arith.mulf %130, %142 : vector<2x16xf32>
    %144 = arith.addf %139, %143 : vector<2x16xf32>
    %145 = math.tanh %144 : vector<2x16xf32>
    %cst_57 = arith.constant 1.000000e+00 : f32
    %146 = vector.broadcast %cst_57 : f32 to vector<2x16xf32>
    %147 = arith.subf %146, %138 : vector<2x16xf32>
    %148 = arith.mulf %147, %145 : vector<2x16xf32>
    %149 = arith.mulf %138, %85 : vector<2x16xf32>
    %150 = arith.addf %148, %149 : vector<2x16xf32>
    %151 = vector.extract_strided_slice %18 {offsets = [0, 8], sizes = [2, 4], strides = [1, 1]} : vector<2x32xf32> to vector<2x4xf32>
    %cst_58 = arith.constant dense<0.000000e+00> : vector<2x96xf32>
    %152 = tpu.matmul %151, %0, %cst_58 {dimension_numbers = #tpu.dot_dimension_numbers<[1], [0], [0], [1], [0, 0, 1, 1], [], []>} : vector<2x4xf32>, vector<4x96xf32>, vector<2x96xf32> -> vector<2x96xf32>
    %153 = vector.broadcast %2 : vector<1x96xf32> to vector<2x96xf32>
    %154 = arith.addf %152, %153 : vector<2x96xf32>
    %cst_59 = arith.constant dense<0.000000e+00> : vector<2x96xf32>
    %155 = tpu.matmul %118, %1, %cst_59 {dimension_numbers = #tpu.dot_dimension_numbers<[1], [0], [0], [1], [0, 0, 1, 1], [], []>} : vector<2x32xf32>, vector<32x96xf32>, vector<2x96xf32> -> vector<2x96xf32>
    %156 = vector.extract_strided_slice %154 {offsets = [0, 0], sizes = [2, 32], strides = [1, 1]} : vector<2x96xf32> to vector<2x32xf32>
    %157 = vector.extract_strided_slice %155 {offsets = [0, 0], sizes = [2, 32], strides = [1, 1]} : vector<2x96xf32> to vector<2x32xf32>
    %158 = arith.addf %156, %157 : vector<2x32xf32>
    %159 = arith.negf %158 : vector<2x32xf32>
    %160 = math.exp %159 : vector<2x32xf32>
    %cst_60 = arith.constant 1.000000e+00 : f32
    %161 = vector.broadcast %cst_60 : f32 to vector<2x32xf32>
    %162 = arith.addf %161, %160 : vector<2x32xf32>
    %163 = arith.divf %161, %162 : vector<2x32xf32>
    %164 = vector.extract_strided_slice %154 {offsets = [0, 32], sizes = [2, 32], strides = [1, 1]} : vector<2x96xf32> to vector<2x32xf32>
    %165 = vector.extract_strided_slice %155 {offsets = [0, 32], sizes = [2, 32], strides = [1, 1]} : vector<2x96xf32> to vector<2x32xf32>
    %166 = arith.addf %164, %165 : vector<2x32xf32>
    %167 = arith.negf %166 : vector<2x32xf32>
    %168 = math.exp %167 : vector<2x32xf32>
    %cst_61 = arith.constant 1.000000e+00 : f32
    %169 = vector.broadcast %cst_61 : f32 to vector<2x32xf32>
    %170 = arith.addf %169, %168 : vector<2x32xf32>
    %171 = arith.divf %169, %170 : vector<2x32xf32>
    %172 = vector.extract_strided_slice %154 {offsets = [0, 64], sizes = [2, 32], strides = [1, 1]} : vector<2x96xf32> to vector<2x32xf32>
    %173 = vector.extract_strided_slice %155 {offsets = [0, 64], sizes = [2, 32], strides = [1, 1]} : vector<2x96xf32> to vector<2x32xf32>
    %174 = vector.broadcast %3 : vector<1x32xf32> to vector<2x32xf32>
    %175 = arith.addf %173, %174 : vector<2x32xf32>
    %176 = arith.mulf %163, %175 : vector<2x32xf32>
    %177 = arith.addf %172, %176 : vector<2x32xf32>
    %178 = math.tanh %177 : vector<2x32xf32>
    %cst_62 = arith.constant 1.000000e+00 : f32
    %179 = vector.broadcast %cst_62 : f32 to vector<2x32xf32>
    %180 = arith.subf %179, %171 : vector<2x32xf32>
    %181 = arith.mulf %180, %178 : vector<2x32xf32>
    %182 = arith.mulf %171, %118 : vector<2x32xf32>
    %183 = arith.addf %181, %182 : vector<2x32xf32>
    %cst_63 = arith.constant dense<0.000000e+00> : vector<2x48xf32>
    %184 = tpu.matmul %183, %4, %cst_63 {dimension_numbers = #tpu.dot_dimension_numbers<[1], [0], [0], [1], [0, 0, 1, 1], [], []>} : vector<2x32xf32>, vector<32x48xf32>, vector<2x48xf32> -> vector<2x48xf32>
    %185 = vector.broadcast %6 : vector<1x48xf32> to vector<2x48xf32>
    %186 = arith.addf %184, %185 : vector<2x48xf32>
    %cst_64 = arith.constant dense<0.000000e+00> : vector<2x48xf32>
    %187 = tpu.matmul %150, %5, %cst_64 {dimension_numbers = #tpu.dot_dimension_numbers<[1], [0], [0], [1], [0, 0, 1, 1], [], []>} : vector<2x16xf32>, vector<16x48xf32>, vector<2x48xf32> -> vector<2x48xf32>
    %188 = vector.extract_strided_slice %186 {offsets = [0, 0], sizes = [2, 16], strides = [1, 1]} : vector<2x48xf32> to vector<2x16xf32>
    %189 = vector.extract_strided_slice %187 {offsets = [0, 0], sizes = [2, 16], strides = [1, 1]} : vector<2x48xf32> to vector<2x16xf32>
    %190 = arith.addf %188, %189 : vector<2x16xf32>
    %191 = arith.negf %190 : vector<2x16xf32>
    %192 = math.exp %191 : vector<2x16xf32>
    %cst_65 = arith.constant 1.000000e+00 : f32
    %193 = vector.broadcast %cst_65 : f32 to vector<2x16xf32>
    %194 = arith.addf %193, %192 : vector<2x16xf32>
    %195 = arith.divf %193, %194 : vector<2x16xf32>
    %196 = vector.extract_strided_slice %186 {offsets = [0, 16], sizes = [2, 16], strides = [1, 1]} : vector<2x48xf32> to vector<2x16xf32>
    %197 = vector.extract_strided_slice %187 {offsets = [0, 16], sizes = [2, 16], strides = [1, 1]} : vector<2x48xf32> to vector<2x16xf32>
    %198 = arith.addf %196, %197 : vector<2x16xf32>
    %199 = arith.negf %198 : vector<2x16xf32>
    %200 = math.exp %199 : vector<2x16xf32>
    %cst_66 = arith.constant 1.000000e+00 : f32
    %201 = vector.broadcast %cst_66 : f32 to vector<2x16xf32>
    %202 = arith.addf %201, %200 : vector<2x16xf32>
    %203 = arith.divf %201, %202 : vector<2x16xf32>
    %204 = vector.extract_strided_slice %186 {offsets = [0, 32], sizes = [2, 16], strides = [1, 1]} : vector<2x48xf32> to vector<2x16xf32>
    %205 = vector.extract_strided_slice %187 {offsets = [0, 32], sizes = [2, 16], strides = [1, 1]} : vector<2x48xf32> to vector<2x16xf32>
    %206 = vector.broadcast %7 : vector<1x16xf32> to vector<2x16xf32>
    %207 = arith.addf %205, %206 : vector<2x16xf32>
    %208 = arith.mulf %195, %207 : vector<2x16xf32>
    %209 = arith.addf %204, %208 : vector<2x16xf32>
    %210 = math.tanh %209 : vector<2x16xf32>
    %cst_67 = arith.constant 1.000000e+00 : f32
    %211 = vector.broadcast %cst_67 : f32 to vector<2x16xf32>
    %212 = arith.subf %211, %203 : vector<2x16xf32>
    %213 = arith.mulf %212, %210 : vector<2x16xf32>
    %214 = arith.mulf %203, %150 : vector<2x16xf32>
    %215 = arith.addf %213, %214 : vector<2x16xf32>
    %216 = vector.extract_strided_slice %18 {offsets = [0, 12], sizes = [2, 4], strides = [1, 1]} : vector<2x32xf32> to vector<2x4xf32>
    %cst_68 = arith.constant dense<0.000000e+00> : vector<2x96xf32>
    %217 = tpu.matmul %216, %0, %cst_68 {dimension_numbers = #tpu.dot_dimension_numbers<[1], [0], [0], [1], [0, 0, 1, 1], [], []>} : vector<2x4xf32>, vector<4x96xf32>, vector<2x96xf32> -> vector<2x96xf32>
    %218 = vector.broadcast %2 : vector<1x96xf32> to vector<2x96xf32>
    %219 = arith.addf %217, %218 : vector<2x96xf32>
    %cst_69 = arith.constant dense<0.000000e+00> : vector<2x96xf32>
    %220 = tpu.matmul %183, %1, %cst_69 {dimension_numbers = #tpu.dot_dimension_numbers<[1], [0], [0], [1], [0, 0, 1, 1], [], []>} : vector<2x32xf32>, vector<32x96xf32>, vector<2x96xf32> -> vector<2x96xf32>
    %221 = vector.extract_strided_slice %219 {offsets = [0, 0], sizes = [2, 32], strides = [1, 1]} : vector<2x96xf32> to vector<2x32xf32>
    %222 = vector.extract_strided_slice %220 {offsets = [0, 0], sizes = [2, 32], strides = [1, 1]} : vector<2x96xf32> to vector<2x32xf32>
    %223 = arith.addf %221, %222 : vector<2x32xf32>
    %224 = arith.negf %223 : vector<2x32xf32>
    %225 = math.exp %224 : vector<2x32xf32>
    %cst_70 = arith.constant 1.000000e+00 : f32
    %226 = vector.broadcast %cst_70 : f32 to vector<2x32xf32>
    %227 = arith.addf %226, %225 : vector<2x32xf32>
    %228 = arith.divf %226, %227 : vector<2x32xf32>
    %229 = vector.extract_strided_slice %219 {offsets = [0, 32], sizes = [2, 32], strides = [1, 1]} : vector<2x96xf32> to vector<2x32xf32>
    %230 = vector.extract_strided_slice %220 {offsets = [0, 32], sizes = [2, 32], strides = [1, 1]} : vector<2x96xf32> to vector<2x32xf32>
    %231 = arith.addf %229, %230 : vector<2x32xf32>
    %232 = arith.negf %231 : vector<2x32xf32>
    %233 = math.exp %232 : vector<2x32xf32>
    %cst_71 = arith.constant 1.000000e+00 : f32
    %234 = vector.broadcast %cst_71 : f32 to vector<2x32xf32>
    %235 = arith.addf %234, %233 : vector<2x32xf32>
    %236 = arith.divf %234, %235 : vector<2x32xf32>
    %237 = vector.extract_strided_slice %219 {offsets = [0, 64], sizes = [2, 32], strides = [1, 1]} : vector<2x96xf32> to vector<2x32xf32>
    %238 = vector.extract_strided_slice %220 {offsets = [0, 64], sizes = [2, 32], strides = [1, 1]} : vector<2x96xf32> to vector<2x32xf32>
    %239 = vector.broadcast %3 : vector<1x32xf32> to vector<2x32xf32>
    %240 = arith.addf %238, %239 : vector<2x32xf32>
    %241 = arith.mulf %228, %240 : vector<2x32xf32>
    %242 = arith.addf %237, %241 : vector<2x32xf32>
    %243 = math.tanh %242 : vector<2x32xf32>
    %cst_72 = arith.constant 1.000000e+00 : f32
    %244 = vector.broadcast %cst_72 : f32 to vector<2x32xf32>
    %245 = arith.subf %244, %236 : vector<2x32xf32>
    %246 = arith.mulf %245, %243 : vector<2x32xf32>
    %247 = arith.mulf %236, %183 : vector<2x32xf32>
    %248 = arith.addf %246, %247 : vector<2x32xf32>
    %cst_73 = arith.constant dense<0.000000e+00> : vector<2x48xf32>
    %249 = tpu.matmul %248, %4, %cst_73 {dimension_numbers = #tpu.dot_dimension_numbers<[1], [0], [0], [1], [0, 0, 1, 1], [], []>} : vector<2x32xf32>, vector<32x48xf32>, vector<2x48xf32> -> vector<2x48xf32>
    %250 = vector.broadcast %6 : vector<1x48xf32> to vector<2x48xf32>
    %251 = arith.addf %249, %250 : vector<2x48xf32>
    %cst_74 = arith.constant dense<0.000000e+00> : vector<2x48xf32>
    %252 = tpu.matmul %215, %5, %cst_74 {dimension_numbers = #tpu.dot_dimension_numbers<[1], [0], [0], [1], [0, 0, 1, 1], [], []>} : vector<2x16xf32>, vector<16x48xf32>, vector<2x48xf32> -> vector<2x48xf32>
    %253 = vector.extract_strided_slice %251 {offsets = [0, 0], sizes = [2, 16], strides = [1, 1]} : vector<2x48xf32> to vector<2x16xf32>
    %254 = vector.extract_strided_slice %252 {offsets = [0, 0], sizes = [2, 16], strides = [1, 1]} : vector<2x48xf32> to vector<2x16xf32>
    %255 = arith.addf %253, %254 : vector<2x16xf32>
    %256 = arith.negf %255 : vector<2x16xf32>
    %257 = math.exp %256 : vector<2x16xf32>
    %cst_75 = arith.constant 1.000000e+00 : f32
    %258 = vector.broadcast %cst_75 : f32 to vector<2x16xf32>
    %259 = arith.addf %258, %257 : vector<2x16xf32>
    %260 = arith.divf %258, %259 : vector<2x16xf32>
    %261 = vector.extract_strided_slice %251 {offsets = [0, 16], sizes = [2, 16], strides = [1, 1]} : vector<2x48xf32> to vector<2x16xf32>
    %262 = vector.extract_strided_slice %252 {offsets = [0, 16], sizes = [2, 16], strides = [1, 1]} : vector<2x48xf32> to vector<2x16xf32>
    %263 = arith.addf %261, %262 : vector<2x16xf32>
    %264 = arith.negf %263 : vector<2x16xf32>
    %265 = math.exp %264 : vector<2x16xf32>
    %cst_76 = arith.constant 1.000000e+00 : f32
    %266 = vector.broadcast %cst_76 : f32 to vector<2x16xf32>
    %267 = arith.addf %266, %265 : vector<2x16xf32>
    %268 = arith.divf %266, %267 : vector<2x16xf32>
    %269 = vector.extract_strided_slice %251 {offsets = [0, 32], sizes = [2, 16], strides = [1, 1]} : vector<2x48xf32> to vector<2x16xf32>
    %270 = vector.extract_strided_slice %252 {offsets = [0, 32], sizes = [2, 16], strides = [1, 1]} : vector<2x48xf32> to vector<2x16xf32>
    %271 = vector.broadcast %7 : vector<1x16xf32> to vector<2x16xf32>
    %272 = arith.addf %270, %271 : vector<2x16xf32>
    %273 = arith.mulf %260, %272 : vector<2x16xf32>
    %274 = arith.addf %269, %273 : vector<2x16xf32>
    %275 = math.tanh %274 : vector<2x16xf32>
    %cst_77 = arith.constant 1.000000e+00 : f32
    %276 = vector.broadcast %cst_77 : f32 to vector<2x16xf32>
    %277 = arith.subf %276, %268 : vector<2x16xf32>
    %278 = arith.mulf %277, %275 : vector<2x16xf32>
    %279 = arith.mulf %268, %215 : vector<2x16xf32>
    %280 = arith.addf %278, %279 : vector<2x16xf32>
    %281 = vector.extract_strided_slice %18 {offsets = [0, 16], sizes = [2, 4], strides = [1, 1]} : vector<2x32xf32> to vector<2x4xf32>
    %cst_78 = arith.constant dense<0.000000e+00> : vector<2x96xf32>
    %282 = tpu.matmul %281, %0, %cst_78 {dimension_numbers = #tpu.dot_dimension_numbers<[1], [0], [0], [1], [0, 0, 1, 1], [], []>} : vector<2x4xf32>, vector<4x96xf32>, vector<2x96xf32> -> vector<2x96xf32>
    %283 = vector.broadcast %2 : vector<1x96xf32> to vector<2x96xf32>
    %284 = arith.addf %282, %283 : vector<2x96xf32>
    %cst_79 = arith.constant dense<0.000000e+00> : vector<2x96xf32>
    %285 = tpu.matmul %248, %1, %cst_79 {dimension_numbers = #tpu.dot_dimension_numbers<[1], [0], [0], [1], [0, 0, 1, 1], [], []>} : vector<2x32xf32>, vector<32x96xf32>, vector<2x96xf32> -> vector<2x96xf32>
    %286 = vector.extract_strided_slice %284 {offsets = [0, 0], sizes = [2, 32], strides = [1, 1]} : vector<2x96xf32> to vector<2x32xf32>
    %287 = vector.extract_strided_slice %285 {offsets = [0, 0], sizes = [2, 32], strides = [1, 1]} : vector<2x96xf32> to vector<2x32xf32>
    %288 = arith.addf %286, %287 : vector<2x32xf32>
    %289 = arith.negf %288 : vector<2x32xf32>
    %290 = math.exp %289 : vector<2x32xf32>
    %cst_80 = arith.constant 1.000000e+00 : f32
    %291 = vector.broadcast %cst_80 : f32 to vector<2x32xf32>
    %292 = arith.addf %291, %290 : vector<2x32xf32>
    %293 = arith.divf %291, %292 : vector<2x32xf32>
    %294 = vector.extract_strided_slice %284 {offsets = [0, 32], sizes = [2, 32], strides = [1, 1]} : vector<2x96xf32> to vector<2x32xf32>
    %295 = vector.extract_strided_slice %285 {offsets = [0, 32], sizes = [2, 32], strides = [1, 1]} : vector<2x96xf32> to vector<2x32xf32>
    %296 = arith.addf %294, %295 : vector<2x32xf32>
    %297 = arith.negf %296 : vector<2x32xf32>
    %298 = math.exp %297 : vector<2x32xf32>
    %cst_81 = arith.constant 1.000000e+00 : f32
    %299 = vector.broadcast %cst_81 : f32 to vector<2x32xf32>
    %300 = arith.addf %299, %298 : vector<2x32xf32>
    %301 = arith.divf %299, %300 : vector<2x32xf32>
    %302 = vector.extract_strided_slice %284 {offsets = [0, 64], sizes = [2, 32], strides = [1, 1]} : vector<2x96xf32> to vector<2x32xf32>
    %303 = vector.extract_strided_slice %285 {offsets = [0, 64], sizes = [2, 32], strides = [1, 1]} : vector<2x96xf32> to vector<2x32xf32>
    %304 = vector.broadcast %3 : vector<1x32xf32> to vector<2x32xf32>
    %305 = arith.addf %303, %304 : vector<2x32xf32>
    %306 = arith.mulf %293, %305 : vector<2x32xf32>
    %307 = arith.addf %302, %306 : vector<2x32xf32>
    %308 = math.tanh %307 : vector<2x32xf32>
    %cst_82 = arith.constant 1.000000e+00 : f32
    %309 = vector.broadcast %cst_82 : f32 to vector<2x32xf32>
    %310 = arith.subf %309, %301 : vector<2x32xf32>
    %311 = arith.mulf %310, %308 : vector<2x32xf32>
    %312 = arith.mulf %301, %248 : vector<2x32xf32>
    %313 = arith.addf %311, %312 : vector<2x32xf32>
    %cst_83 = arith.constant dense<0.000000e+00> : vector<2x48xf32>
    %314 = tpu.matmul %313, %4, %cst_83 {dimension_numbers = #tpu.dot_dimension_numbers<[1], [0], [0], [1], [0, 0, 1, 1], [], []>} : vector<2x32xf32>, vector<32x48xf32>, vector<2x48xf32> -> vector<2x48xf32>
    %315 = vector.broadcast %6 : vector<1x48xf32> to vector<2x48xf32>
    %316 = arith.addf %314, %315 : vector<2x48xf32>
    %cst_84 = arith.constant dense<0.000000e+00> : vector<2x48xf32>
    %317 = tpu.matmul %280, %5, %cst_84 {dimension_numbers = #tpu.dot_dimension_numbers<[1], [0], [0], [1], [0, 0, 1, 1], [], []>} : vector<2x16xf32>, vector<16x48xf32>, vector<2x48xf32> -> vector<2x48xf32>
    %318 = vector.extract_strided_slice %316 {offsets = [0, 0], sizes = [2, 16], strides = [1, 1]} : vector<2x48xf32> to vector<2x16xf32>
    %319 = vector.extract_strided_slice %317 {offsets = [0, 0], sizes = [2, 16], strides = [1, 1]} : vector<2x48xf32> to vector<2x16xf32>
    %320 = arith.addf %318, %319 : vector<2x16xf32>
    %321 = arith.negf %320 : vector<2x16xf32>
    %322 = math.exp %321 : vector<2x16xf32>
    %cst_85 = arith.constant 1.000000e+00 : f32
    %323 = vector.broadcast %cst_85 : f32 to vector<2x16xf32>
    %324 = arith.addf %323, %322 : vector<2x16xf32>
    %325 = arith.divf %323, %324 : vector<2x16xf32>
    %326 = vector.extract_strided_slice %316 {offsets = [0, 16], sizes = [2, 16], strides = [1, 1]} : vector<2x48xf32> to vector<2x16xf32>
    %327 = vector.extract_strided_slice %317 {offsets = [0, 16], sizes = [2, 16], strides = [1, 1]} : vector<2x48xf32> to vector<2x16xf32>
    %328 = arith.addf %326, %327 : vector<2x16xf32>
    %329 = arith.negf %328 : vector<2x16xf32>
    %330 = math.exp %329 : vector<2x16xf32>
    %cst_86 = arith.constant 1.000000e+00 : f32
    %331 = vector.broadcast %cst_86 : f32 to vector<2x16xf32>
    %332 = arith.addf %331, %330 : vector<2x16xf32>
    %333 = arith.divf %331, %332 : vector<2x16xf32>
    %334 = vector.extract_strided_slice %316 {offsets = [0, 32], sizes = [2, 16], strides = [1, 1]} : vector<2x48xf32> to vector<2x16xf32>
    %335 = vector.extract_strided_slice %317 {offsets = [0, 32], sizes = [2, 16], strides = [1, 1]} : vector<2x48xf32> to vector<2x16xf32>
    %336 = vector.broadcast %7 : vector<1x16xf32> to vector<2x16xf32>
    %337 = arith.addf %335, %336 : vector<2x16xf32>
    %338 = arith.mulf %325, %337 : vector<2x16xf32>
    %339 = arith.addf %334, %338 : vector<2x16xf32>
    %340 = math.tanh %339 : vector<2x16xf32>
    %cst_87 = arith.constant 1.000000e+00 : f32
    %341 = vector.broadcast %cst_87 : f32 to vector<2x16xf32>
    %342 = arith.subf %341, %333 : vector<2x16xf32>
    %343 = arith.mulf %342, %340 : vector<2x16xf32>
    %344 = arith.mulf %333, %280 : vector<2x16xf32>
    %345 = arith.addf %343, %344 : vector<2x16xf32>
    %346 = vector.extract_strided_slice %18 {offsets = [0, 20], sizes = [2, 4], strides = [1, 1]} : vector<2x32xf32> to vector<2x4xf32>
    %cst_88 = arith.constant dense<0.000000e+00> : vector<2x96xf32>
    %347 = tpu.matmul %346, %0, %cst_88 {dimension_numbers = #tpu.dot_dimension_numbers<[1], [0], [0], [1], [0, 0, 1, 1], [], []>} : vector<2x4xf32>, vector<4x96xf32>, vector<2x96xf32> -> vector<2x96xf32>
    %348 = vector.broadcast %2 : vector<1x96xf32> to vector<2x96xf32>
    %349 = arith.addf %347, %348 : vector<2x96xf32>
    %cst_89 = arith.constant dense<0.000000e+00> : vector<2x96xf32>
    %350 = tpu.matmul %313, %1, %cst_89 {dimension_numbers = #tpu.dot_dimension_numbers<[1], [0], [0], [1], [0, 0, 1, 1], [], []>} : vector<2x32xf32>, vector<32x96xf32>, vector<2x96xf32> -> vector<2x96xf32>
    %351 = vector.extract_strided_slice %349 {offsets = [0, 0], sizes = [2, 32], strides = [1, 1]} : vector<2x96xf32> to vector<2x32xf32>
    %352 = vector.extract_strided_slice %350 {offsets = [0, 0], sizes = [2, 32], strides = [1, 1]} : vector<2x96xf32> to vector<2x32xf32>
    %353 = arith.addf %351, %352 : vector<2x32xf32>
    %354 = arith.negf %353 : vector<2x32xf32>
    %355 = math.exp %354 : vector<2x32xf32>
    %cst_90 = arith.constant 1.000000e+00 : f32
    %356 = vector.broadcast %cst_90 : f32 to vector<2x32xf32>
    %357 = arith.addf %356, %355 : vector<2x32xf32>
    %358 = arith.divf %356, %357 : vector<2x32xf32>
    %359 = vector.extract_strided_slice %349 {offsets = [0, 32], sizes = [2, 32], strides = [1, 1]} : vector<2x96xf32> to vector<2x32xf32>
    %360 = vector.extract_strided_slice %350 {offsets = [0, 32], sizes = [2, 32], strides = [1, 1]} : vector<2x96xf32> to vector<2x32xf32>
    %361 = arith.addf %359, %360 : vector<2x32xf32>
    %362 = arith.negf %361 : vector<2x32xf32>
    %363 = math.exp %362 : vector<2x32xf32>
    %cst_91 = arith.constant 1.000000e+00 : f32
    %364 = vector.broadcast %cst_91 : f32 to vector<2x32xf32>
    %365 = arith.addf %364, %363 : vector<2x32xf32>
    %366 = arith.divf %364, %365 : vector<2x32xf32>
    %367 = vector.extract_strided_slice %349 {offsets = [0, 64], sizes = [2, 32], strides = [1, 1]} : vector<2x96xf32> to vector<2x32xf32>
    %368 = vector.extract_strided_slice %350 {offsets = [0, 64], sizes = [2, 32], strides = [1, 1]} : vector<2x96xf32> to vector<2x32xf32>
    %369 = vector.broadcast %3 : vector<1x32xf32> to vector<2x32xf32>
    %370 = arith.addf %368, %369 : vector<2x32xf32>
    %371 = arith.mulf %358, %370 : vector<2x32xf32>
    %372 = arith.addf %367, %371 : vector<2x32xf32>
    %373 = math.tanh %372 : vector<2x32xf32>
    %cst_92 = arith.constant 1.000000e+00 : f32
    %374 = vector.broadcast %cst_92 : f32 to vector<2x32xf32>
    %375 = arith.subf %374, %366 : vector<2x32xf32>
    %376 = arith.mulf %375, %373 : vector<2x32xf32>
    %377 = arith.mulf %366, %313 : vector<2x32xf32>
    %378 = arith.addf %376, %377 : vector<2x32xf32>
    %cst_93 = arith.constant dense<0.000000e+00> : vector<2x48xf32>
    %379 = tpu.matmul %378, %4, %cst_93 {dimension_numbers = #tpu.dot_dimension_numbers<[1], [0], [0], [1], [0, 0, 1, 1], [], []>} : vector<2x32xf32>, vector<32x48xf32>, vector<2x48xf32> -> vector<2x48xf32>
    %380 = vector.broadcast %6 : vector<1x48xf32> to vector<2x48xf32>
    %381 = arith.addf %379, %380 : vector<2x48xf32>
    %cst_94 = arith.constant dense<0.000000e+00> : vector<2x48xf32>
    %382 = tpu.matmul %345, %5, %cst_94 {dimension_numbers = #tpu.dot_dimension_numbers<[1], [0], [0], [1], [0, 0, 1, 1], [], []>} : vector<2x16xf32>, vector<16x48xf32>, vector<2x48xf32> -> vector<2x48xf32>
    %383 = vector.extract_strided_slice %381 {offsets = [0, 0], sizes = [2, 16], strides = [1, 1]} : vector<2x48xf32> to vector<2x16xf32>
    %384 = vector.extract_strided_slice %382 {offsets = [0, 0], sizes = [2, 16], strides = [1, 1]} : vector<2x48xf32> to vector<2x16xf32>
    %385 = arith.addf %383, %384 : vector<2x16xf32>
    %386 = arith.negf %385 : vector<2x16xf32>
    %387 = math.exp %386 : vector<2x16xf32>
    %cst_95 = arith.constant 1.000000e+00 : f32
    %388 = vector.broadcast %cst_95 : f32 to vector<2x16xf32>
    %389 = arith.addf %388, %387 : vector<2x16xf32>
    %390 = arith.divf %388, %389 : vector<2x16xf32>
    %391 = vector.extract_strided_slice %381 {offsets = [0, 16], sizes = [2, 16], strides = [1, 1]} : vector<2x48xf32> to vector<2x16xf32>
    %392 = vector.extract_strided_slice %382 {offsets = [0, 16], sizes = [2, 16], strides = [1, 1]} : vector<2x48xf32> to vector<2x16xf32>
    %393 = arith.addf %391, %392 : vector<2x16xf32>
    %394 = arith.negf %393 : vector<2x16xf32>
    %395 = math.exp %394 : vector<2x16xf32>
    %cst_96 = arith.constant 1.000000e+00 : f32
    %396 = vector.broadcast %cst_96 : f32 to vector<2x16xf32>
    %397 = arith.addf %396, %395 : vector<2x16xf32>
    %398 = arith.divf %396, %397 : vector<2x16xf32>
    %399 = vector.extract_strided_slice %381 {offsets = [0, 32], sizes = [2, 16], strides = [1, 1]} : vector<2x48xf32> to vector<2x16xf32>
    %400 = vector.extract_strided_slice %382 {offsets = [0, 32], sizes = [2, 16], strides = [1, 1]} : vector<2x48xf32> to vector<2x16xf32>
    %401 = vector.broadcast %7 : vector<1x16xf32> to vector<2x16xf32>
    %402 = arith.addf %400, %401 : vector<2x16xf32>
    %403 = arith.mulf %390, %402 : vector<2x16xf32>
    %404 = arith.addf %399, %403 : vector<2x16xf32>
    %405 = math.tanh %404 : vector<2x16xf32>
    %cst_97 = arith.constant 1.000000e+00 : f32
    %406 = vector.broadcast %cst_97 : f32 to vector<2x16xf32>
    %407 = arith.subf %406, %398 : vector<2x16xf32>
    %408 = arith.mulf %407, %405 : vector<2x16xf32>
    %409 = arith.mulf %398, %345 : vector<2x16xf32>
    %410 = arith.addf %408, %409 : vector<2x16xf32>
    %411 = vector.extract_strided_slice %18 {offsets = [0, 24], sizes = [2, 4], strides = [1, 1]} : vector<2x32xf32> to vector<2x4xf32>
    %cst_98 = arith.constant dense<0.000000e+00> : vector<2x96xf32>
    %412 = tpu.matmul %411, %0, %cst_98 {dimension_numbers = #tpu.dot_dimension_numbers<[1], [0], [0], [1], [0, 0, 1, 1], [], []>} : vector<2x4xf32>, vector<4x96xf32>, vector<2x96xf32> -> vector<2x96xf32>
    %413 = vector.broadcast %2 : vector<1x96xf32> to vector<2x96xf32>
    %414 = arith.addf %412, %413 : vector<2x96xf32>
    %cst_99 = arith.constant dense<0.000000e+00> : vector<2x96xf32>
    %415 = tpu.matmul %378, %1, %cst_99 {dimension_numbers = #tpu.dot_dimension_numbers<[1], [0], [0], [1], [0, 0, 1, 1], [], []>} : vector<2x32xf32>, vector<32x96xf32>, vector<2x96xf32> -> vector<2x96xf32>
    %416 = vector.extract_strided_slice %414 {offsets = [0, 0], sizes = [2, 32], strides = [1, 1]} : vector<2x96xf32> to vector<2x32xf32>
    %417 = vector.extract_strided_slice %415 {offsets = [0, 0], sizes = [2, 32], strides = [1, 1]} : vector<2x96xf32> to vector<2x32xf32>
    %418 = arith.addf %416, %417 : vector<2x32xf32>
    %419 = arith.negf %418 : vector<2x32xf32>
    %420 = math.exp %419 : vector<2x32xf32>
    %cst_100 = arith.constant 1.000000e+00 : f32
    %421 = vector.broadcast %cst_100 : f32 to vector<2x32xf32>
    %422 = arith.addf %421, %420 : vector<2x32xf32>
    %423 = arith.divf %421, %422 : vector<2x32xf32>
    %424 = vector.extract_strided_slice %414 {offsets = [0, 32], sizes = [2, 32], strides = [1, 1]} : vector<2x96xf32> to vector<2x32xf32>
    %425 = vector.extract_strided_slice %415 {offsets = [0, 32], sizes = [2, 32], strides = [1, 1]} : vector<2x96xf32> to vector<2x32xf32>
    %426 = arith.addf %424, %425 : vector<2x32xf32>
    %427 = arith.negf %426 : vector<2x32xf32>
    %428 = math.exp %427 : vector<2x32xf32>
    %cst_101 = arith.constant 1.000000e+00 : f32
    %429 = vector.broadcast %cst_101 : f32 to vector<2x32xf32>
    %430 = arith.addf %429, %428 : vector<2x32xf32>
    %431 = arith.divf %429, %430 : vector<2x32xf32>
    %432 = vector.extract_strided_slice %414 {offsets = [0, 64], sizes = [2, 32], strides = [1, 1]} : vector<2x96xf32> to vector<2x32xf32>
    %433 = vector.extract_strided_slice %415 {offsets = [0, 64], sizes = [2, 32], strides = [1, 1]} : vector<2x96xf32> to vector<2x32xf32>
    %434 = vector.broadcast %3 : vector<1x32xf32> to vector<2x32xf32>
    %435 = arith.addf %433, %434 : vector<2x32xf32>
    %436 = arith.mulf %423, %435 : vector<2x32xf32>
    %437 = arith.addf %432, %436 : vector<2x32xf32>
    %438 = math.tanh %437 : vector<2x32xf32>
    %cst_102 = arith.constant 1.000000e+00 : f32
    %439 = vector.broadcast %cst_102 : f32 to vector<2x32xf32>
    %440 = arith.subf %439, %431 : vector<2x32xf32>
    %441 = arith.mulf %440, %438 : vector<2x32xf32>
    %442 = arith.mulf %431, %378 : vector<2x32xf32>
    %443 = arith.addf %441, %442 : vector<2x32xf32>
    %cst_103 = arith.constant dense<0.000000e+00> : vector<2x48xf32>
    %444 = tpu.matmul %443, %4, %cst_103 {dimension_numbers = #tpu.dot_dimension_numbers<[1], [0], [0], [1], [0, 0, 1, 1], [], []>} : vector<2x32xf32>, vector<32x48xf32>, vector<2x48xf32> -> vector<2x48xf32>
    %445 = vector.broadcast %6 : vector<1x48xf32> to vector<2x48xf32>
    %446 = arith.addf %444, %445 : vector<2x48xf32>
    %cst_104 = arith.constant dense<0.000000e+00> : vector<2x48xf32>
    %447 = tpu.matmul %410, %5, %cst_104 {dimension_numbers = #tpu.dot_dimension_numbers<[1], [0], [0], [1], [0, 0, 1, 1], [], []>} : vector<2x16xf32>, vector<16x48xf32>, vector<2x48xf32> -> vector<2x48xf32>
    %448 = vector.extract_strided_slice %446 {offsets = [0, 0], sizes = [2, 16], strides = [1, 1]} : vector<2x48xf32> to vector<2x16xf32>
    %449 = vector.extract_strided_slice %447 {offsets = [0, 0], sizes = [2, 16], strides = [1, 1]} : vector<2x48xf32> to vector<2x16xf32>
    %450 = arith.addf %448, %449 : vector<2x16xf32>
    %451 = arith.negf %450 : vector<2x16xf32>
    %452 = math.exp %451 : vector<2x16xf32>
    %cst_105 = arith.constant 1.000000e+00 : f32
    %453 = vector.broadcast %cst_105 : f32 to vector<2x16xf32>
    %454 = arith.addf %453, %452 : vector<2x16xf32>
    %455 = arith.divf %453, %454 : vector<2x16xf32>
    %456 = vector.extract_strided_slice %446 {offsets = [0, 16], sizes = [2, 16], strides = [1, 1]} : vector<2x48xf32> to vector<2x16xf32>
    %457 = vector.extract_strided_slice %447 {offsets = [0, 16], sizes = [2, 16], strides = [1, 1]} : vector<2x48xf32> to vector<2x16xf32>
    %458 = arith.addf %456, %457 : vector<2x16xf32>
    %459 = arith.negf %458 : vector<2x16xf32>
    %460 = math.exp %459 : vector<2x16xf32>
    %cst_106 = arith.constant 1.000000e+00 : f32
    %461 = vector.broadcast %cst_106 : f32 to vector<2x16xf32>
    %462 = arith.addf %461, %460 : vector<2x16xf32>
    %463 = arith.divf %461, %462 : vector<2x16xf32>
    %464 = vector.extract_strided_slice %446 {offsets = [0, 32], sizes = [2, 16], strides = [1, 1]} : vector<2x48xf32> to vector<2x16xf32>
    %465 = vector.extract_strided_slice %447 {offsets = [0, 32], sizes = [2, 16], strides = [1, 1]} : vector<2x48xf32> to vector<2x16xf32>
    %466 = vector.broadcast %7 : vector<1x16xf32> to vector<2x16xf32>
    %467 = arith.addf %465, %466 : vector<2x16xf32>
    %468 = arith.mulf %455, %467 : vector<2x16xf32>
    %469 = arith.addf %464, %468 : vector<2x16xf32>
    %470 = math.tanh %469 : vector<2x16xf32>
    %cst_107 = arith.constant 1.000000e+00 : f32
    %471 = vector.broadcast %cst_107 : f32 to vector<2x16xf32>
    %472 = arith.subf %471, %463 : vector<2x16xf32>
    %473 = arith.mulf %472, %470 : vector<2x16xf32>
    %474 = arith.mulf %463, %410 : vector<2x16xf32>
    %475 = arith.addf %473, %474 : vector<2x16xf32>
    %476 = vector.extract_strided_slice %18 {offsets = [0, 28], sizes = [2, 4], strides = [1, 1]} : vector<2x32xf32> to vector<2x4xf32>
    %cst_108 = arith.constant dense<0.000000e+00> : vector<2x96xf32>
    %477 = tpu.matmul %476, %0, %cst_108 {dimension_numbers = #tpu.dot_dimension_numbers<[1], [0], [0], [1], [0, 0, 1, 1], [], []>} : vector<2x4xf32>, vector<4x96xf32>, vector<2x96xf32> -> vector<2x96xf32>
    %478 = vector.broadcast %2 : vector<1x96xf32> to vector<2x96xf32>
    %479 = arith.addf %477, %478 : vector<2x96xf32>
    %cst_109 = arith.constant dense<0.000000e+00> : vector<2x96xf32>
    %480 = tpu.matmul %443, %1, %cst_109 {dimension_numbers = #tpu.dot_dimension_numbers<[1], [0], [0], [1], [0, 0, 1, 1], [], []>} : vector<2x32xf32>, vector<32x96xf32>, vector<2x96xf32> -> vector<2x96xf32>
    %481 = vector.extract_strided_slice %479 {offsets = [0, 0], sizes = [2, 32], strides = [1, 1]} : vector<2x96xf32> to vector<2x32xf32>
    %482 = vector.extract_strided_slice %480 {offsets = [0, 0], sizes = [2, 32], strides = [1, 1]} : vector<2x96xf32> to vector<2x32xf32>
    %483 = arith.addf %481, %482 : vector<2x32xf32>
    %484 = arith.negf %483 : vector<2x32xf32>
    %485 = math.exp %484 : vector<2x32xf32>
    %cst_110 = arith.constant 1.000000e+00 : f32
    %486 = vector.broadcast %cst_110 : f32 to vector<2x32xf32>
    %487 = arith.addf %486, %485 : vector<2x32xf32>
    %488 = arith.divf %486, %487 : vector<2x32xf32>
    %489 = vector.extract_strided_slice %479 {offsets = [0, 32], sizes = [2, 32], strides = [1, 1]} : vector<2x96xf32> to vector<2x32xf32>
    %490 = vector.extract_strided_slice %480 {offsets = [0, 32], sizes = [2, 32], strides = [1, 1]} : vector<2x96xf32> to vector<2x32xf32>
    %491 = arith.addf %489, %490 : vector<2x32xf32>
    %492 = arith.negf %491 : vector<2x32xf32>
    %493 = math.exp %492 : vector<2x32xf32>
    %cst_111 = arith.constant 1.000000e+00 : f32
    %494 = vector.broadcast %cst_111 : f32 to vector<2x32xf32>
    %495 = arith.addf %494, %493 : vector<2x32xf32>
    %496 = arith.divf %494, %495 : vector<2x32xf32>
    %497 = vector.extract_strided_slice %479 {offsets = [0, 64], sizes = [2, 32], strides = [1, 1]} : vector<2x96xf32> to vector<2x32xf32>
    %498 = vector.extract_strided_slice %480 {offsets = [0, 64], sizes = [2, 32], strides = [1, 1]} : vector<2x96xf32> to vector<2x32xf32>
    %499 = vector.broadcast %3 : vector<1x32xf32> to vector<2x32xf32>
    %500 = arith.addf %498, %499 : vector<2x32xf32>
    %501 = arith.mulf %488, %500 : vector<2x32xf32>
    %502 = arith.addf %497, %501 : vector<2x32xf32>
    %503 = math.tanh %502 : vector<2x32xf32>
    %cst_112 = arith.constant 1.000000e+00 : f32
    %504 = vector.broadcast %cst_112 : f32 to vector<2x32xf32>
    %505 = arith.subf %504, %496 : vector<2x32xf32>
    %506 = arith.mulf %505, %503 : vector<2x32xf32>
    %507 = arith.mulf %496, %443 : vector<2x32xf32>
    %508 = arith.addf %506, %507 : vector<2x32xf32>
    %cst_113 = arith.constant dense<0.000000e+00> : vector<2x48xf32>
    %509 = tpu.matmul %508, %4, %cst_113 {dimension_numbers = #tpu.dot_dimension_numbers<[1], [0], [0], [1], [0, 0, 1, 1], [], []>} : vector<2x32xf32>, vector<32x48xf32>, vector<2x48xf32> -> vector<2x48xf32>
    %510 = vector.broadcast %6 : vector<1x48xf32> to vector<2x48xf32>
    %511 = arith.addf %509, %510 : vector<2x48xf32>
    %cst_114 = arith.constant dense<0.000000e+00> : vector<2x48xf32>
    %512 = tpu.matmul %475, %5, %cst_114 {dimension_numbers = #tpu.dot_dimension_numbers<[1], [0], [0], [1], [0, 0, 1, 1], [], []>} : vector<2x16xf32>, vector<16x48xf32>, vector<2x48xf32> -> vector<2x48xf32>
    %513 = vector.extract_strided_slice %511 {offsets = [0, 0], sizes = [2, 16], strides = [1, 1]} : vector<2x48xf32> to vector<2x16xf32>
    %514 = vector.extract_strided_slice %512 {offsets = [0, 0], sizes = [2, 16], strides = [1, 1]} : vector<2x48xf32> to vector<2x16xf32>
    %515 = arith.addf %513, %514 : vector<2x16xf32>
    %516 = arith.negf %515 : vector<2x16xf32>
    %517 = math.exp %516 : vector<2x16xf32>
    %cst_115 = arith.constant 1.000000e+00 : f32
    %518 = vector.broadcast %cst_115 : f32 to vector<2x16xf32>
    %519 = arith.addf %518, %517 : vector<2x16xf32>
    %520 = arith.divf %518, %519 : vector<2x16xf32>
    %521 = vector.extract_strided_slice %511 {offsets = [0, 16], sizes = [2, 16], strides = [1, 1]} : vector<2x48xf32> to vector<2x16xf32>
    %522 = vector.extract_strided_slice %512 {offsets = [0, 16], sizes = [2, 16], strides = [1, 1]} : vector<2x48xf32> to vector<2x16xf32>
    %523 = arith.addf %521, %522 : vector<2x16xf32>
    %524 = arith.negf %523 : vector<2x16xf32>
    %525 = math.exp %524 : vector<2x16xf32>
    %cst_116 = arith.constant 1.000000e+00 : f32
    %526 = vector.broadcast %cst_116 : f32 to vector<2x16xf32>
    %527 = arith.addf %526, %525 : vector<2x16xf32>
    %528 = arith.divf %526, %527 : vector<2x16xf32>
    %529 = vector.extract_strided_slice %511 {offsets = [0, 32], sizes = [2, 16], strides = [1, 1]} : vector<2x48xf32> to vector<2x16xf32>
    %530 = vector.extract_strided_slice %512 {offsets = [0, 32], sizes = [2, 16], strides = [1, 1]} : vector<2x48xf32> to vector<2x16xf32>
    %531 = vector.broadcast %7 : vector<1x16xf32> to vector<2x16xf32>
    %532 = arith.addf %530, %531 : vector<2x16xf32>
    %533 = arith.mulf %520, %532 : vector<2x16xf32>
    %534 = arith.addf %529, %533 : vector<2x16xf32>
    %535 = math.tanh %534 : vector<2x16xf32>
    %cst_117 = arith.constant 1.000000e+00 : f32
    %536 = vector.broadcast %cst_117 : f32 to vector<2x16xf32>
    %537 = arith.subf %536, %528 : vector<2x16xf32>
    %538 = arith.mulf %537, %535 : vector<2x16xf32>
    %539 = arith.mulf %528, %475 : vector<2x16xf32>
    %540 = arith.addf %538, %539 : vector<2x16xf32>
    %cst_118 = arith.constant dense<0.000000e+00> : vector<2x48xf32>
    %541 = tpu.matmul %540, %8, %cst_118 {dimension_numbers = #tpu.dot_dimension_numbers<[1], [0], [0], [1], [0, 0, 1, 1], [], []>} : vector<2x16xf32>, vector<16x48xf32>, vector<2x48xf32> -> vector<2x48xf32>
    %542 = vector.broadcast %10 : vector<1x48xf32> to vector<2x48xf32>
    %543 = arith.addf %541, %542 : vector<2x48xf32>
    %cst_119 = arith.constant 0.000000e+00 : f32
    %544 = vector.broadcast %cst_119 : f32 to vector<2x16xf32>
    %cst_120 = arith.constant 0.000000e+00 : f32
    %545 = vector.broadcast %cst_120 : f32 to vector<2x32xf32>
    %cst_121 = arith.constant dense<0.000000e+00> : vector<2x48xf32>
    %546 = tpu.matmul %544, %9, %cst_121 {dimension_numbers = #tpu.dot_dimension_numbers<[1], [0], [0], [1], [0, 0, 1, 1], [], []>} : vector<2x16xf32>, vector<16x48xf32>, vector<2x48xf32> -> vector<2x48xf32>
    %547 = vector.extract_strided_slice %543 {offsets = [0, 0], sizes = [2, 16], strides = [1, 1]} : vector<2x48xf32> to vector<2x16xf32>
    %548 = vector.extract_strided_slice %546 {offsets = [0, 0], sizes = [2, 16], strides = [1, 1]} : vector<2x48xf32> to vector<2x16xf32>
    %549 = arith.addf %547, %548 : vector<2x16xf32>
    %550 = arith.negf %549 : vector<2x16xf32>
    %551 = math.exp %550 : vector<2x16xf32>
    %cst_122 = arith.constant 1.000000e+00 : f32
    %552 = vector.broadcast %cst_122 : f32 to vector<2x16xf32>
    %553 = arith.addf %552, %551 : vector<2x16xf32>
    %554 = arith.divf %552, %553 : vector<2x16xf32>
    %555 = vector.extract_strided_slice %543 {offsets = [0, 16], sizes = [2, 16], strides = [1, 1]} : vector<2x48xf32> to vector<2x16xf32>
    %556 = vector.extract_strided_slice %546 {offsets = [0, 16], sizes = [2, 16], strides = [1, 1]} : vector<2x48xf32> to vector<2x16xf32>
    %557 = arith.addf %555, %556 : vector<2x16xf32>
    %558 = arith.negf %557 : vector<2x16xf32>
    %559 = math.exp %558 : vector<2x16xf32>
    %cst_123 = arith.constant 1.000000e+00 : f32
    %560 = vector.broadcast %cst_123 : f32 to vector<2x16xf32>
    %561 = arith.addf %560, %559 : vector<2x16xf32>
    %562 = arith.divf %560, %561 : vector<2x16xf32>
    %563 = vector.extract_strided_slice %543 {offsets = [0, 32], sizes = [2, 16], strides = [1, 1]} : vector<2x48xf32> to vector<2x16xf32>
    %564 = vector.extract_strided_slice %546 {offsets = [0, 32], sizes = [2, 16], strides = [1, 1]} : vector<2x48xf32> to vector<2x16xf32>
    %565 = vector.broadcast %11 : vector<1x16xf32> to vector<2x16xf32>
    %566 = arith.addf %564, %565 : vector<2x16xf32>
    %567 = arith.mulf %554, %566 : vector<2x16xf32>
    %568 = arith.addf %563, %567 : vector<2x16xf32>
    %569 = math.tanh %568 : vector<2x16xf32>
    %cst_124 = arith.constant 1.000000e+00 : f32
    %570 = vector.broadcast %cst_124 : f32 to vector<2x16xf32>
    %571 = arith.subf %570, %562 : vector<2x16xf32>
    %572 = arith.mulf %571, %569 : vector<2x16xf32>
    %573 = arith.mulf %562, %544 : vector<2x16xf32>
    %574 = arith.addf %572, %573 : vector<2x16xf32>
    %cst_125 = arith.constant dense<0.000000e+00> : vector<2x96xf32>
    %575 = tpu.matmul %574, %12, %cst_125 {dimension_numbers = #tpu.dot_dimension_numbers<[1], [0], [0], [1], [0, 0, 1, 1], [], []>} : vector<2x16xf32>, vector<16x96xf32>, vector<2x96xf32> -> vector<2x96xf32>
    %576 = vector.broadcast %14 : vector<1x96xf32> to vector<2x96xf32>
    %577 = arith.addf %575, %576 : vector<2x96xf32>
    %cst_126 = arith.constant dense<0.000000e+00> : vector<2x96xf32>
    %578 = tpu.matmul %545, %13, %cst_126 {dimension_numbers = #tpu.dot_dimension_numbers<[1], [0], [0], [1], [0, 0, 1, 1], [], []>} : vector<2x32xf32>, vector<32x96xf32>, vector<2x96xf32> -> vector<2x96xf32>
    %579 = vector.extract_strided_slice %577 {offsets = [0, 0], sizes = [2, 32], strides = [1, 1]} : vector<2x96xf32> to vector<2x32xf32>
    %580 = vector.extract_strided_slice %578 {offsets = [0, 0], sizes = [2, 32], strides = [1, 1]} : vector<2x96xf32> to vector<2x32xf32>
    %581 = arith.addf %579, %580 : vector<2x32xf32>
    %582 = arith.negf %581 : vector<2x32xf32>
    %583 = math.exp %582 : vector<2x32xf32>
    %cst_127 = arith.constant 1.000000e+00 : f32
    %584 = vector.broadcast %cst_127 : f32 to vector<2x32xf32>
    %585 = arith.addf %584, %583 : vector<2x32xf32>
    %586 = arith.divf %584, %585 : vector<2x32xf32>
    %587 = vector.extract_strided_slice %577 {offsets = [0, 32], sizes = [2, 32], strides = [1, 1]} : vector<2x96xf32> to vector<2x32xf32>
    %588 = vector.extract_strided_slice %578 {offsets = [0, 32], sizes = [2, 32], strides = [1, 1]} : vector<2x96xf32> to vector<2x32xf32>
    %589 = arith.addf %587, %588 : vector<2x32xf32>
    %590 = arith.negf %589 : vector<2x32xf32>
    %591 = math.exp %590 : vector<2x32xf32>
    %cst_128 = arith.constant 1.000000e+00 : f32
    %592 = vector.broadcast %cst_128 : f32 to vector<2x32xf32>
    %593 = arith.addf %592, %591 : vector<2x32xf32>
    %594 = arith.divf %592, %593 : vector<2x32xf32>
    %595 = vector.extract_strided_slice %577 {offsets = [0, 64], sizes = [2, 32], strides = [1, 1]} : vector<2x96xf32> to vector<2x32xf32>
    %596 = vector.extract_strided_slice %578 {offsets = [0, 64], sizes = [2, 32], strides = [1, 1]} : vector<2x96xf32> to vector<2x32xf32>
    %597 = vector.broadcast %15 : vector<1x32xf32> to vector<2x32xf32>
    %598 = arith.addf %596, %597 : vector<2x32xf32>
    %599 = arith.mulf %586, %598 : vector<2x32xf32>
    %600 = arith.addf %595, %599 : vector<2x32xf32>
    %601 = math.tanh %600 : vector<2x32xf32>
    %cst_129 = arith.constant 1.000000e+00 : f32
    %602 = vector.broadcast %cst_129 : f32 to vector<2x32xf32>
    %603 = arith.subf %602, %594 : vector<2x32xf32>
    %604 = arith.mulf %603, %601 : vector<2x32xf32>
    %605 = arith.mulf %594, %545 : vector<2x32xf32>
    %606 = arith.addf %604, %605 : vector<2x32xf32>
    %cst_130 = arith.constant dense<0.000000e+00> : vector<2x4xf32>
    %607 = tpu.matmul %606, %16, %cst_130 {dimension_numbers = #tpu.dot_dimension_numbers<[1], [0], [0], [1], [0, 0, 1, 1], [], []>} : vector<2x32xf32>, vector<32x4xf32>, vector<2x4xf32> -> vector<2x4xf32>
    %608 = vector.broadcast %17 : vector<1x4xf32> to vector<2x4xf32>
    %609 = arith.addf %607, %608 : vector<2x4xf32>
    %610 = arith.negf %609 : vector<2x4xf32>
    %611 = math.exp %610 : vector<2x4xf32>
    %cst_131 = arith.constant 1.000000e+00 : f32
    %612 = vector.broadcast %cst_131 : f32 to vector<2x4xf32>
    %613 = arith.addf %612, %611 : vector<2x4xf32>
    %614 = arith.divf %612, %613 : vector<2x4xf32>
    %c0_132 = arith.constant 0 : index
    %c0_133 = arith.constant 0 : index
    %615 = vector.load %arg19[%c0_132, %c0_133] : memref<2x32xf32, #tpu.memory_space<vmem>>, vector<2x4xf32>
    tpu.vector_store %arg19[%c0_132, %c0_133], %614 {strides = array<i32>} : memref<2x32xf32, #tpu.memory_space<vmem>>, vector<2x4xf32>,
    %cst_134 = arith.constant dense<0.000000e+00> : vector<2x48xf32>
    %616 = tpu.matmul %574, %9, %cst_134 {dimension_numbers = #tpu.dot_dimension_numbers<[1], [0], [0], [1], [0, 0, 1, 1], [], []>} : vector<2x16xf32>, vector<16x48xf32>, vector<2x48xf32> -> vector<2x48xf32>
    %617 = vector.extract_strided_slice %543 {offsets = [0, 0], sizes = [2, 16], strides = [1, 1]} : vector<2x48xf32> to vector<2x16xf32>
    %618 = vector.extract_strided_slice %616 {offsets = [0, 0], sizes = [2, 16], strides = [1, 1]} : vector<2x48xf32> to vector<2x16xf32>
    %619 = arith.addf %617, %618 : vector<2x16xf32>
    %620 = arith.negf %619 : vector<2x16xf32>
    %621 = math.exp %620 : vector<2x16xf32>
    %cst_135 = arith.constant 1.000000e+00 : f32
    %622 = vector.broadcast %cst_135 : f32 to vector<2x16xf32>
    %623 = arith.addf %622, %621 : vector<2x16xf32>
    %624 = arith.divf %622, %623 : vector<2x16xf32>
    %625 = vector.extract_strided_slice %543 {offsets = [0, 16], sizes = [2, 16], strides = [1, 1]} : vector<2x48xf32> to vector<2x16xf32>
    %626 = vector.extract_strided_slice %616 {offsets = [0, 16], sizes = [2, 16], strides = [1, 1]} : vector<2x48xf32> to vector<2x16xf32>
    %627 = arith.addf %625, %626 : vector<2x16xf32>
    %628 = arith.negf %627 : vector<2x16xf32>
    %629 = math.exp %628 : vector<2x16xf32>
    %cst_136 = arith.constant 1.000000e+00 : f32
    %630 = vector.broadcast %cst_136 : f32 to vector<2x16xf32>
    %631 = arith.addf %630, %629 : vector<2x16xf32>
    %632 = arith.divf %630, %631 : vector<2x16xf32>
    %633 = vector.extract_strided_slice %543 {offsets = [0, 32], sizes = [2, 16], strides = [1, 1]} : vector<2x48xf32> to vector<2x16xf32>
    %634 = vector.extract_strided_slice %616 {offsets = [0, 32], sizes = [2, 16], strides = [1, 1]} : vector<2x48xf32> to vector<2x16xf32>
    %635 = vector.broadcast %11 : vector<1x16xf32> to vector<2x16xf32>
    %636 = arith.addf %634, %635 : vector<2x16xf32>
    %637 = arith.mulf %624, %636 : vector<2x16xf32>
    %638 = arith.addf %633, %637 : vector<2x16xf32>
    %639 = math.tanh %638 : vector<2x16xf32>
    %cst_137 = arith.constant 1.000000e+00 : f32
    %640 = vector.broadcast %cst_137 : f32 to vector<2x16xf32>
    %641 = arith.subf %640, %632 : vector<2x16xf32>
    %642 = arith.mulf %641, %639 : vector<2x16xf32>
    %643 = arith.mulf %632, %574 : vector<2x16xf32>
    %644 = arith.addf %642, %643 : vector<2x16xf32>
    %cst_138 = arith.constant dense<0.000000e+00> : vector<2x96xf32>
    %645 = tpu.matmul %644, %12, %cst_138 {dimension_numbers = #tpu.dot_dimension_numbers<[1], [0], [0], [1], [0, 0, 1, 1], [], []>} : vector<2x16xf32>, vector<16x96xf32>, vector<2x96xf32> -> vector<2x96xf32>
    %646 = vector.broadcast %14 : vector<1x96xf32> to vector<2x96xf32>
    %647 = arith.addf %645, %646 : vector<2x96xf32>
    %cst_139 = arith.constant dense<0.000000e+00> : vector<2x96xf32>
    %648 = tpu.matmul %606, %13, %cst_139 {dimension_numbers = #tpu.dot_dimension_numbers<[1], [0], [0], [1], [0, 0, 1, 1], [], []>} : vector<2x32xf32>, vector<32x96xf32>, vector<2x96xf32> -> vector<2x96xf32>
    %649 = vector.extract_strided_slice %647 {offsets = [0, 0], sizes = [2, 32], strides = [1, 1]} : vector<2x96xf32> to vector<2x32xf32>
    %650 = vector.extract_strided_slice %648 {offsets = [0, 0], sizes = [2, 32], strides = [1, 1]} : vector<2x96xf32> to vector<2x32xf32>
    %651 = arith.addf %649, %650 : vector<2x32xf32>
    %652 = arith.negf %651 : vector<2x32xf32>
    %653 = math.exp %652 : vector<2x32xf32>
    %cst_140 = arith.constant 1.000000e+00 : f32
    %654 = vector.broadcast %cst_140 : f32 to vector<2x32xf32>
    %655 = arith.addf %654, %653 : vector<2x32xf32>
    %656 = arith.divf %654, %655 : vector<2x32xf32>
    %657 = vector.extract_strided_slice %647 {offsets = [0, 32], sizes = [2, 32], strides = [1, 1]} : vector<2x96xf32> to vector<2x32xf32>
    %658 = vector.extract_strided_slice %648 {offsets = [0, 32], sizes = [2, 32], strides = [1, 1]} : vector<2x96xf32> to vector<2x32xf32>
    %659 = arith.addf %657, %658 : vector<2x32xf32>
    %660 = arith.negf %659 : vector<2x32xf32>
    %661 = math.exp %660 : vector<2x32xf32>
    %cst_141 = arith.constant 1.000000e+00 : f32
    %662 = vector.broadcast %cst_141 : f32 to vector<2x32xf32>
    %663 = arith.addf %662, %661 : vector<2x32xf32>
    %664 = arith.divf %662, %663 : vector<2x32xf32>
    %665 = vector.extract_strided_slice %647 {offsets = [0, 64], sizes = [2, 32], strides = [1, 1]} : vector<2x96xf32> to vector<2x32xf32>
    %666 = vector.extract_strided_slice %648 {offsets = [0, 64], sizes = [2, 32], strides = [1, 1]} : vector<2x96xf32> to vector<2x32xf32>
    %667 = vector.broadcast %15 : vector<1x32xf32> to vector<2x32xf32>
    %668 = arith.addf %666, %667 : vector<2x32xf32>
    %669 = arith.mulf %656, %668 : vector<2x32xf32>
    %670 = arith.addf %665, %669 : vector<2x32xf32>
    %671 = math.tanh %670 : vector<2x32xf32>
    %cst_142 = arith.constant 1.000000e+00 : f32
    %672 = vector.broadcast %cst_142 : f32 to vector<2x32xf32>
    %673 = arith.subf %672, %664 : vector<2x32xf32>
    %674 = arith.mulf %673, %671 : vector<2x32xf32>
    %675 = arith.mulf %664, %606 : vector<2x32xf32>
    %676 = arith.addf %674, %675 : vector<2x32xf32>
    %cst_143 = arith.constant dense<0.000000e+00> : vector<2x4xf32>
    %677 = tpu.matmul %676, %16, %cst_143 {dimension_numbers = #tpu.dot_dimension_numbers<[1], [0], [0], [1], [0, 0, 1, 1], [], []>} : vector<2x32xf32>, vector<32x4xf32>, vector<2x4xf32> -> vector<2x4xf32>
    %678 = vector.broadcast %17 : vector<1x4xf32> to vector<2x4xf32>
    %679 = arith.addf %677, %678 : vector<2x4xf32>
    %680 = arith.negf %679 : vector<2x4xf32>
    %681 = math.exp %680 : vector<2x4xf32>
    %cst_144 = arith.constant 1.000000e+00 : f32
    %682 = vector.broadcast %cst_144 : f32 to vector<2x4xf32>
    %683 = arith.addf %682, %681 : vector<2x4xf32>
    %684 = arith.divf %682, %683 : vector<2x4xf32>
    %c0_145 = arith.constant 0 : index
    %c4 = arith.constant 4 : index
    %685 = vector.load %arg19[%c0_145, %c4] : memref<2x32xf32, #tpu.memory_space<vmem>>, vector<2x4xf32>
    tpu.vector_store %arg19[%c0_145, %c4], %684 {strides = array<i32>} : memref<2x32xf32, #tpu.memory_space<vmem>>, vector<2x4xf32>,
    %cst_146 = arith.constant dense<0.000000e+00> : vector<2x48xf32>
    %686 = tpu.matmul %644, %9, %cst_146 {dimension_numbers = #tpu.dot_dimension_numbers<[1], [0], [0], [1], [0, 0, 1, 1], [], []>} : vector<2x16xf32>, vector<16x48xf32>, vector<2x48xf32> -> vector<2x48xf32>
    %687 = vector.extract_strided_slice %543 {offsets = [0, 0], sizes = [2, 16], strides = [1, 1]} : vector<2x48xf32> to vector<2x16xf32>
    %688 = vector.extract_strided_slice %686 {offsets = [0, 0], sizes = [2, 16], strides = [1, 1]} : vector<2x48xf32> to vector<2x16xf32>
    %689 = arith.addf %687, %688 : vector<2x16xf32>
    %690 = arith.negf %689 : vector<2x16xf32>
    %691 = math.exp %690 : vector<2x16xf32>
    %cst_147 = arith.constant 1.000000e+00 : f32
    %692 = vector.broadcast %cst_147 : f32 to vector<2x16xf32>
    %693 = arith.addf %692, %691 : vector<2x16xf32>
    %694 = arith.divf %692, %693 : vector<2x16xf32>
    %695 = vector.extract_strided_slice %543 {offsets = [0, 16], sizes = [2, 16], strides = [1, 1]} : vector<2x48xf32> to vector<2x16xf32>
    %696 = vector.extract_strided_slice %686 {offsets = [0, 16], sizes = [2, 16], strides = [1, 1]} : vector<2x48xf32> to vector<2x16xf32>
    %697 = arith.addf %695, %696 : vector<2x16xf32>
    %698 = arith.negf %697 : vector<2x16xf32>
    %699 = math.exp %698 : vector<2x16xf32>
    %cst_148 = arith.constant 1.000000e+00 : f32
    %700 = vector.broadcast %cst_148 : f32 to vector<2x16xf32>
    %701 = arith.addf %700, %699 : vector<2x16xf32>
    %702 = arith.divf %700, %701 : vector<2x16xf32>
    %703 = vector.extract_strided_slice %543 {offsets = [0, 32], sizes = [2, 16], strides = [1, 1]} : vector<2x48xf32> to vector<2x16xf32>
    %704 = vector.extract_strided_slice %686 {offsets = [0, 32], sizes = [2, 16], strides = [1, 1]} : vector<2x48xf32> to vector<2x16xf32>
    %705 = vector.broadcast %11 : vector<1x16xf32> to vector<2x16xf32>
    %706 = arith.addf %704, %705 : vector<2x16xf32>
    %707 = arith.mulf %694, %706 : vector<2x16xf32>
    %708 = arith.addf %703, %707 : vector<2x16xf32>
    %709 = math.tanh %708 : vector<2x16xf32>
    %cst_149 = arith.constant 1.000000e+00 : f32
    %710 = vector.broadcast %cst_149 : f32 to vector<2x16xf32>
    %711 = arith.subf %710, %702 : vector<2x16xf32>
    %712 = arith.mulf %711, %709 : vector<2x16xf32>
    %713 = arith.mulf %702, %644 : vector<2x16xf32>
    %714 = arith.addf %712, %713 : vector<2x16xf32>
    %cst_150 = arith.constant dense<0.000000e+00> : vector<2x96xf32>
    %715 = tpu.matmul %714, %12, %cst_150 {dimension_numbers = #tpu.dot_dimension_numbers<[1], [0], [0], [1], [0, 0, 1, 1], [], []>} : vector<2x16xf32>, vector<16x96xf32>, vector<2x96xf32> -> vector<2x96xf32>
    %716 = vector.broadcast %14 : vector<1x96xf32> to vector<2x96xf32>
    %717 = arith.addf %715, %716 : vector<2x96xf32>
    %cst_151 = arith.constant dense<0.000000e+00> : vector<2x96xf32>
    %718 = tpu.matmul %676, %13, %cst_151 {dimension_numbers = #tpu.dot_dimension_numbers<[1], [0], [0], [1], [0, 0, 1, 1], [], []>} : vector<2x32xf32>, vector<32x96xf32>, vector<2x96xf32> -> vector<2x96xf32>
    %719 = vector.extract_strided_slice %717 {offsets = [0, 0], sizes = [2, 32], strides = [1, 1]} : vector<2x96xf32> to vector<2x32xf32>
    %720 = vector.extract_strided_slice %718 {offsets = [0, 0], sizes = [2, 32], strides = [1, 1]} : vector<2x96xf32> to vector<2x32xf32>
    %721 = arith.addf %719, %720 : vector<2x32xf32>
    %722 = arith.negf %721 : vector<2x32xf32>
    %723 = math.exp %722 : vector<2x32xf32>
    %cst_152 = arith.constant 1.000000e+00 : f32
    %724 = vector.broadcast %cst_152 : f32 to vector<2x32xf32>
    %725 = arith.addf %724, %723 : vector<2x32xf32>
    %726 = arith.divf %724, %725 : vector<2x32xf32>
    %727 = vector.extract_strided_slice %717 {offsets = [0, 32], sizes = [2, 32], strides = [1, 1]} : vector<2x96xf32> to vector<2x32xf32>
    %728 = vector.extract_strided_slice %718 {offsets = [0, 32], sizes = [2, 32], strides = [1, 1]} : vector<2x96xf32> to vector<2x32xf32>
    %729 = arith.addf %727, %728 : vector<2x32xf32>
    %730 = arith.negf %729 : vector<2x32xf32>
    %731 = math.exp %730 : vector<2x32xf32>
    %cst_153 = arith.constant 1.000000e+00 : f32
    %732 = vector.broadcast %cst_153 : f32 to vector<2x32xf32>
    %733 = arith.addf %732, %731 : vector<2x32xf32>
    %734 = arith.divf %732, %733 : vector<2x32xf32>
    %735 = vector.extract_strided_slice %717 {offsets = [0, 64], sizes = [2, 32], strides = [1, 1]} : vector<2x96xf32> to vector<2x32xf32>
    %736 = vector.extract_strided_slice %718 {offsets = [0, 64], sizes = [2, 32], strides = [1, 1]} : vector<2x96xf32> to vector<2x32xf32>
    %737 = vector.broadcast %15 : vector<1x32xf32> to vector<2x32xf32>
    %738 = arith.addf %736, %737 : vector<2x32xf32>
    %739 = arith.mulf %726, %738 : vector<2x32xf32>
    %740 = arith.addf %735, %739 : vector<2x32xf32>
    %741 = math.tanh %740 : vector<2x32xf32>
    %cst_154 = arith.constant 1.000000e+00 : f32
    %742 = vector.broadcast %cst_154 : f32 to vector<2x32xf32>
    %743 = arith.subf %742, %734 : vector<2x32xf32>
    %744 = arith.mulf %743, %741 : vector<2x32xf32>
    %745 = arith.mulf %734, %676 : vector<2x32xf32>
    %746 = arith.addf %744, %745 : vector<2x32xf32>
    %cst_155 = arith.constant dense<0.000000e+00> : vector<2x4xf32>
    %747 = tpu.matmul %746, %16, %cst_155 {dimension_numbers = #tpu.dot_dimension_numbers<[1], [0], [0], [1], [0, 0, 1, 1], [], []>} : vector<2x32xf32>, vector<32x4xf32>, vector<2x4xf32> -> vector<2x4xf32>
    %748 = vector.broadcast %17 : vector<1x4xf32> to vector<2x4xf32>
    %749 = arith.addf %747, %748 : vector<2x4xf32>
    %750 = arith.negf %749 : vector<2x4xf32>
    %751 = math.exp %750 : vector<2x4xf32>
    %cst_156 = arith.constant 1.000000e+00 : f32
    %752 = vector.broadcast %cst_156 : f32 to vector<2x4xf32>
    %753 = arith.addf %752, %751 : vector<2x4xf32>
    %754 = arith.divf %752, %753 : vector<2x4xf32>
    %c0_157 = arith.constant 0 : index
    %c8 = arith.constant 8 : index
    %755 = vector.load %arg19[%c0_157, %c8] : memref<2x32xf32, #tpu.memory_space<vmem>>, vector<2x4xf32>
    tpu.vector_store %arg19[%c0_157, %c8], %754 {strides = array<i32>} : memref<2x32xf32, #tpu.memory_space<vmem>>, vector<2x4xf32>,
    %cst_158 = arith.constant dense<0.000000e+00> : vector<2x48xf32>
    %756 = tpu.matmul %714, %9, %cst_158 {dimension_numbers = #tpu.dot_dimension_numbers<[1], [0], [0], [1], [0, 0, 1, 1], [], []>} : vector<2x16xf32>, vector<16x48xf32>, vector<2x48xf32> -> vector<2x48xf32>
    %757 = vector.extract_strided_slice %543 {offsets = [0, 0], sizes = [2, 16], strides = [1, 1]} : vector<2x48xf32> to vector<2x16xf32>
    %758 = vector.extract_strided_slice %756 {offsets = [0, 0], sizes = [2, 16], strides = [1, 1]} : vector<2x48xf32> to vector<2x16xf32>
    %759 = arith.addf %757, %758 : vector<2x16xf32>
    %760 = arith.negf %759 : vector<2x16xf32>
    %761 = math.exp %760 : vector<2x16xf32>
    %cst_159 = arith.constant 1.000000e+00 : f32
    %762 = vector.broadcast %cst_159 : f32 to vector<2x16xf32>
    %763 = arith.addf %762, %761 : vector<2x16xf32>
    %764 = arith.divf %762, %763 : vector<2x16xf32>
    %765 = vector.extract_strided_slice %543 {offsets = [0, 16], sizes = [2, 16], strides = [1, 1]} : vector<2x48xf32> to vector<2x16xf32>
    %766 = vector.extract_strided_slice %756 {offsets = [0, 16], sizes = [2, 16], strides = [1, 1]} : vector<2x48xf32> to vector<2x16xf32>
    %767 = arith.addf %765, %766 : vector<2x16xf32>
    %768 = arith.negf %767 : vector<2x16xf32>
    %769 = math.exp %768 : vector<2x16xf32>
    %cst_160 = arith.constant 1.000000e+00 : f32
    %770 = vector.broadcast %cst_160 : f32 to vector<2x16xf32>
    %771 = arith.addf %770, %769 : vector<2x16xf32>
    %772 = arith.divf %770, %771 : vector<2x16xf32>
    %773 = vector.extract_strided_slice %543 {offsets = [0, 32], sizes = [2, 16], strides = [1, 1]} : vector<2x48xf32> to vector<2x16xf32>
    %774 = vector.extract_strided_slice %756 {offsets = [0, 32], sizes = [2, 16], strides = [1, 1]} : vector<2x48xf32> to vector<2x16xf32>
    %775 = vector.broadcast %11 : vector<1x16xf32> to vector<2x16xf32>
    %776 = arith.addf %774, %775 : vector<2x16xf32>
    %777 = arith.mulf %764, %776 : vector<2x16xf32>
    %778 = arith.addf %773, %777 : vector<2x16xf32>
    %779 = math.tanh %778 : vector<2x16xf32>
    %cst_161 = arith.constant 1.000000e+00 : f32
    %780 = vector.broadcast %cst_161 : f32 to vector<2x16xf32>
    %781 = arith.subf %780, %772 : vector<2x16xf32>
    %782 = arith.mulf %781, %779 : vector<2x16xf32>
    %783 = arith.mulf %772, %714 : vector<2x16xf32>
    %784 = arith.addf %782, %783 : vector<2x16xf32>
    %cst_162 = arith.constant dense<0.000000e+00> : vector<2x96xf32>
    %785 = tpu.matmul %784, %12, %cst_162 {dimension_numbers = #tpu.dot_dimension_numbers<[1], [0], [0], [1], [0, 0, 1, 1], [], []>} : vector<2x16xf32>, vector<16x96xf32>, vector<2x96xf32> -> vector<2x96xf32>
    %786 = vector.broadcast %14 : vector<1x96xf32> to vector<2x96xf32>
    %787 = arith.addf %785, %786 : vector<2x96xf32>
    %cst_163 = arith.constant dense<0.000000e+00> : vector<2x96xf32>
    %788 = tpu.matmul %746, %13, %cst_163 {dimension_numbers = #tpu.dot_dimension_numbers<[1], [0], [0], [1], [0, 0, 1, 1], [], []>} : vector<2x32xf32>, vector<32x96xf32>, vector<2x96xf32> -> vector<2x96xf32>
    %789 = vector.extract_strided_slice %787 {offsets = [0, 0], sizes = [2, 32], strides = [1, 1]} : vector<2x96xf32> to vector<2x32xf32>
    %790 = vector.extract_strided_slice %788 {offsets = [0, 0], sizes = [2, 32], strides = [1, 1]} : vector<2x96xf32> to vector<2x32xf32>
    %791 = arith.addf %789, %790 : vector<2x32xf32>
    %792 = arith.negf %791 : vector<2x32xf32>
    %793 = math.exp %792 : vector<2x32xf32>
    %cst_164 = arith.constant 1.000000e+00 : f32
    %794 = vector.broadcast %cst_164 : f32 to vector<2x32xf32>
    %795 = arith.addf %794, %793 : vector<2x32xf32>
    %796 = arith.divf %794, %795 : vector<2x32xf32>
    %797 = vector.extract_strided_slice %787 {offsets = [0, 32], sizes = [2, 32], strides = [1, 1]} : vector<2x96xf32> to vector<2x32xf32>
    %798 = vector.extract_strided_slice %788 {offsets = [0, 32], sizes = [2, 32], strides = [1, 1]} : vector<2x96xf32> to vector<2x32xf32>
    %799 = arith.addf %797, %798 : vector<2x32xf32>
    %800 = arith.negf %799 : vector<2x32xf32>
    %801 = math.exp %800 : vector<2x32xf32>
    %cst_165 = arith.constant 1.000000e+00 : f32
    %802 = vector.broadcast %cst_165 : f32 to vector<2x32xf32>
    %803 = arith.addf %802, %801 : vector<2x32xf32>
    %804 = arith.divf %802, %803 : vector<2x32xf32>
    %805 = vector.extract_strided_slice %787 {offsets = [0, 64], sizes = [2, 32], strides = [1, 1]} : vector<2x96xf32> to vector<2x32xf32>
    %806 = vector.extract_strided_slice %788 {offsets = [0, 64], sizes = [2, 32], strides = [1, 1]} : vector<2x96xf32> to vector<2x32xf32>
    %807 = vector.broadcast %15 : vector<1x32xf32> to vector<2x32xf32>
    %808 = arith.addf %806, %807 : vector<2x32xf32>
    %809 = arith.mulf %796, %808 : vector<2x32xf32>
    %810 = arith.addf %805, %809 : vector<2x32xf32>
    %811 = math.tanh %810 : vector<2x32xf32>
    %cst_166 = arith.constant 1.000000e+00 : f32
    %812 = vector.broadcast %cst_166 : f32 to vector<2x32xf32>
    %813 = arith.subf %812, %804 : vector<2x32xf32>
    %814 = arith.mulf %813, %811 : vector<2x32xf32>
    %815 = arith.mulf %804, %746 : vector<2x32xf32>
    %816 = arith.addf %814, %815 : vector<2x32xf32>
    %cst_167 = arith.constant dense<0.000000e+00> : vector<2x4xf32>
    %817 = tpu.matmul %816, %16, %cst_167 {dimension_numbers = #tpu.dot_dimension_numbers<[1], [0], [0], [1], [0, 0, 1, 1], [], []>} : vector<2x32xf32>, vector<32x4xf32>, vector<2x4xf32> -> vector<2x4xf32>
    %818 = vector.broadcast %17 : vector<1x4xf32> to vector<2x4xf32>
    %819 = arith.addf %817, %818 : vector<2x4xf32>
    %820 = arith.negf %819 : vector<2x4xf32>
    %821 = math.exp %820 : vector<2x4xf32>
    %cst_168 = arith.constant 1.000000e+00 : f32
    %822 = vector.broadcast %cst_168 : f32 to vector<2x4xf32>
    %823 = arith.addf %822, %821 : vector<2x4xf32>
    %824 = arith.divf %822, %823 : vector<2x4xf32>
    %c0_169 = arith.constant 0 : index
    %c12 = arith.constant 12 : index
    %825 = vector.load %arg19[%c0_169, %c12] : memref<2x32xf32, #tpu.memory_space<vmem>>, vector<2x4xf32>
    tpu.vector_store %arg19[%c0_169, %c12], %824 {strides = array<i32>} : memref<2x32xf32, #tpu.memory_space<vmem>>, vector<2x4xf32>,
    %cst_170 = arith.constant dense<0.000000e+00> : vector<2x48xf32>
    %826 = tpu.matmul %784, %9, %cst_170 {dimension_numbers = #tpu.dot_dimension_numbers<[1], [0], [0], [1], [0, 0, 1, 1], [], []>} : vector<2x16xf32>, vector<16x48xf32>, vector<2x48xf32> -> vector<2x48xf32>
    %827 = vector.extract_strided_slice %543 {offsets = [0, 0], sizes = [2, 16], strides = [1, 1]} : vector<2x48xf32> to vector<2x16xf32>
    %828 = vector.extract_strided_slice %826 {offsets = [0, 0], sizes = [2, 16], strides = [1, 1]} : vector<2x48xf32> to vector<2x16xf32>
    %829 = arith.addf %827, %828 : vector<2x16xf32>
    %830 = arith.negf %829 : vector<2x16xf32>
    %831 = math.exp %830 : vector<2x16xf32>
    %cst_171 = arith.constant 1.000000e+00 : f32
    %832 = vector.broadcast %cst_171 : f32 to vector<2x16xf32>
    %833 = arith.addf %832, %831 : vector<2x16xf32>
    %834 = arith.divf %832, %833 : vector<2x16xf32>
    %835 = vector.extract_strided_slice %543 {offsets = [0, 16], sizes = [2, 16], strides = [1, 1]} : vector<2x48xf32> to vector<2x16xf32>
    %836 = vector.extract_strided_slice %826 {offsets = [0, 16], sizes = [2, 16], strides = [1, 1]} : vector<2x48xf32> to vector<2x16xf32>
    %837 = arith.addf %835, %836 : vector<2x16xf32>
    %838 = arith.negf %837 : vector<2x16xf32>
    %839 = math.exp %838 : vector<2x16xf32>
    %cst_172 = arith.constant 1.000000e+00 : f32
    %840 = vector.broadcast %cst_172 : f32 to vector<2x16xf32>
    %841 = arith.addf %840, %839 : vector<2x16xf32>
    %842 = arith.divf %840, %841 : vector<2x16xf32>
    %843 = vector.extract_strided_slice %543 {offsets = [0, 32], sizes = [2, 16], strides = [1, 1]} : vector<2x48xf32> to vector<2x16xf32>
    %844 = vector.extract_strided_slice %826 {offsets = [0, 32], sizes = [2, 16], strides = [1, 1]} : vector<2x48xf32> to vector<2x16xf32>
    %845 = vector.broadcast %11 : vector<1x16xf32> to vector<2x16xf32>
    %846 = arith.addf %844, %845 : vector<2x16xf32>
    %847 = arith.mulf %834, %846 : vector<2x16xf32>
    %848 = arith.addf %843, %847 : vector<2x16xf32>
    %849 = math.tanh %848 : vector<2x16xf32>
    %cst_173 = arith.constant 1.000000e+00 : f32
    %850 = vector.broadcast %cst_173 : f32 to vector<2x16xf32>
    %851 = arith.subf %850, %842 : vector<2x16xf32>
    %852 = arith.mulf %851, %849 : vector<2x16xf32>
    %853 = arith.mulf %842, %784 : vector<2x16xf32>
    %854 = arith.addf %852, %853 : vector<2x16xf32>
    %cst_174 = arith.constant dense<0.000000e+00> : vector<2x96xf32>
    %855 = tpu.matmul %854, %12, %cst_174 {dimension_numbers = #tpu.dot_dimension_numbers<[1], [0], [0], [1], [0, 0, 1, 1], [], []>} : vector<2x16xf32>, vector<16x96xf32>, vector<2x96xf32> -> vector<2x96xf32>
    %856 = vector.broadcast %14 : vector<1x96xf32> to vector<2x96xf32>
    %857 = arith.addf %855, %856 : vector<2x96xf32>
    %cst_175 = arith.constant dense<0.000000e+00> : vector<2x96xf32>
    %858 = tpu.matmul %816, %13, %cst_175 {dimension_numbers = #tpu.dot_dimension_numbers<[1], [0], [0], [1], [0, 0, 1, 1], [], []>} : vector<2x32xf32>, vector<32x96xf32>, vector<2x96xf32> -> vector<2x96xf32>
    %859 = vector.extract_strided_slice %857 {offsets = [0, 0], sizes = [2, 32], strides = [1, 1]} : vector<2x96xf32> to vector<2x32xf32>
    %860 = vector.extract_strided_slice %858 {offsets = [0, 0], sizes = [2, 32], strides = [1, 1]} : vector<2x96xf32> to vector<2x32xf32>
    %861 = arith.addf %859, %860 : vector<2x32xf32>
    %862 = arith.negf %861 : vector<2x32xf32>
    %863 = math.exp %862 : vector<2x32xf32>
    %cst_176 = arith.constant 1.000000e+00 : f32
    %864 = vector.broadcast %cst_176 : f32 to vector<2x32xf32>
    %865 = arith.addf %864, %863 : vector<2x32xf32>
    %866 = arith.divf %864, %865 : vector<2x32xf32>
    %867 = vector.extract_strided_slice %857 {offsets = [0, 32], sizes = [2, 32], strides = [1, 1]} : vector<2x96xf32> to vector<2x32xf32>
    %868 = vector.extract_strided_slice %858 {offsets = [0, 32], sizes = [2, 32], strides = [1, 1]} : vector<2x96xf32> to vector<2x32xf32>
    %869 = arith.addf %867, %868 : vector<2x32xf32>
    %870 = arith.negf %869 : vector<2x32xf32>
    %871 = math.exp %870 : vector<2x32xf32>
    %cst_177 = arith.constant 1.000000e+00 : f32
    %872 = vector.broadcast %cst_177 : f32 to vector<2x32xf32>
    %873 = arith.addf %872, %871 : vector<2x32xf32>
    %874 = arith.divf %872, %873 : vector<2x32xf32>
    %875 = vector.extract_strided_slice %857 {offsets = [0, 64], sizes = [2, 32], strides = [1, 1]} : vector<2x96xf32> to vector<2x32xf32>
    %876 = vector.extract_strided_slice %858 {offsets = [0, 64], sizes = [2, 32], strides = [1, 1]} : vector<2x96xf32> to vector<2x32xf32>
    %877 = vector.broadcast %15 : vector<1x32xf32> to vector<2x32xf32>
    %878 = arith.addf %876, %877 : vector<2x32xf32>
    %879 = arith.mulf %866, %878 : vector<2x32xf32>
    %880 = arith.addf %875, %879 : vector<2x32xf32>
    %881 = math.tanh %880 : vector<2x32xf32>
    %cst_178 = arith.constant 1.000000e+00 : f32
    %882 = vector.broadcast %cst_178 : f32 to vector<2x32xf32>
    %883 = arith.subf %882, %874 : vector<2x32xf32>
    %884 = arith.mulf %883, %881 : vector<2x32xf32>
    %885 = arith.mulf %874, %816 : vector<2x32xf32>
    %886 = arith.addf %884, %885 : vector<2x32xf32>
    %cst_179 = arith.constant dense<0.000000e+00> : vector<2x4xf32>
    %887 = tpu.matmul %886, %16, %cst_179 {dimension_numbers = #tpu.dot_dimension_numbers<[1], [0], [0], [1], [0, 0, 1, 1], [], []>} : vector<2x32xf32>, vector<32x4xf32>, vector<2x4xf32> -> vector<2x4xf32>
    %888 = vector.broadcast %17 : vector<1x4xf32> to vector<2x4xf32>
    %889 = arith.addf %887, %888 : vector<2x4xf32>
    %890 = arith.negf %889 : vector<2x4xf32>
    %891 = math.exp %890 : vector<2x4xf32>
    %cst_180 = arith.constant 1.000000e+00 : f32
    %892 = vector.broadcast %cst_180 : f32 to vector<2x4xf32>
    %893 = arith.addf %892, %891 : vector<2x4xf32>
    %894 = arith.divf %892, %893 : vector<2x4xf32>
    %c0_181 = arith.constant 0 : index
    %c16 = arith.constant 16 : index
    %895 = vector.load %arg19[%c0_181, %c16] : memref<2x32xf32, #tpu.memory_space<vmem>>, vector<2x4xf32>
    tpu.vector_store %arg19[%c0_181, %c16], %894 {strides = array<i32>} : memref<2x32xf32, #tpu.memory_space<vmem>>, vector<2x4xf32>,
    %cst_182 = arith.constant dense<0.000000e+00> : vector<2x48xf32>
    %896 = tpu.matmul %854, %9, %cst_182 {dimension_numbers = #tpu.dot_dimension_numbers<[1], [0], [0], [1], [0, 0, 1, 1], [], []>} : vector<2x16xf32>, vector<16x48xf32>, vector<2x48xf32> -> vector<2x48xf32>
    %897 = vector.extract_strided_slice %543 {offsets = [0, 0], sizes = [2, 16], strides = [1, 1]} : vector<2x48xf32> to vector<2x16xf32>
    %898 = vector.extract_strided_slice %896 {offsets = [0, 0], sizes = [2, 16], strides = [1, 1]} : vector<2x48xf32> to vector<2x16xf32>
    %899 = arith.addf %897, %898 : vector<2x16xf32>
    %900 = arith.negf %899 : vector<2x16xf32>
    %901 = math.exp %900 : vector<2x16xf32>
    %cst_183 = arith.constant 1.000000e+00 : f32
    %902 = vector.broadcast %cst_183 : f32 to vector<2x16xf32>
    %903 = arith.addf %902, %901 : vector<2x16xf32>
    %904 = arith.divf %902, %903 : vector<2x16xf32>
    %905 = vector.extract_strided_slice %543 {offsets = [0, 16], sizes = [2, 16], strides = [1, 1]} : vector<2x48xf32> to vector<2x16xf32>
    %906 = vector.extract_strided_slice %896 {offsets = [0, 16], sizes = [2, 16], strides = [1, 1]} : vector<2x48xf32> to vector<2x16xf32>
    %907 = arith.addf %905, %906 : vector<2x16xf32>
    %908 = arith.negf %907 : vector<2x16xf32>
    %909 = math.exp %908 : vector<2x16xf32>
    %cst_184 = arith.constant 1.000000e+00 : f32
    %910 = vector.broadcast %cst_184 : f32 to vector<2x16xf32>
    %911 = arith.addf %910, %909 : vector<2x16xf32>
    %912 = arith.divf %910, %911 : vector<2x16xf32>
    %913 = vector.extract_strided_slice %543 {offsets = [0, 32], sizes = [2, 16], strides = [1, 1]} : vector<2x48xf32> to vector<2x16xf32>
    %914 = vector.extract_strided_slice %896 {offsets = [0, 32], sizes = [2, 16], strides = [1, 1]} : vector<2x48xf32> to vector<2x16xf32>
    %915 = vector.broadcast %11 : vector<1x16xf32> to vector<2x16xf32>
    %916 = arith.addf %914, %915 : vector<2x16xf32>
    %917 = arith.mulf %904, %916 : vector<2x16xf32>
    %918 = arith.addf %913, %917 : vector<2x16xf32>
    %919 = math.tanh %918 : vector<2x16xf32>
    %cst_185 = arith.constant 1.000000e+00 : f32
    %920 = vector.broadcast %cst_185 : f32 to vector<2x16xf32>
    %921 = arith.subf %920, %912 : vector<2x16xf32>
    %922 = arith.mulf %921, %919 : vector<2x16xf32>
    %923 = arith.mulf %912, %854 : vector<2x16xf32>
    %924 = arith.addf %922, %923 : vector<2x16xf32>
    %cst_186 = arith.constant dense<0.000000e+00> : vector<2x96xf32>
    %925 = tpu.matmul %924, %12, %cst_186 {dimension_numbers = #tpu.dot_dimension_numbers<[1], [0], [0], [1], [0, 0, 1, 1], [], []>} : vector<2x16xf32>, vector<16x96xf32>, vector<2x96xf32> -> vector<2x96xf32>
    %926 = vector.broadcast %14 : vector<1x96xf32> to vector<2x96xf32>
    %927 = arith.addf %925, %926 : vector<2x96xf32>
    %cst_187 = arith.constant dense<0.000000e+00> : vector<2x96xf32>
    %928 = tpu.matmul %886, %13, %cst_187 {dimension_numbers = #tpu.dot_dimension_numbers<[1], [0], [0], [1], [0, 0, 1, 1], [], []>} : vector<2x32xf32>, vector<32x96xf32>, vector<2x96xf32> -> vector<2x96xf32>
    %929 = vector.extract_strided_slice %927 {offsets = [0, 0], sizes = [2, 32], strides = [1, 1]} : vector<2x96xf32> to vector<2x32xf32>
    %930 = vector.extract_strided_slice %928 {offsets = [0, 0], sizes = [2, 32], strides = [1, 1]} : vector<2x96xf32> to vector<2x32xf32>
    %931 = arith.addf %929, %930 : vector<2x32xf32>
    %932 = arith.negf %931 : vector<2x32xf32>
    %933 = math.exp %932 : vector<2x32xf32>
    %cst_188 = arith.constant 1.000000e+00 : f32
    %934 = vector.broadcast %cst_188 : f32 to vector<2x32xf32>
    %935 = arith.addf %934, %933 : vector<2x32xf32>
    %936 = arith.divf %934, %935 : vector<2x32xf32>
    %937 = vector.extract_strided_slice %927 {offsets = [0, 32], sizes = [2, 32], strides = [1, 1]} : vector<2x96xf32> to vector<2x32xf32>
    %938 = vector.extract_strided_slice %928 {offsets = [0, 32], sizes = [2, 32], strides = [1, 1]} : vector<2x96xf32> to vector<2x32xf32>
    %939 = arith.addf %937, %938 : vector<2x32xf32>
    %940 = arith.negf %939 : vector<2x32xf32>
    %941 = math.exp %940 : vector<2x32xf32>
    %cst_189 = arith.constant 1.000000e+00 : f32
    %942 = vector.broadcast %cst_189 : f32 to vector<2x32xf32>
    %943 = arith.addf %942, %941 : vector<2x32xf32>
    %944 = arith.divf %942, %943 : vector<2x32xf32>
    %945 = vector.extract_strided_slice %927 {offsets = [0, 64], sizes = [2, 32], strides = [1, 1]} : vector<2x96xf32> to vector<2x32xf32>
    %946 = vector.extract_strided_slice %928 {offsets = [0, 64], sizes = [2, 32], strides = [1, 1]} : vector<2x96xf32> to vector<2x32xf32>
    %947 = vector.broadcast %15 : vector<1x32xf32> to vector<2x32xf32>
    %948 = arith.addf %946, %947 : vector<2x32xf32>
    %949 = arith.mulf %936, %948 : vector<2x32xf32>
    %950 = arith.addf %945, %949 : vector<2x32xf32>
    %951 = math.tanh %950 : vector<2x32xf32>
    %cst_190 = arith.constant 1.000000e+00 : f32
    %952 = vector.broadcast %cst_190 : f32 to vector<2x32xf32>
    %953 = arith.subf %952, %944 : vector<2x32xf32>
    %954 = arith.mulf %953, %951 : vector<2x32xf32>
    %955 = arith.mulf %944, %886 : vector<2x32xf32>
    %956 = arith.addf %954, %955 : vector<2x32xf32>
    %cst_191 = arith.constant dense<0.000000e+00> : vector<2x4xf32>
    %957 = tpu.matmul %956, %16, %cst_191 {dimension_numbers = #tpu.dot_dimension_numbers<[1], [0], [0], [1], [0, 0, 1, 1], [], []>} : vector<2x32xf32>, vector<32x4xf32>, vector<2x4xf32> -> vector<2x4xf32>
    %958 = vector.broadcast %17 : vector<1x4xf32> to vector<2x4xf32>
    %959 = arith.addf %957, %958 : vector<2x4xf32>
    %960 = arith.negf %959 : vector<2x4xf32>
    %961 = math.exp %960 : vector<2x4xf32>
    %cst_192 = arith.constant 1.000000e+00 : f32
    %962 = vector.broadcast %cst_192 : f32 to vector<2x4xf32>
    %963 = arith.addf %962, %961 : vector<2x4xf32>
    %964 = arith.divf %962, %963 : vector<2x4xf32>
    %c0_193 = arith.constant 0 : index
    %c20 = arith.constant 20 : index
    %965 = vector.load %arg19[%c0_193, %c20] : memref<2x32xf32, #tpu.memory_space<vmem>>, vector<2x4xf32>
    tpu.vector_store %arg19[%c0_193, %c20], %964 {strides = array<i32>} : memref<2x32xf32, #tpu.memory_space<vmem>>, vector<2x4xf32>,
    %cst_194 = arith.constant dense<0.000000e+00> : vector<2x48xf32>
    %966 = tpu.matmul %924, %9, %cst_194 {dimension_numbers = #tpu.dot_dimension_numbers<[1], [0], [0], [1], [0, 0, 1, 1], [], []>} : vector<2x16xf32>, vector<16x48xf32>, vector<2x48xf32> -> vector<2x48xf32>
    %967 = vector.extract_strided_slice %543 {offsets = [0, 0], sizes = [2, 16], strides = [1, 1]} : vector<2x48xf32> to vector<2x16xf32>
    %968 = vector.extract_strided_slice %966 {offsets = [0, 0], sizes = [2, 16], strides = [1, 1]} : vector<2x48xf32> to vector<2x16xf32>
    %969 = arith.addf %967, %968 : vector<2x16xf32>
    %970 = arith.negf %969 : vector<2x16xf32>
    %971 = math.exp %970 : vector<2x16xf32>
    %cst_195 = arith.constant 1.000000e+00 : f32
    %972 = vector.broadcast %cst_195 : f32 to vector<2x16xf32>
    %973 = arith.addf %972, %971 : vector<2x16xf32>
    %974 = arith.divf %972, %973 : vector<2x16xf32>
    %975 = vector.extract_strided_slice %543 {offsets = [0, 16], sizes = [2, 16], strides = [1, 1]} : vector<2x48xf32> to vector<2x16xf32>
    %976 = vector.extract_strided_slice %966 {offsets = [0, 16], sizes = [2, 16], strides = [1, 1]} : vector<2x48xf32> to vector<2x16xf32>
    %977 = arith.addf %975, %976 : vector<2x16xf32>
    %978 = arith.negf %977 : vector<2x16xf32>
    %979 = math.exp %978 : vector<2x16xf32>
    %cst_196 = arith.constant 1.000000e+00 : f32
    %980 = vector.broadcast %cst_196 : f32 to vector<2x16xf32>
    %981 = arith.addf %980, %979 : vector<2x16xf32>
    %982 = arith.divf %980, %981 : vector<2x16xf32>
    %983 = vector.extract_strided_slice %543 {offsets = [0, 32], sizes = [2, 16], strides = [1, 1]} : vector<2x48xf32> to vector<2x16xf32>
    %984 = vector.extract_strided_slice %966 {offsets = [0, 32], sizes = [2, 16], strides = [1, 1]} : vector<2x48xf32> to vector<2x16xf32>
    %985 = vector.broadcast %11 : vector<1x16xf32> to vector<2x16xf32>
    %986 = arith.addf %984, %985 : vector<2x16xf32>
    %987 = arith.mulf %974, %986 : vector<2x16xf32>
    %988 = arith.addf %983, %987 : vector<2x16xf32>
    %989 = math.tanh %988 : vector<2x16xf32>
    %cst_197 = arith.constant 1.000000e+00 : f32
    %990 = vector.broadcast %cst_197 : f32 to vector<2x16xf32>
    %991 = arith.subf %990, %982 : vector<2x16xf32>
    %992 = arith.mulf %991, %989 : vector<2x16xf32>
    %993 = arith.mulf %982, %924 : vector<2x16xf32>
    %994 = arith.addf %992, %993 : vector<2x16xf32>
    %cst_198 = arith.constant dense<0.000000e+00> : vector<2x96xf32>
    %995 = tpu.matmul %994, %12, %cst_198 {dimension_numbers = #tpu.dot_dimension_numbers<[1], [0], [0], [1], [0, 0, 1, 1], [], []>} : vector<2x16xf32>, vector<16x96xf32>, vector<2x96xf32> -> vector<2x96xf32>
    %996 = vector.broadcast %14 : vector<1x96xf32> to vector<2x96xf32>
    %997 = arith.addf %995, %996 : vector<2x96xf32>
    %cst_199 = arith.constant dense<0.000000e+00> : vector<2x96xf32>
    %998 = tpu.matmul %956, %13, %cst_199 {dimension_numbers = #tpu.dot_dimension_numbers<[1], [0], [0], [1], [0, 0, 1, 1], [], []>} : vector<2x32xf32>, vector<32x96xf32>, vector<2x96xf32> -> vector<2x96xf32>
    %999 = vector.extract_strided_slice %997 {offsets = [0, 0], sizes = [2, 32], strides = [1, 1]} : vector<2x96xf32> to vector<2x32xf32>
    %1000 = vector.extract_strided_slice %998 {offsets = [0, 0], sizes = [2, 32], strides = [1, 1]} : vector<2x96xf32> to vector<2x32xf32>
    %1001 = arith.addf %999, %1000 : vector<2x32xf32>
    %1002 = arith.negf %1001 : vector<2x32xf32>
    %1003 = math.exp %1002 : vector<2x32xf32>
    %cst_200 = arith.constant 1.000000e+00 : f32
    %1004 = vector.broadcast %cst_200 : f32 to vector<2x32xf32>
    %1005 = arith.addf %1004, %1003 : vector<2x32xf32>
    %1006 = arith.divf %1004, %1005 : vector<2x32xf32>
    %1007 = vector.extract_strided_slice %997 {offsets = [0, 32], sizes = [2, 32], strides = [1, 1]} : vector<2x96xf32> to vector<2x32xf32>
    %1008 = vector.extract_strided_slice %998 {offsets = [0, 32], sizes = [2, 32], strides = [1, 1]} : vector<2x96xf32> to vector<2x32xf32>
    %1009 = arith.addf %1007, %1008 : vector<2x32xf32>
    %1010 = arith.negf %1009 : vector<2x32xf32>
    %1011 = math.exp %1010 : vector<2x32xf32>
    %cst_201 = arith.constant 1.000000e+00 : f32
    %1012 = vector.broadcast %cst_201 : f32 to vector<2x32xf32>
    %1013 = arith.addf %1012, %1011 : vector<2x32xf32>
    %1014 = arith.divf %1012, %1013 : vector<2x32xf32>
    %1015 = vector.extract_strided_slice %997 {offsets = [0, 64], sizes = [2, 32], strides = [1, 1]} : vector<2x96xf32> to vector<2x32xf32>
    %1016 = vector.extract_strided_slice %998 {offsets = [0, 64], sizes = [2, 32], strides = [1, 1]} : vector<2x96xf32> to vector<2x32xf32>
    %1017 = vector.broadcast %15 : vector<1x32xf32> to vector<2x32xf32>
    %1018 = arith.addf %1016, %1017 : vector<2x32xf32>
    %1019 = arith.mulf %1006, %1018 : vector<2x32xf32>
    %1020 = arith.addf %1015, %1019 : vector<2x32xf32>
    %1021 = math.tanh %1020 : vector<2x32xf32>
    %cst_202 = arith.constant 1.000000e+00 : f32
    %1022 = vector.broadcast %cst_202 : f32 to vector<2x32xf32>
    %1023 = arith.subf %1022, %1014 : vector<2x32xf32>
    %1024 = arith.mulf %1023, %1021 : vector<2x32xf32>
    %1025 = arith.mulf %1014, %956 : vector<2x32xf32>
    %1026 = arith.addf %1024, %1025 : vector<2x32xf32>
    %cst_203 = arith.constant dense<0.000000e+00> : vector<2x4xf32>
    %1027 = tpu.matmul %1026, %16, %cst_203 {dimension_numbers = #tpu.dot_dimension_numbers<[1], [0], [0], [1], [0, 0, 1, 1], [], []>} : vector<2x32xf32>, vector<32x4xf32>, vector<2x4xf32> -> vector<2x4xf32>
    %1028 = vector.broadcast %17 : vector<1x4xf32> to vector<2x4xf32>
    %1029 = arith.addf %1027, %1028 : vector<2x4xf32>
    %1030 = arith.negf %1029 : vector<2x4xf32>
    %1031 = math.exp %1030 : vector<2x4xf32>
    %cst_204 = arith.constant 1.000000e+00 : f32
    %1032 = vector.broadcast %cst_204 : f32 to vector<2x4xf32>
    %1033 = arith.addf %1032, %1031 : vector<2x4xf32>
    %1034 = arith.divf %1032, %1033 : vector<2x4xf32>
    %c0_205 = arith.constant 0 : index
    %c24 = arith.constant 24 : index
    %1035 = vector.load %arg19[%c0_205, %c24] : memref<2x32xf32, #tpu.memory_space<vmem>>, vector<2x4xf32>
    tpu.vector_store %arg19[%c0_205, %c24], %1034 {strides = array<i32>} : memref<2x32xf32, #tpu.memory_space<vmem>>, vector<2x4xf32>,
    %cst_206 = arith.constant dense<0.000000e+00> : vector<2x48xf32>
    %1036 = tpu.matmul %994, %9, %cst_206 {dimension_numbers = #tpu.dot_dimension_numbers<[1], [0], [0], [1], [0, 0, 1, 1], [], []>} : vector<2x16xf32>, vector<16x48xf32>, vector<2x48xf32> -> vector<2x48xf32>
    %1037 = vector.extract_strided_slice %543 {offsets = [0, 0], sizes = [2, 16], strides = [1, 1]} : vector<2x48xf32> to vector<2x16xf32>
    %1038 = vector.extract_strided_slice %1036 {offsets = [0, 0], sizes = [2, 16], strides = [1, 1]} : vector<2x48xf32> to vector<2x16xf32>
    %1039 = arith.addf %1037, %1038 : vector<2x16xf32>
    %1040 = arith.negf %1039 : vector<2x16xf32>
    %1041 = math.exp %1040 : vector<2x16xf32>
    %cst_207 = arith.constant 1.000000e+00 : f32
    %1042 = vector.broadcast %cst_207 : f32 to vector<2x16xf32>
    %1043 = arith.addf %1042, %1041 : vector<2x16xf32>
    %1044 = arith.divf %1042, %1043 : vector<2x16xf32>
    %1045 = vector.extract_strided_slice %543 {offsets = [0, 16], sizes = [2, 16], strides = [1, 1]} : vector<2x48xf32> to vector<2x16xf32>
    %1046 = vector.extract_strided_slice %1036 {offsets = [0, 16], sizes = [2, 16], strides = [1, 1]} : vector<2x48xf32> to vector<2x16xf32>
    %1047 = arith.addf %1045, %1046 : vector<2x16xf32>
    %1048 = arith.negf %1047 : vector<2x16xf32>
    %1049 = math.exp %1048 : vector<2x16xf32>
    %cst_208 = arith.constant 1.000000e+00 : f32
    %1050 = vector.broadcast %cst_208 : f32 to vector<2x16xf32>
    %1051 = arith.addf %1050, %1049 : vector<2x16xf32>
    %1052 = arith.divf %1050, %1051 : vector<2x16xf32>
    %1053 = vector.extract_strided_slice %543 {offsets = [0, 32], sizes = [2, 16], strides = [1, 1]} : vector<2x48xf32> to vector<2x16xf32>
    %1054 = vector.extract_strided_slice %1036 {offsets = [0, 32], sizes = [2, 16], strides = [1, 1]} : vector<2x48xf32> to vector<2x16xf32>
    %1055 = vector.broadcast %11 : vector<1x16xf32> to vector<2x16xf32>
    %1056 = arith.addf %1054, %1055 : vector<2x16xf32>
    %1057 = arith.mulf %1044, %1056 : vector<2x16xf32>
    %1058 = arith.addf %1053, %1057 : vector<2x16xf32>
    %1059 = math.tanh %1058 : vector<2x16xf32>
    %cst_209 = arith.constant 1.000000e+00 : f32
    %1060 = vector.broadcast %cst_209 : f32 to vector<2x16xf32>
    %1061 = arith.subf %1060, %1052 : vector<2x16xf32>
    %1062 = arith.mulf %1061, %1059 : vector<2x16xf32>
    %1063 = arith.mulf %1052, %994 : vector<2x16xf32>
    %1064 = arith.addf %1062, %1063 : vector<2x16xf32>
    %cst_210 = arith.constant dense<0.000000e+00> : vector<2x96xf32>
    %1065 = tpu.matmul %1064, %12, %cst_210 {dimension_numbers = #tpu.dot_dimension_numbers<[1], [0], [0], [1], [0, 0, 1, 1], [], []>} : vector<2x16xf32>, vector<16x96xf32>, vector<2x96xf32> -> vector<2x96xf32>
    %1066 = vector.broadcast %14 : vector<1x96xf32> to vector<2x96xf32>
    %1067 = arith.addf %1065, %1066 : vector<2x96xf32>
    %cst_211 = arith.constant dense<0.000000e+00> : vector<2x96xf32>
    %1068 = tpu.matmul %1026, %13, %cst_211 {dimension_numbers = #tpu.dot_dimension_numbers<[1], [0], [0], [1], [0, 0, 1, 1], [], []>} : vector<2x32xf32>, vector<32x96xf32>, vector<2x96xf32> -> vector<2x96xf32>
    %1069 = vector.extract_strided_slice %1067 {offsets = [0, 0], sizes = [2, 32], strides = [1, 1]} : vector<2x96xf32> to vector<2x32xf32>
    %1070 = vector.extract_strided_slice %1068 {offsets = [0, 0], sizes = [2, 32], strides = [1, 1]} : vector<2x96xf32> to vector<2x32xf32>
    %1071 = arith.addf %1069, %1070 : vector<2x32xf32>
    %1072 = arith.negf %1071 : vector<2x32xf32>
    %1073 = math.exp %1072 : vector<2x32xf32>
    %cst_212 = arith.constant 1.000000e+00 : f32
    %1074 = vector.broadcast %cst_212 : f32 to vector<2x32xf32>
    %1075 = arith.addf %1074, %1073 : vector<2x32xf32>
    %1076 = arith.divf %1074, %1075 : vector<2x32xf32>
    %1077 = vector.extract_strided_slice %1067 {offsets = [0, 32], sizes = [2, 32], strides = [1, 1]} : vector<2x96xf32> to vector<2x32xf32>
    %1078 = vector.extract_strided_slice %1068 {offsets = [0, 32], sizes = [2, 32], strides = [1, 1]} : vector<2x96xf32> to vector<2x32xf32>
    %1079 = arith.addf %1077, %1078 : vector<2x32xf32>
    %1080 = arith.negf %1079 : vector<2x32xf32>
    %1081 = math.exp %1080 : vector<2x32xf32>
    %cst_213 = arith.constant 1.000000e+00 : f32
    %1082 = vector.broadcast %cst_213 : f32 to vector<2x32xf32>
    %1083 = arith.addf %1082, %1081 : vector<2x32xf32>
    %1084 = arith.divf %1082, %1083 : vector<2x32xf32>
    %1085 = vector.extract_strided_slice %1067 {offsets = [0, 64], sizes = [2, 32], strides = [1, 1]} : vector<2x96xf32> to vector<2x32xf32>
    %1086 = vector.extract_strided_slice %1068 {offsets = [0, 64], sizes = [2, 32], strides = [1, 1]} : vector<2x96xf32> to vector<2x32xf32>
    %1087 = vector.broadcast %15 : vector<1x32xf32> to vector<2x32xf32>
    %1088 = arith.addf %1086, %1087 : vector<2x32xf32>
    %1089 = arith.mulf %1076, %1088 : vector<2x32xf32>
    %1090 = arith.addf %1085, %1089 : vector<2x32xf32>
    %1091 = math.tanh %1090 : vector<2x32xf32>
    %cst_214 = arith.constant 1.000000e+00 : f32
    %1092 = vector.broadcast %cst_214 : f32 to vector<2x32xf32>
    %1093 = arith.subf %1092, %1084 : vector<2x32xf32>
    %1094 = arith.mulf %1093, %1091 : vector<2x32xf32>
    %1095 = arith.mulf %1084, %1026 : vector<2x32xf32>
    %1096 = arith.addf %1094, %1095 : vector<2x32xf32>
    %cst_215 = arith.constant dense<0.000000e+00> : vector<2x4xf32>
    %1097 = tpu.matmul %1096, %16, %cst_215 {dimension_numbers = #tpu.dot_dimension_numbers<[1], [0], [0], [1], [0, 0, 1, 1], [], []>} : vector<2x32xf32>, vector<32x4xf32>, vector<2x4xf32> -> vector<2x4xf32>
    %1098 = vector.broadcast %17 : vector<1x4xf32> to vector<2x4xf32>
    %1099 = arith.addf %1097, %1098 : vector<2x4xf32>
    %1100 = arith.negf %1099 : vector<2x4xf32>
    %1101 = math.exp %1100 : vector<2x4xf32>
    %cst_216 = arith.constant 1.000000e+00 : f32
    %1102 = vector.broadcast %cst_216 : f32 to vector<2x4xf32>
    %1103 = arith.addf %1102, %1101 : vector<2x4xf32>
    %1104 = arith.divf %1102, %1103 : vector<2x4xf32>
    %c0_217 = arith.constant 0 : index
    %c28 = arith.constant 28 : index
    %1105 = vector.load %arg19[%c0_217, %c28] : memref<2x32xf32, #tpu.memory_space<vmem>>, vector<2x4xf32>
    tpu.vector_store %arg19[%c0_217, %c28], %1104 {strides = array<i32>} : memref<2x32xf32, #tpu.memory_space<vmem>>, vector<2x4xf32>,
    return
  }
}

</mosaic_0001>

<bundles_post_ra>
// kernel: _lambda_.1
= control target key start
LH: loop header
LB: loop body
LE: loop exit
PB: predicated region body
PF: predicated region fallthrough
CT: control target
= control target key end

     0   :  { %s8753_s0 = inlined_call_operand.vmem [shape: f32[2,32], index: 0, kind: input, shape index: {}]   ;;  %s8754_s1 = inlined_call_operand.hbm [shape: f32[4,96], index: 1, kind: input, shape index: {}]   ;;  %s8755_s2 = inlined_call_operand.vmem [shape: f32[32,96], index: 2, kind: input, shape index: {}]   ;;  %s8756_s3 = inlined_call_operand.hbm [shape: f32[1,96], index: 3, kind: input, shape index: {}]   ;;  %s8757_s4 = inlined_call_operand.hbm [shape: f32[1,32], index: 4, kind: input, shape index: {}]   ;;  %s8758_s5 = inlined_call_operand.vmem [shape: f32[32,48], index: 5, kind: input, shape index: {}]   ;;  %s8759_s6 = inlined_call_operand.hbm [shape: f32[16,48], index: 6, kind: input, shape index: {}]   ;;  %s8760_s7 = inlined_call_operand.hbm [shape: f32[1,48], index: 7, kind: input, shape index: {}]   ;;  %s8761_s8 = inlined_call_operand.hbm [shape: f32[1,16], index: 8, kind: input, shape index: {}]   ;;  %s8762_s9 = inlined_call_operand.hbm [shape: f32[16,48], index: 9, kind: input, shape index: {}]   ;;  %s8763_s10 = inlined_call_operand.vmem [shape: f32[16,48], index: 10, kind: input, shape index: {}]   ;;  %s8764_s11 = inlined_call_operand.vmem [shape: f32[1,48], index: 11, kind: input, shape index: {}]   ;;  %s8765_s12 = inlined_call_operand.vmem [shape: f32[1,16], index: 12, kind: input, shape index: {}]   ;;  %s8766_s13 = inlined_call_operand.hbm [shape: f32[16,96], index: 13, kind: input, shape index: {}]   ;;  %s8767_s14 = inlined_call_operand.vmem [shape: f32[32,96], index: 14, kind: input, shape index: {}]   ;;  %s8768_s15 = inlined_call_operand.vmem [shape: f32[1,96], index: 15, kind: input, shape index: {}]   ;;  %s8769_s16 = inlined_call_operand.vmem [shape: f32[1,32], index: 16, kind: input, shape index: {}]   ;;  %s8770_s17 = inlined_call_operand.vmem [shape: f32[32,4], index: 17, kind: input, shape index: {}]   ;;  %s8771_s18 = inlined_call_operand.vmem [shape: f32[1,4], index: 18, kind: input, shape index: {}]   ;;  %s8772_s19 = inlined_call_operand.vmem [shape: f32[2,32], index: 19, kind: output, shape index: {}]  }
   0x1   :  { %8778 = sst [smem:[#allocation20_spill]] %s8753_s0 }
   0x2   :  { %8779 = sst [smem:[#allocation21_spill]] %s8754_s1 }
   0x3   :  { %8780 = sst [smem:[#allocation22_spill]] %s8755_s2 }
   0x4   :  { %8781 = sst [smem:[#allocation23_spill]] %s8756_s3 }
   0x5   :  { %8782 = sst [smem:[#allocation24_spill]] %s8772_s19 }
   0x6   :  { %24 = vsyncpa [#allocation3], 0 }
   0x7   :  { %25 = vsyncpa [#allocation5], 0 }
   0x8   :  { %26 = vsyncpa [#allocation8], 0 }
   0x9   :  { %27 = vsyncpa [#allocation11], 0 }
   0xa   :  { %28 = vsyncpa [#allocation14], 0  ;;  %s7624_s0 = smov [#allocation4]   ;;  %s7625_s20 = smov [#allocation7]  }
   0xb   :  { %s49_s30 = sshll.u32 %s7624_s0, 4  ;;  %s70_s21 = sshll.u32 %s7625_s20, 4  ;;  %s50_s30 = int_to_ptr.vmem [resolvable:$true] %s49_s30  ;;  %s7753_s21 = int_to_ptr.vmem [resolvable:$true] %s70_s21 }
   0xc   :  { %s8783_s2 = sld [smem:[#allocation23_spill]] }
  0x12   :  { %s7438_s23 = scalar_lea.hbm %s8783_s2, 16 }
  0x13   :  { %p7439_p0 = scmp.ne.s32.totalorder %s8783_s2, %s7438_s23  ;;  %p7442_p1 = scmp.lt.u32.totalorder %s7438_s23, %s8783_s2 }
  0x15   :  { %p7444_p2 = pnand %p7442_p1, %p7439_p0 }
  0x17   :  { %7447 = shalt.err (!%p7444_p2)
}
  0x18   :  { %s7448_s27 = scalar_lea.vmem %s50_s30, 16  ;;  %s7452_s28 = scalar_lea.vmem %s50_s30, 32 }
  0x19   :  { %p7449_p3 = scmp.ne.s32.totalorder %s50_s30, %s7448_s27  ;;  %p7453_p4 = scmp.lt.s32.totalorder %s50_s30, %s50_s30 }
  0x1a   :  { %p7454_p5 = scmp.lt.s32.totalorder %s7452_s28, %s7448_s27 }
  0x1c   :  { %p7455_p6 = por %p7454_p5, %p7453_p4 }
  0x1e   :  { %p7456_p7 = pnand %p7455_p6, %p7449_p3 }
  0x20   :  { %7459 = shalt.err (!%p7456_p7)
}
  0x21   :  { %52 = dma.hbm_to_vmem [thread:$0]  %s8783_s2, 16, %s50_s30, [#allocation5]  }
  0x22   :  { %s7460_s22 = scalar_lea.hbm %s8759_s6, 256 }
  0x23   :  { %p7461_p8 = scmp.ne.s32.totalorder %s8759_s6, %s7460_s22  ;;  %p7464_p9 = scmp.lt.u32.totalorder %s7460_s22, %s8759_s6 }
  0x25   :  { %p7466_p10 = pnand %p7464_p9, %p7461_p8 }
  0x27   :  { %7469 = shalt.err (!%p7466_p10)
}
  0x28   :  { %s7470_s26 = scalar_lea.vmem %s7753_s21, 256  ;;  %p7475_p12 = scmp.lt.s32.totalorder %s7753_s21, %s7753_s21 }
  0x29   :  { %p7471_p11 = scmp.ne.s32.totalorder %s7753_s21, %s7470_s26  ;;  %p7476_p13 = scmp.lt.s32.totalorder %s7470_s26, %s7470_s26 }
  0x2b   :  { %p7477_p0 = por %p7476_p13, %p7475_p12 }
  0x2d   :  { %p7478_p1 = pnand %p7477_p0, %p7471_p11 }
  0x2f   :  { %7481 = shalt.err (!%p7478_p1)
}
  0x30   :  { %s7626_s30 = smov 128   ;;  %s7627_s2 = smov 8  }
  0x31   :  { %76 = dma.hbm_to_vmem [thread:$0]  %s8759_s6, 256, %s7753_s21, [#allocation8], %s7626_s30, %s7626_s30, %s7627_s2  }
  0x32   :  { %s7628_s29 = smov [#allocation10]   ;;  %s7629_s20 = smov [#allocation2]  }
  0x33   :  { %s93_s0 = sshll.u32 %s7628_s29, 4  ;;  %s37_s1 = sshll.u32 %s7629_s20, 4  ;;  %s94_s0 = int_to_ptr.vmem [resolvable:$true] %s93_s0  ;;  %s38_s1 = int_to_ptr.vmem [resolvable:$true] %s37_s1 }
  0x34   :  { %s7482_s23 = scalar_lea.hbm %s8761_s8, 16 }
  0x35   :  { %p7483_p2 = scmp.ne.s32.totalorder %s8761_s8, %s7482_s23  ;;  %p7486_p3 = scmp.lt.u32.totalorder %s7482_s23, %s8761_s8 }
  0x37   :  { %p7488_p4 = pnand %p7486_p3, %p7483_p2 }
  0x39   :  { %7491 = shalt.err (!%p7488_p4)
}
  0x3a   :  { %s7492_s6 = scalar_lea.vmem %s94_s0, 16  ;;  %s7496_s21 = scalar_lea.vmem %s94_s0, 32 }
  0x3b   :  { %p7493_p5 = scmp.ne.s32.totalorder %s94_s0, %s7492_s6  ;;  %p7497_p6 = scmp.lt.s32.totalorder %s94_s0, %s94_s0 }
  0x3c   :  { %p7498_p7 = scmp.lt.s32.totalorder %s7496_s21, %s7492_s6 }
  0x3e   :  { %p7499_p8 = por %p7498_p7, %p7497_p6 }
  0x40   :  { %p7500_p9 = pnand %p7499_p8, %p7493_p5 }
  0x42   :  { %7503 = shalt.err (!%p7500_p9)
}
  0x43   :  { %96 = dma.hbm_to_vmem [thread:$0]  %s8761_s8, 16, %s94_s0, [#allocation11]  }
  0x44   :  { %s8784_s22 = sld [smem:[#allocation21_spill]] }
  0x4a   :  { %s7504_s24 = scalar_lea.hbm %s8784_s22, 64 }
  0x4b   :  { %p7505_p10 = scmp.ne.s32.totalorder %s8784_s22, %s7504_s24  ;;  %p7508_p11 = scmp.lt.u32.totalorder %s7504_s24, %s8784_s22 }
  0x4d   :  { %p7510_p12 = pnand %p7508_p11, %p7505_p10 }
  0x4f   :  { %7513 = shalt.err (!%p7510_p12)
}
  0x50   :  { %s7514_s26 = scalar_lea.vmem %s38_s1, 64  ;;  %p7519_p0 = scmp.lt.s32.totalorder %s38_s1, %s38_s1 }
  0x51   :  { %p7515_p13 = scmp.ne.s32.totalorder %s38_s1, %s7514_s26  ;;  %p7520_p1 = scmp.lt.s32.totalorder %s7514_s26, %s7514_s26 }
  0x53   :  { %p7521_p2 = por %p7520_p1, %p7519_p0 }
  0x55   :  { %p7522_p3 = pnand %p7521_p2, %p7515_p13 }
  0x57   :  { %7525 = shalt.err (!%p7522_p3)
}
  0x58   :  { %40 = dma.hbm_to_vmem [thread:$0]  %s8784_s22, 64, %s38_s1, [#allocation3]  }
  0x59   :  { %s7630_s6 = smov [#allocation6]   ;;  %s7631_s27 = smov [#allocation9]  }
  0x5a   :  { %s59_s21 = sshll.u32 %s7630_s6, 4  ;;  %s83_s28 = sshll.u32 %s7631_s27, 4  ;;  %s60_s21 = int_to_ptr.vmem [resolvable:$true] %s59_s21  ;;  %s84_s28 = int_to_ptr.vmem [resolvable:$true] %s83_s28 }
  0x5b   :  { %s7526_s24 = scalar_lea.hbm %s8757_s4, 16 }
  0x5c   :  { %p7527_p4 = scmp.ne.s32.totalorder %s8757_s4, %s7526_s24  ;;  %p7530_p5 = scmp.lt.u32.totalorder %s7526_s24, %s8757_s4 }
  0x5e   :  { %p7532_p6 = pnand %p7530_p5, %p7527_p4 }
  0x60   :  { %7535 = shalt.err (!%p7532_p6)
}
  0x61   :  { %s7536_s1 = scalar_lea.vmem %s60_s21, 16  ;;  %s7540_s22 = scalar_lea.vmem %s60_s21, 32 }
  0x62   :  { %p7537_p7 = scmp.ne.s32.totalorder %s60_s21, %s7536_s1  ;;  %p7541_p8 = scmp.lt.s32.totalorder %s60_s21, %s60_s21 }
  0x63   :  { %p7542_p9 = scmp.lt.s32.totalorder %s7540_s22, %s7536_s1 }
  0x65   :  { %p7543_p10 = por %p7542_p9, %p7541_p8 }
  0x67   :  { %p7544_p11 = pnand %p7543_p10, %p7537_p7 }
  0x69   :  { %7547 = shalt.err (!%p7544_p11)
}
  0x6a   :  { %62 = dma.hbm_to_vmem [thread:$0]  %s8757_s4, 16, %s60_s21, [#allocation5]  }
  0x6b   :  { %s7548_s27 = scalar_lea.hbm %s8760_s7, 16 }
  0x6c   :  { %p7549_p12 = scmp.ne.s32.totalorder %s8760_s7, %s7548_s27  ;;  %p7552_p13 = scmp.lt.u32.totalorder %s7548_s27, %s8760_s7 }
  0x6e   :  { %p7554_p0 = pnand %p7552_p13, %p7549_p12 }
  0x70   :  { %7557 = shalt.err (!%p7554_p0)
}
  0x71   :  { %s7558_s23 = scalar_lea.vmem %s84_s28, 16  ;;  %s7562_s25 = scalar_lea.vmem %s84_s28, 32 }
  0x72   :  { %p7559_p1 = scmp.ne.s32.totalorder %s84_s28, %s7558_s23  ;;  %p7563_p2 = scmp.lt.s32.totalorder %s84_s28, %s84_s28 }
  0x73   :  { %p7564_p3 = scmp.lt.s32.totalorder %s7562_s25, %s7558_s23 }
  0x75   :  { %p7565_p4 = por %p7564_p3, %p7563_p2 }
  0x77   :  { %p7566_p5 = pnand %p7565_p4, %p7559_p1 }
  0x79   :  { %7569 = shalt.err (!%p7566_p5)
}
  0x7a   :  { %86 = dma.hbm_to_vmem [thread:$0]  %s8760_s7, 16, %s84_s28, [#allocation8]  }
  0x7b   :  { %s7632_s3 = smov [#allocation12]   ;;  %s7633_s22 = smov [#allocation13]  }
  0x7c   :  { %s102_s1 = sshll.u32 %s7632_s3, 4  ;;  %s120_s26 = sshll.u32 %s7633_s22, 4  ;;  %s103_s1 = int_to_ptr.vmem [resolvable:$true] %s102_s1  ;;  %s7835_s26 = int_to_ptr.vmem [resolvable:$true] %s120_s26 }
  0x7d   :  { %s7570_s6 = scalar_lea.hbm %s8762_s9, 256 }
  0x7e   :  { %p7571_p6 = scmp.ne.s32.totalorder %s8762_s9, %s7570_s6  ;;  %p7574_p7 = scmp.lt.u32.totalorder %s7570_s6, %s8762_s9 }
  0x80   :  { %p7576_p8 = pnand %p7574_p7, %p7571_p6 }
  0x82   :  { %7579 = shalt.err (!%p7576_p8)
}
  0x83   :  { %s7580_s7 = scalar_lea.vmem %s103_s1, 256  ;;  %p7585_p10 = scmp.lt.s32.totalorder %s103_s1, %s103_s1 }
  0x84   :  { %p7581_p9 = scmp.ne.s32.totalorder %s103_s1, %s7580_s7  ;;  %p7586_p11 = scmp.lt.s32.totalorder %s7580_s7, %s7580_s7 }
  0x86   :  { %p7587_p12 = por %p7586_p11, %p7585_p10 }
  0x88   :  { %p7588_p13 = pnand %p7587_p12, %p7581_p9 }
  0x8a   :  { %7591 = shalt.err (!%p7588_p13)
}
  0x8b   :  { %108 = dma.hbm_to_vmem [thread:$0]  %s8762_s9, 256, %s103_s1, [#allocation11], %s7626_s30, %s7626_s30, %s7627_s2  }
  0x8c   :  { %s7592_s4 = scalar_lea.hbm %s8766_s13, 256 }
  0x8d   :  { %p7593_p0 = scmp.ne.s32.totalorder %s8766_s13, %s7592_s4  ;;  %p7596_p1 = scmp.lt.u32.totalorder %s7592_s4, %s8766_s13 }
  0x8f   :  { %p7598_p2 = pnand %p7596_p1, %p7593_p0 }
  0x91   :  { %7601 = shalt.err (!%p7598_p2)
}
  0x92   :  { %s7602_s0 = scalar_lea.vmem %s7835_s26, 256  ;;  %p7607_p4 = scmp.lt.s32.totalorder %s7835_s26, %s7835_s26 }
  0x93   :  { %p7603_p3 = scmp.ne.s32.totalorder %s7835_s26, %s7602_s0  ;;  %p7608_p5 = scmp.lt.s32.totalorder %s7602_s0, %s7602_s0 }
  0x95   :  { %p7609_p6 = por %p7608_p5, %p7607_p4 }
  0x97   :  { %p7610_p7 = pnand %p7609_p6, %p7603_p3 }
  0x99   :  { %7613 = shalt.err (!%p7610_p7)
}
  0x9a   :  { %126 = dma.hbm_to_vmem [thread:$0]  %s8766_s13, 256, %s7835_s26, [#allocation14], %s7626_s30, %s7626_s30, %s7627_s2  }
  0x9b   :  { %7614 = dma.done.wait [#allocation3], 64  }
  0x9c   :  { %7615 = vsyncadd [#allocation3], 4294967232 }
  0x9d   :  { %7616 = dma.done.wait [#allocation5], 32  }
  0x9e   :  { %7617 = vsyncadd [#allocation5], 4294967264 }
  0x9f   :  { %7618 = dma.done.wait [#allocation8], 272  }
  0xa0   :  { %7619 = vsyncadd [#allocation8], 4294967024 }
  0xa1   :  { %7620 = dma.done.wait [#allocation11], 272  }
  0xa2   :  { %7621 = vsyncadd [#allocation11], 4294967024 }
  0xa3   :  { %7622 = dma.done.wait [#allocation14], 256  }
  0xa4   :  { %7623 = vsyncadd [#allocation14], 4294967040  ;;  %v7634_v0 = vmov 0.0|0.0   ;;  %v7635_v1 = vmov 0.0   ;;  %vm7636_vm0 = vmmov 0   ;;  %vm206_vm1 = vcmask 1043456  }
  0xa5   :  { %6912 = vmatprep.subr.bf16.mxu1 %v7634_v0  ;;  %6345 = vmatprep.subr.mxu0 %v7635_v1  ;;  %vm202_vm2 = vcmask 31744   ;;  %s8785_s26 = sld [smem:[#allocation22_spill]]  ;;  %v7884_v4 = vld [vmem:[#allocation2] sm:$0xf]  ;;  %s8786_s23 = sld [smem:[#allocation20_spill]]  ;;  %v172_v28 = vld [vmem:[#allocation7] sm:$0xff] }
  0xa6   :  { %6347 = vmatprep.mubr.msk.f32.mxu0 %vm7636_vm0, %v7635_v1  ;;  %6358 = vmatprep.mubr.msk.f32.mxu1 %vm7636_vm0, %v7635_v1  ;;  %v5980_v9 = vld [vmem:[#allocation6] ss:$0 sm:$0xff]  ;;  %s7637_s25 = smov 64   ;;  %v7920_v17 = vld [vmem:[#allocation4] ss:$0 sm:$0xff]  ;;  %v173_v29 = vld [vmem:[#allocation7 + $0x8] sm:$0xff] }
  0xa7   :  { %6346 = vmatpush3.msk.msra.mxu0 %vm206_vm1, %v7884_v4  ;;  %366 = vrot.lane.b32.xlu0 %v5980_v9, %s7637_s25  ;;  %v168_v30 = vld [vmem:[%s8758_s5] sm:$0xff]  ;;  %v7927_v31 = vpack.c.bf16 %v173_v29, %v172_v28  ;;  %v169_v32 = vld [vmem:[%s8758_s5 + $0x8] sm:$0xff]  ;;  %v170_v33 = vld [vmem:[%s8758_s5 + $0x10] sm:$0xff]  ;;  %s7639_s13 = smov 124   ;;  %s7640_s30 = smov 32   ;;  %vm280_vm3 = vcmask 261120  }
  0xa8   :  { %6918 = vmatprep.subr.bf16.mxu0 %v7634_v0  ;;  %v171_v34 = vld [vmem:[%s8758_s5 + $0x18] sm:$0xff]  ;;  %v7938_v35 = vpack.c.bf16 %v169_v32, %v168_v30  ;;  %s7638_s5 = smov 96   ;;  %s7642_s6 = smov 120   ;;  %vm470_vm4 = vcmask 130048   ;;  %vm3473_vm5 = vcmask 25600   ;;  %vm3829_vm6 = vcmask 58400  }
  0xa9   :  { %v7943_v36 = vpack.c.bf16 %v171_v34, %v170_v33  ;;  %v5984_v43 = vld [vmem:[#allocation10] ss:$0 sm:$0xff]  ;;  %v7984_v50 = vld [vmem:[#allocation9] ss:$0 sm:$0xff]  ;;  %s7643_s27 = smov 116   ;;  %s7644_s29 = smov 108  }
  0xaa   :  { %s7645_s20 = smov 104   ;;  %s7646_s28 = smov 100   ;;  %vm4185_vm7 = vcmask 91200   ;;  %vm4541_vm8 = vcmask 124000   ;;  %vm4897_vm9 = vcmask 156800   ;;  %vm5253_vm10 = vcmask 189600  }
  0xab   :  { %v162_v2 = vld [vmem:[%s8785_s26] sm:$0xff]  ;;  %v163_v3 = vld [vmem:[%s8785_s26 + $0x8] sm:$0xff]  ;;  %v164_v6 = vld [vmem:[%s8785_s26 + $0x10] sm:$0xff]  ;;  %s7649_s8 = smov 20   ;;  %vm5609_vm11 = vcmask 222400   ;;  %s7652_s19 = smov 28  }
  0xac   :  { %v7886_v5 = vpack.c.bf16 %v163_v3, %v162_v2  ;;  %v165_v7 = vld [vmem:[%s8785_s26 + $0x18] sm:$0xff]  ;;  %v7899_v8 = vld [vmem:[%s8786_s23] sm:$0x3]  ;;  %s7641_s26 = smov 112   ;;  %vm5965_vm12 = vcmask 255200  }
  0xad   :  { %6348 = vmatmul.mubr.msk.f32.vlgmr.msra.gmra.mrb[0].mxu0 %vm202_vm2, %v7899_v8  ;;  %v7905_v10 = vpack.c.bf16 %v165_v7, %v164_v6 }
  0xae   :  { %6914 = vmatpush3.bf16.msra.mxu1 %v7886_v5  ;;  %6369 = vmatprep.mubr.msk.f32.mxu0 %vm7636_vm0, %v7635_v1 }
  0xaf   :  { %6915 = vmatprep.subr.bf16.mxu1 %v7634_v0  ;;  %6920 = vmatpush3.bf16.msra.mxu0 %v7938_v35 }
  0xb0   :  { %6921 = vmatprep.subr.bf16.mxu0 %v7634_v0 }
  0xb2   :  { %6917 = vmatpush3.bf16.msra.mxu1 %v7905_v10 }
  0xb3   :  { %6924 = vmatprep.subr.bf16.mxu1 %v7634_v0  ;;  %6923 = vmatpush3.bf16.msra.mxu0 %v7943_v36 }
  0xb4   :  { %6379 = vmatprep.subr.mxu0 %v7635_v1 }
  0xb5   :  { %6359 = vmatmul.mubr.f32.vlgmr.msra.gmra.mrb[0].mxu1 %v7635_v1 }
  0xb6   :  { %6376 = vmatprep.mubr.msk.f32.mxu1 %vm7636_vm0, %v7635_v1  ;;  %6926 = vmatpush3.bf16.msra.mxu1 %v7927_v31 }
  0xb7   :  { %6927 = vmatprep.subr.bf16.mxu1 %v7634_v0 }
  0xb9   :  { %6377 = vmatmul.mubr.f32.vlgmr.msra.gmra.mrb[2].mxu1 %v7635_v1 }
  0xba   :  { %6929 = vmatpush3.bf16.msra.mxu1 %v7886_v5  ;;  %6392 = vmatprep.mubr.msk.f32.mxu1 %vm7636_vm0, %v7635_v1 }
  0xbb   :  { %6930 = vmatprep.subr.bf16.mxu1 %v7634_v0 }
  0xbe   :  { %6932 = vmatpush3.bf16.msra.mxu1 %v7905_v10 }
  0xbf   :  { %6939 = vmatprep.subr.bf16.mxu1 %v7634_v0 }
 0x119   :  { %v7916_v13 = vpop.permute.xlu0 %366 }
 0x180   :  { %v276_v11 = vpop.f32.mrb[0].mxu0 }
 0x181   :  { %v6349_v12 = vpop.f32.mrb[1].mxu0  ;;  %v277_v18 = vadd.f32 %v7920_v17, %v276_v11 }
 0x188   :  { %v350_v14 = vpop.f32.mrb[0].mxu1 }
 0x189   :  { %v369_v15 = vadd.f32 %v7916_v13, %v350_v14  ;;  %v6360_v16 = vpop.f32.mrb[1].mxu1  ;;  %v354_v19 = vadd.f32 %v350_v14, %v277_v18 }
 0x18b   :  { %371 = vrot.lane.b32.xlu0 %v369_v15, %s7637_s25  ;;  %v5979_v20 = vmul.f32 -1.442695, %v354_v19 }
 0x18c   :  { %v539_v44 = vpop.f32.mrb[2].mxu1 }
 0x18d   :  { %7208 = vpow2.f32 %v5979_v20  ;;  %v6378_v45 = vpop.f32.mrb[3].mxu1 }
 0x197   :  { %v7209_v21 = vpop.eup %7208 }
 0x198   :  { %v358_v22 = vadd.f32 1.0, %v7209_v21 }
 0x19a   :  { %7210 = vrcp.f32 %v358_v22 }
 0x1a4   :  { %v7211_v23 = vpop.eup %7210 }
 0x1a5   :  { %v381_v38 = vsub.f32 1.0, %v7211_v23  ;;  %v387_v40 = vmul.f32 0.0, %v7211_v23 }
 0x1fd   :  { %v372_v24 = vpop.permute.xlu0 %371 }
 0x1fe   :  { %v374_v25 = vmul.f32 %v7211_v23, %v372_v24 }
 0x200   :  { %376 = vrot.lane.b32.xlu1 %v374_v25, %s7637_s25 }
 0x272   :  { %v377_v26 = vpop.permute.xlu1 %376 }
 0x273   :  { %v379_v27 = vadd.f32 %v377_v26, %v277_v18 }
 0x275   :  { %7212 = vtanh.f32 %v379_v27 }
 0x27f   :  { %v7213_v37 = vpop.eup %7212 }
 0x280   :  { %383 = vrot.lane.b32.xlu1 %v7213_v37, %s7638_s5 }
 0x284   :  { %578 = vrot.lane.b32.xlu1 %v7899_v8, %s7639_s13  ;;  %s7650_s13 = smov 16  }
 0x2f2   :  { %v384_v39 = vpop.permute.xlu1 %383 }
 0x2f3   :  { %v386_v41 = vmul.f32 %v384_v39, %v381_v38 }
 0x2f5   :  { %v7957_v42 = vadd.f32 %v387_v40, %v386_v41 }
 0x2f6   :  { %v579_v47 = vpop.permute.xlu1 %578 }
 0x2f7   :  { %396 = vrot.lane.b32.xlu0 %v7957_v42, %s7638_s5 }
 0x2fb   :  { %555 = vrot.lane.b32.xlu0 %v5984_v43, %s7640_s30 }
 0x369   :  { %v397_v46 = vpop.permute.xlu0 %396 }
 0x36a   :  { %6370 = vmatmul.mubr.msk.f32.vlgmr.msra.gmra.mrb[2].mxu0 %vm280_vm3, %v397_v46  ;;  %6393 = vmatmul.mubr.msk.f32.vlgmr.msra.gmra.mrb[4].mxu1 %vm280_vm3, %v397_v46 }
 0x36b   :  { %6380 = vmatpush3.msk.msra.mxu0 %vm206_vm1, %v7884_v4  ;;  %6381 = vmatprep.mubr.msk.f32.mxu0 %vm7636_vm0, %v7635_v1 }
 0x36c   :  { %6941 = vmatpush3.bf16.msra.mxu1 %v7927_v31  ;;  %6410 = vmatprep.mubr.msk.f32.mxu1 %vm7636_vm0, %v7635_v1 }
 0x36d   :  { %v7971_v48 = vpop.permute.xlu0 %555  ;;  %6933 = vmatprep.subr.bf16.mxu0 %v7634_v0  ;;  %6942 = vmatprep.subr.bf16.mxu1 %v7634_v0 }
 0x36e   :  { %6382 = vmatmul.mubr.msk.f32.vlgmr.msra.gmra.mrb[4].mxu0 %vm202_vm2, %v579_v47  ;;  %v558_v49 = vadd.f32 %v7971_v48, %v539_v44 }
 0x36f   :  { %6935 = vmatpush3.bf16.msra.mxu0 %v7938_v35  ;;  %6403 = vmatprep.mubr.msk.f32.mxu0 %vm7636_vm0, %v7635_v1 }
 0x370   :  { %560 = vrot.lane.b32.xlu1 %v558_v49, %s7638_s5  ;;  %6936 = vmatprep.subr.bf16.mxu0 %v7634_v0 }
 0x373   :  { %6938 = vmatpush3.bf16.msra.mxu0 %v7943_v36 }
 0x374   :  { %6413 = vmatprep.subr.mxu0 %v7635_v1 }
 0x3e2   :  { %v561_v63 = vpop.permute.xlu1 %560 }
 0x43d   :  { %v466_v51 = vpop.f32.mrb[2].mxu0  ;;  %v718_v52 = vpop.f32.mrb[4].mxu1 }
 0x43e   :  { %v467_v53 = vadd.f32 %v7984_v50, %v466_v51  ;;  %v729_v54 = vadd.f32 %v718_v52, %v7916_v13  ;;  %v6371_v55 = vpop.f32.mrb[3].mxu0  ;;  %v6394_v56 = vpop.f32.mrb[5].mxu1 }
 0x440   :  { %v543_v57 = vadd.f32 %v539_v44, %v467_v53  ;;  %731 = vrot.lane.b32.xlu0 %v729_v54, %s7637_s25 }
 0x441   :  { %v648_v58 = vpop.f32.mrb[4].mxu0 }
 0x442   :  { %v5983_v59 = vmul.f32 -1.442695, %v543_v57  ;;  %v6383_v60 = vpop.f32.mrb[5].mxu0  ;;  %v649_v6 = vadd.f32 %v7920_v17, %v648_v58 }
 0x444   :  { %7214 = vpow2.f32 %v5983_v59  ;;  %v722_v7 = vadd.f32 %v718_v52, %v649_v6 }
 0x446   :  { %v5988_v9 = vmul.f32 -1.442695, %v722_v7 }
 0x44e   :  { %v7215_v61 = vpop.eup %7214 }
 0x44f   :  { %v547_v62 = vadd.f32 1.0, %v7215_v61 }
 0x451   :  { %7216 = vrcp.f32 %v547_v62 }
 0x452   :  { %7218 = vpow2.f32 %v5988_v9 }
 0x45b   :  { %v7217_v2 = vpop.eup %7216 }
 0x45c   :  { %v563_v3 = vmul.f32 %v7217_v2, %v561_v63  ;;  %v7219_v11 = vpop.eup %7218  ;;  %v570_v24 = vsub.f32 1.0, %v7217_v2  ;;  %v576_v26 = vmul.f32 0.0, %v7217_v2 }
 0x45d   :  { %v726_v12 = vadd.f32 1.0, %v7219_v11 }
 0x45e   :  { %565 = vrot.lane.b32.xlu1 %v563_v3, %s7640_s30 }
 0x45f   :  { %7220 = vrcp.f32 %v726_v12 }
 0x469   :  { %v7221_v14 = vpop.eup %7220 }
 0x46a   :  { %v741_v29 = vsub.f32 1.0, %v7221_v14  ;;  %v747_v32 = vmul.f32 %v7221_v14, %v7957_v42 }
 0x4b2   :  { %v732_v15 = vpop.permute.xlu0 %731 }
 0x4b3   :  { %v734_v16 = vmul.f32 %v7221_v14, %v732_v15 }
 0x4b5   :  { %736 = vrot.lane.b32.xlu0 %v734_v16, %s7637_s25 }
 0x4d0   :  { %v566_v18 = vpop.permute.xlu1 %565 }
 0x4d1   :  { %v568_v19 = vadd.f32 %v566_v18, %v467_v53 }
 0x4d3   :  { %7222 = vtanh.f32 %v568_v19 }
 0x4dd   :  { %v7223_v20 = vpop.eup %7222 }
 0x4de   :  { %572 = vrot.lane.b32.xlu1 %v7223_v20, %s7641_s26 }
 0x527   :  { %v737_v21 = vpop.permute.xlu0 %736 }
 0x528   :  { %v739_v22 = vadd.f32 %v737_v21, %v649_v6 }
 0x52a   :  { %7224 = vtanh.f32 %v739_v22 }
 0x534   :  { %v7225_v23 = vpop.eup %7224 }
 0x535   :  { %743 = vrot.lane.b32.xlu0 %v7225_v23, %s7638_s5 }
 0x550   :  { %v573_v25 = vpop.permute.xlu1 %572 }
 0x551   :  { %v575_v27 = vmul.f32 %v573_v25, %v570_v24 }
 0x553   :  { %v7994_v28 = vadd.f32 %v576_v26, %v575_v27 }
 0x555   :  { %825 = vrot.lane.b32.xlu1 %v7994_v28, %s7641_s26 }
 0x559   :  { %926 = vrot.lane.b32.xlu1 %v7899_v8, %s7642_s6  ;;  %s7651_s6 = smov 24  }
 0x5a7   :  { %v744_v30 = vpop.permute.xlu0 %743 }
 0x5a8   :  { %v746_v33 = vmul.f32 %v744_v30, %v741_v29 }
 0x5aa   :  { %v8000_v34 = vadd.f32 %v747_v32, %v746_v33 }
 0x5ac   :  { %750 = vrot.lane.b32.xlu0 %v8000_v34, %s7638_s5 }
 0x5c7   :  { %v826_v37 = vpop.permute.xlu1 %825 }
 0x5c8   :  { %6411 = vmatmul.mubr.msk.f32.vlgmr.msra.gmra.mrb[6].mxu1 %vm470_vm4, %v826_v37 }
 0x5c9   :  { %6944 = vmatpush3.bf16.msra.mxu1 %v7886_v5  ;;  %6426 = vmatprep.mubr.msk.f32.mxu1 %vm7636_vm0, %v7635_v1 }
 0x5ca   :  { %6945 = vmatprep.subr.bf16.mxu1 %v7634_v0 }
 0x5cb   :  { %v927_v39 = vpop.permute.xlu1 %926 }
 0x5cd   :  { %6947 = vmatpush3.bf16.msra.mxu1 %v7905_v10 }
 0x5ce   :  { %6954 = vmatprep.subr.bf16.mxu1 %v7634_v0 }
 0x61e   :  { %v751_v38 = vpop.permute.xlu0 %750 }
 0x61f   :  { %6404 = vmatmul.mubr.msk.f32.vlgmr.msra.gmra.mrb[6].mxu0 %vm280_vm3, %v751_v38  ;;  %6427 = vmatmul.mubr.msk.f32.vlgmr.msra.gmra.mrb[8].mxu1 %vm280_vm3, %v751_v38 }
 0x620   :  { %6414 = vmatpush3.msk.msra.mxu0 %vm206_vm1, %v7884_v4  ;;  %6415 = vmatprep.mubr.msk.f32.mxu0 %vm7636_vm0, %v7635_v1 }
 0x621   :  { %6956 = vmatpush3.bf16.msra.mxu1 %v7927_v31  ;;  %6444 = vmatprep.mubr.msk.f32.mxu1 %vm7636_vm0, %v7635_v1 }
 0x622   :  { %6948 = vmatprep.subr.bf16.mxu0 %v7634_v0  ;;  %6957 = vmatprep.subr.bf16.mxu1 %v7634_v0 }
 0x623   :  { %6416 = vmatmul.mubr.msk.f32.vlgmr.msra.gmra.mrb[8].mxu0 %vm202_vm2, %v927_v39 }
 0x624   :  { %6950 = vmatpush3.bf16.msra.mxu0 %v7938_v35  ;;  %6437 = vmatprep.mubr.msk.f32.mxu0 %vm7636_vm0, %v7635_v1 }
 0x625   :  { %6951 = vmatprep.subr.bf16.mxu0 %v7634_v0 }
 0x628   :  { %6953 = vmatpush3.bf16.msra.mxu0 %v7943_v36 }
 0x629   :  { %6447 = vmatprep.subr.mxu0 %v7635_v1 }
 0x69b   :  { %v895_v40 = vpop.f32.mrb[6].mxu1 }
 0x69c   :  { %v906_v41 = vadd.f32 %v895_v40, %v7971_v48  ;;  %v6412_v42 = vpop.f32.mrb[7].mxu1 }
 0x69e   :  { %908 = vrot.lane.b32.xlu0 %v906_v41, %s7638_s5 }
 0x6f2   :  { %v820_v43 = vpop.f32.mrb[6].mxu0  ;;  %v1066_v44 = vpop.f32.mrb[8].mxu1 }
 0x6f3   :  { %v821_v45 = vadd.f32 %v7984_v50, %v820_v43  ;;  %v1077_v46 = vadd.f32 %v1066_v44, %v7916_v13  ;;  %v6405_v47 = vpop.f32.mrb[7].mxu0  ;;  %v6428_v49 = vpop.f32.mrb[9].mxu1 }
 0x6f5   :  { %v899_v51 = vadd.f32 %v895_v40, %v821_v45  ;;  %1079 = vrot.lane.b32.xlu1 %v1077_v46, %s7637_s25 }
 0x6f6   :  { %v996_v52 = vpop.f32.mrb[8].mxu0 }
 0x6f7   :  { %v5991_v53 = vmul.f32 -1.442695, %v899_v51  ;;  %v6417_v54 = vpop.f32.mrb[9].mxu0  ;;  %v997_v60 = vadd.f32 %v7920_v17, %v996_v52 }
 0x6f9   :  { %7226 = vpow2.f32 %v5991_v53  ;;  %v1070_v61 = vadd.f32 %v1066_v44, %v997_v60 }
 0x6fb   :  { %v5995_v62 = vmul.f32 -1.442695, %v1070_v61 }
 0x703   :  { %v7227_v55 = vpop.eup %7226 }
 0x704   :  { %v903_v56 = vadd.f32 1.0, %v7227_v55 }
 0x706   :  { %7228 = vrcp.f32 %v903_v56 }
 0x707   :  { %7230 = vpow2.f32 %v5995_v62 }
 0x710   :  { %v7229_v57 = vpop.eup %7228  ;;  %v909_v58 = vpop.permute.xlu0 %908 }
 0x711   :  { %v911_v59 = vmul.f32 %v7229_v57, %v909_v58  ;;  %v7231_v63 = vpop.eup %7230  ;;  %v918_v18 = vsub.f32 1.0, %v7229_v57  ;;  %v924_v20 = vmul.f32 %v7229_v57, %v7994_v28 }
 0x712   :  { %v1074_v2 = vadd.f32 1.0, %v7231_v63 }
 0x713   :  { %913 = vrot.lane.b32.xlu0 %v911_v59, %s7640_s30 }
 0x714   :  { %7232 = vrcp.f32 %v1074_v2 }
 0x71e   :  { %v7233_v3 = vpop.eup %7232 }
 0x71f   :  { %v1089_v23 = vsub.f32 1.0, %v7233_v3  ;;  %v1095_v25 = vmul.f32 %v7233_v3, %v8000_v34 }
 0x767   :  { %v1080_v6 = vpop.permute.xlu1 %1079 }
 0x768   :  { %v1082_v7 = vmul.f32 %v7233_v3, %v1080_v6 }
 0x76a   :  { %1084 = vrot.lane.b32.xlu1 %v1082_v7, %s7637_s25 }
 0x785   :  { %v914_v9 = vpop.permute.xlu0 %913 }
 0x786   :  { %v916_v11 = vadd.f32 %v914_v9, %v821_v45 }
 0x788   :  { %7234 = vtanh.f32 %v916_v11 }
 0x792   :  { %v7235_v12 = vpop.eup %7234 }
 0x793   :  { %920 = vrot.lane.b32.xlu0 %v7235_v12, %s7641_s26 }
 0x7dc   :  { %v1085_v14 = vpop.permute.xlu1 %1084 }
 0x7dd   :  { %v1087_v15 = vadd.f32 %v1085_v14, %v997_v60 }
 0x7df   :  { %7236 = vtanh.f32 %v1087_v15 }
 0x7e9   :  { %v7237_v16 = vpop.eup %7236 }
 0x7ea   :  { %1091 = vrot.lane.b32.xlu1 %v7237_v16, %s7638_s5 }
 0x805   :  { %v921_v19 = vpop.permute.xlu0 %920 }
 0x806   :  { %v923_v21 = vmul.f32 %v921_v19, %v918_v18 }
 0x808   :  { %v8040_v22 = vadd.f32 %v924_v20, %v923_v21 }
 0x80a   :  { %1173 = vrot.lane.b32.xlu0 %v8040_v22, %s7641_s26 }
 0x80e   :  { %1274 = vrot.lane.b32.xlu0 %v7899_v8, %s7643_s27 }
 0x85c   :  { %v1092_v24 = vpop.permute.xlu1 %1091 }
 0x85d   :  { %v1094_v26 = vmul.f32 %v1092_v24, %v1089_v23 }
 0x85f   :  { %v8046_v27 = vadd.f32 %v1095_v25, %v1094_v26 }
 0x861   :  { %1098 = vrot.lane.b32.xlu1 %v8046_v27, %s7638_s5 }
 0x87c   :  { %v1174_v28 = vpop.permute.xlu0 %1173 }
 0x87d   :  { %6445 = vmatmul.mubr.msk.f32.vlgmr.msra.gmra.mrb[10].mxu1 %vm470_vm4, %v1174_v28 }
 0x87e   :  { %6959 = vmatpush3.bf16.msra.mxu1 %v7886_v5  ;;  %6460 = vmatprep.mubr.msk.f32.mxu1 %vm7636_vm0, %v7635_v1 }
 0x87f   :  { %6960 = vmatprep.subr.bf16.mxu1 %v7634_v0 }
 0x880   :  { %v1275_v30 = vpop.permute.xlu0 %1274 }
 0x882   :  { %6962 = vmatpush3.bf16.msra.mxu1 %v7905_v10 }
 0x883   :  { %6969 = vmatprep.subr.bf16.mxu1 %v7634_v0 }
 0x8d3   :  { %v1099_v29 = vpop.permute.xlu1 %1098 }
 0x8d4   :  { %6438 = vmatmul.mubr.msk.f32.vlgmr.msra.gmra.mrb[10].mxu0 %vm280_vm3, %v1099_v29  ;;  %6461 = vmatmul.mubr.msk.f32.vlgmr.msra.gmra.mrb[12].mxu1 %vm280_vm3, %v1099_v29 }
 0x8d5   :  { %6448 = vmatpush3.msk.msra.mxu0 %vm206_vm1, %v7884_v4  ;;  %6449 = vmatprep.mubr.msk.f32.mxu0 %vm7636_vm0, %v7635_v1 }
 0x8d6   :  { %6971 = vmatpush3.bf16.msra.mxu1 %v7927_v31  ;;  %6478 = vmatprep.mubr.msk.f32.mxu1 %vm7636_vm0, %v7635_v1 }
 0x8d7   :  { %6963 = vmatprep.subr.bf16.mxu0 %v7634_v0  ;;  %6972 = vmatprep.subr.bf16.mxu1 %v7634_v0 }
 0x8d8   :  { %6450 = vmatmul.mubr.msk.f32.vlgmr.msra.gmra.mrb[12].mxu0 %vm202_vm2, %v1275_v30 }
 0x8d9   :  { %6965 = vmatpush3.bf16.msra.mxu0 %v7938_v35  ;;  %6471 = vmatprep.mubr.msk.f32.mxu0 %vm7636_vm0, %v7635_v1 }
 0x8da   :  { %6966 = vmatprep.subr.bf16.mxu0 %v7634_v0 }
 0x8dd   :  { %6968 = vmatpush3.bf16.msra.mxu0 %v7943_v36 }
 0x8de   :  { %6481 = vmatprep.subr.mxu0 %v7635_v1 }
 0x950   :  { %v1243_v32 = vpop.f32.mrb[10].mxu1 }
 0x951   :  { %v1254_v33 = vadd.f32 %v1243_v32, %v7971_v48  ;;  %v6446_v34 = vpop.f32.mrb[11].mxu1 }
 0x953   :  { %1256 = vrot.lane.b32.xlu1 %v1254_v33, %s7638_s5 }
 0x9a7   :  { %v1168_v37 = vpop.f32.mrb[10].mxu0  ;;  %v1414_v38 = vpop.f32.mrb[12].mxu1 }
 0x9a8   :  { %v1169_v39 = vadd.f32 %v7984_v50, %v1168_v37  ;;  %v1425_v40 = vadd.f32 %v1414_v38, %v7916_v13  ;;  %v6439_v41 = vpop.f32.mrb[11].mxu0  ;;  %v6462_v42 = vpop.f32.mrb[13].mxu1 }
 0x9aa   :  { %v1247_v43 = vadd.f32 %v1243_v32, %v1169_v39  ;;  %1427 = vrot.lane.b32.xlu0 %v1425_v40, %s7637_s25 }
 0x9ab   :  { %v1344_v44 = vpop.f32.mrb[12].mxu0 }
 0x9ac   :  { %v5998_v45 = vmul.f32 -1.442695, %v1247_v43  ;;  %v6451_v46 = vpop.f32.mrb[13].mxu0  ;;  %v1345_v54 = vadd.f32 %v7920_v17, %v1344_v44 }
 0x9ae   :  { %7238 = vpow2.f32 %v5998_v45  ;;  %v1418_v55 = vadd.f32 %v1414_v38, %v1345_v54 }
 0x9b0   :  { %v6002_v56 = vmul.f32 -1.442695, %v1418_v55 }
 0x9b8   :  { %v7239_v47 = vpop.eup %7238 }
 0x9b9   :  { %v1251_v49 = vadd.f32 1.0, %v7239_v47 }
 0x9bb   :  { %7240 = vrcp.f32 %v1251_v49 }
 0x9bc   :  { %7242 = vpow2.f32 %v6002_v56 }
 0x9c5   :  { %v7241_v51 = vpop.eup %7240  ;;  %v1257_v52 = vpop.permute.xlu1 %1256 }
 0x9c6   :  { %v1259_v53 = vmul.f32 %v7241_v51, %v1257_v52  ;;  %v7243_v57 = vpop.eup %7242  ;;  %v1266_v9 = vsub.f32 1.0, %v7241_v51  ;;  %v1272_v12 = vmul.f32 %v7241_v51, %v8040_v22 }
 0x9c7   :  { %v1422_v58 = vadd.f32 1.0, %v7243_v57 }
 0x9c8   :  { %1261 = vrot.lane.b32.xlu1 %v1259_v53, %s7640_s30 }
 0x9c9   :  { %7244 = vrcp.f32 %v1422_v58 }
 0x9d3   :  { %v7245_v59 = vpop.eup %7244 }
 0x9d4   :  { %v1437_v16 = vsub.f32 1.0, %v7245_v59  ;;  %v1443_v19 = vmul.f32 %v7245_v59, %v8046_v27 }
 0xa1c   :  { %v1428_v60 = vpop.permute.xlu0 %1427 }
 0xa1d   :  { %v1430_v61 = vmul.f32 %v7245_v59, %v1428_v60 }
 0xa1f   :  { %1432 = vrot.lane.b32.xlu0 %v1430_v61, %s7637_s25 }
 0xa3a   :  { %v1262_v62 = vpop.permute.xlu1 %1261 }
 0xa3b   :  { %v1264_v63 = vadd.f32 %v1262_v62, %v1169_v39 }
 0xa3d   :  { %7246 = vtanh.f32 %v1264_v63 }
 0xa47   :  { %v7247_v2 = vpop.eup %7246 }
 0xa48   :  { %1268 = vrot.lane.b32.xlu1 %v7247_v2, %s7641_s26 }
 0xa91   :  { %v1433_v3 = vpop.permute.xlu0 %1432 }
 0xa92   :  { %v1435_v6 = vadd.f32 %v1433_v3, %v1345_v54 }
 0xa94   :  { %7248 = vtanh.f32 %v1435_v6 }
 0xa9e   :  { %v7249_v7 = vpop.eup %7248 }
 0xa9f   :  { %1439 = vrot.lane.b32.xlu0 %v7249_v7, %s7638_s5 }
 0xaba   :  { %v1269_v11 = vpop.permute.xlu1 %1268 }
 0xabb   :  { %v1271_v14 = vmul.f32 %v1269_v11, %v1266_v9 }
 0xabd   :  { %v8086_v15 = vadd.f32 %v1272_v12, %v1271_v14 }
 0xabf   :  { %1521 = vrot.lane.b32.xlu1 %v8086_v15, %s7641_s26 }
 0xac3   :  { %1622 = vrot.lane.b32.xlu1 %v7899_v8, %s7641_s26 }
 0xb11   :  { %v1440_v18 = vpop.permute.xlu0 %1439 }
 0xb12   :  { %v1442_v20 = vmul.f32 %v1440_v18, %v1437_v16 }
 0xb14   :  { %v8093_v21 = vadd.f32 %v1443_v19, %v1442_v20 }
 0xb16   :  { %1446 = vrot.lane.b32.xlu0 %v8093_v21, %s7638_s5 }
 0xb31   :  { %v1522_v22 = vpop.permute.xlu1 %1521 }
 0xb32   :  { %6479 = vmatmul.mubr.msk.f32.vlgmr.msra.gmra.mrb[14].mxu1 %vm470_vm4, %v1522_v22 }
 0xb33   :  { %6974 = vmatpush3.bf16.msra.mxu1 %v7886_v5  ;;  %6494 = vmatprep.mubr.msk.f32.mxu1 %vm7636_vm0, %v7635_v1 }
 0xb34   :  { %6975 = vmatprep.subr.bf16.mxu1 %v7634_v0 }
 0xb35   :  { %v1623_v24 = vpop.permute.xlu1 %1622 }
 0xb37   :  { %6977 = vmatpush3.bf16.msra.mxu1 %v7905_v10 }
 0xb38   :  { %6984 = vmatprep.subr.bf16.mxu1 %v7634_v0 }
 0xb88   :  { %v1447_v23 = vpop.permute.xlu0 %1446 }
 0xb89   :  { %6472 = vmatmul.mubr.msk.f32.vlgmr.msra.gmra.mrb[14].mxu0 %vm280_vm3, %v1447_v23  ;;  %6495 = vmatmul.mubr.msk.f32.vlgmr.msra.gmra.mrb[16].mxu1 %vm280_vm3, %v1447_v23 }
 0xb8a   :  { %6482 = vmatpush3.msk.msra.mxu0 %vm206_vm1, %v7884_v4  ;;  %6483 = vmatprep.mubr.msk.f32.mxu0 %vm7636_vm0, %v7635_v1 }
 0xb8b   :  { %6986 = vmatpush3.bf16.msra.mxu1 %v7927_v31  ;;  %6512 = vmatprep.mubr.msk.f32.mxu1 %vm7636_vm0, %v7635_v1 }
 0xb8c   :  { %6978 = vmatprep.subr.bf16.mxu0 %v7634_v0  ;;  %6987 = vmatprep.subr.bf16.mxu1 %v7634_v0 }
 0xb8d   :  { %6484 = vmatmul.mubr.msk.f32.vlgmr.msra.gmra.mrb[16].mxu0 %vm202_vm2, %v1623_v24 }
 0xb8e   :  { %6980 = vmatpush3.bf16.msra.mxu0 %v7938_v35  ;;  %6505 = vmatprep.mubr.msk.f32.mxu0 %vm7636_vm0, %v7635_v1 }
 0xb8f   :  { %6981 = vmatprep.subr.bf16.mxu0 %v7634_v0 }
 0xb92   :  { %6983 = vmatpush3.bf16.msra.mxu0 %v7943_v36 }
 0xb93   :  { %6515 = vmatprep.subr.mxu0 %v7635_v1 }
 0xc05   :  { %v1591_v25 = vpop.f32.mrb[14].mxu1 }
 0xc06   :  { %v1602_v26 = vadd.f32 %v1591_v25, %v7971_v48  ;;  %v6480_v27 = vpop.f32.mrb[15].mxu1 }
 0xc08   :  { %1604 = vrot.lane.b32.xlu0 %v1602_v26, %s7638_s5 }
 0xc5c   :  { %v1516_v28 = vpop.f32.mrb[14].mxu0  ;;  %v1762_v29 = vpop.f32.mrb[16].mxu1 }
 0xc5d   :  { %v1517_v30 = vadd.f32 %v7984_v50, %v1516_v28  ;;  %v1773_v32 = vadd.f32 %v1762_v29, %v7916_v13  ;;  %v6473_v33 = vpop.f32.mrb[15].mxu0  ;;  %v6496_v34 = vpop.f32.mrb[17].mxu1 }
 0xc5f   :  { %v1595_v37 = vadd.f32 %v1591_v25, %v1517_v30  ;;  %1775 = vrot.lane.b32.xlu1 %v1773_v32, %s7637_s25 }
 0xc60   :  { %v1692_v38 = vpop.f32.mrb[16].mxu0 }
 0xc61   :  { %v6005_v39 = vmul.f32 -1.442695, %v1595_v37  ;;  %v6485_v40 = vpop.f32.mrb[17].mxu0  ;;  %v1693_v46 = vadd.f32 %v7920_v17, %v1692_v38 }
 0xc63   :  { %7250 = vpow2.f32 %v6005_v39  ;;  %v1766_v47 = vadd.f32 %v1762_v29, %v1693_v46 }
 0xc65   :  { %v6009_v49 = vmul.f32 -1.442695, %v1766_v47 }
 0xc6d   :  { %v7251_v41 = vpop.eup %7250 }
 0xc6e   :  { %v1599_v42 = vadd.f32 1.0, %v7251_v41 }
 0xc70   :  { %7252 = vrcp.f32 %v1599_v42 }
 0xc71   :  { %7254 = vpow2.f32 %v6009_v49 }
 0xc7a   :  { %v7253_v43 = vpop.eup %7252  ;;  %v1605_v44 = vpop.permute.xlu0 %1604 }
 0xc7b   :  { %v1607_v45 = vmul.f32 %v7253_v43, %v1605_v44  ;;  %v7255_v51 = vpop.eup %7254  ;;  %v1614_v62 = vsub.f32 1.0, %v7253_v43  ;;  %v1620_v2 = vmul.f32 %v7253_v43, %v8086_v15 }
 0xc7c   :  { %v1770_v52 = vadd.f32 1.0, %v7255_v51 }
 0xc7d   :  { %1609 = vrot.lane.b32.xlu0 %v1607_v45, %s7640_s30 }
 0xc7e   :  { %7256 = vrcp.f32 %v1770_v52 }
 0xc88   :  { %v7257_v53 = vpop.eup %7256 }
 0xc89   :  { %v1785_v7 = vsub.f32 1.0, %v7257_v53  ;;  %v1791_v11 = vmul.f32 %v7257_v53, %v8093_v21 }
 0xcd1   :  { %v1776_v54 = vpop.permute.xlu1 %1775 }
 0xcd2   :  { %v1778_v55 = vmul.f32 %v7257_v53, %v1776_v54 }
 0xcd4   :  { %1780 = vrot.lane.b32.xlu1 %v1778_v55, %s7637_s25 }
 0xcef   :  { %v1610_v56 = vpop.permute.xlu0 %1609 }
 0xcf0   :  { %v1612_v57 = vadd.f32 %v1610_v56, %v1517_v30 }
 0xcf2   :  { %7258 = vtanh.f32 %v1612_v57 }
 0xcfc   :  { %v7259_v58 = vpop.eup %7258 }
 0xcfd   :  { %1616 = vrot.lane.b32.xlu0 %v7259_v58, %s7641_s26 }
 0xd46   :  { %v1781_v59 = vpop.permute.xlu1 %1780 }
 0xd47   :  { %v1783_v60 = vadd.f32 %v1781_v59, %v1693_v46 }
 0xd49   :  { %7260 = vtanh.f32 %v1783_v60 }
 0xd53   :  { %v7261_v61 = vpop.eup %7260 }
 0xd54   :  { %1787 = vrot.lane.b32.xlu1 %v7261_v61, %s7638_s5 }
 0xd6f   :  { %v1617_v63 = vpop.permute.xlu0 %1616 }
 0xd70   :  { %v1619_v3 = vmul.f32 %v1617_v63, %v1614_v62 }
 0xd72   :  { %v8133_v6 = vadd.f32 %v1620_v2, %v1619_v3 }
 0xd74   :  { %1869 = vrot.lane.b32.xlu0 %v8133_v6, %s7641_s26 }
 0xd78   :  { %1970 = vrot.lane.b32.xlu0 %v7899_v8, %s7644_s29 }
 0xdc6   :  { %v1788_v9 = vpop.permute.xlu1 %1787 }
 0xdc7   :  { %v1790_v12 = vmul.f32 %v1788_v9, %v1785_v7 }
 0xdc9   :  { %v8139_v14 = vadd.f32 %v1791_v11, %v1790_v12 }
 0xdcb   :  { %1794 = vrot.lane.b32.xlu1 %v8139_v14, %s7638_s5 }
 0xde6   :  { %v1870_v15 = vpop.permute.xlu0 %1869 }
 0xde7   :  { %6513 = vmatmul.mubr.msk.f32.vlgmr.msra.gmra.mrb[18].mxu1 %vm470_vm4, %v1870_v15 }
 0xde8   :  { %6989 = vmatpush3.bf16.msra.mxu1 %v7886_v5  ;;  %6528 = vmatprep.mubr.msk.f32.mxu1 %vm7636_vm0, %v7635_v1 }
 0xde9   :  { %6990 = vmatprep.subr.bf16.mxu1 %v7634_v0 }
 0xdea   :  { %v1971_v18 = vpop.permute.xlu0 %1970 }
 0xdec   :  { %6992 = vmatpush3.bf16.msra.mxu1 %v7905_v10 }
 0xded   :  { %6999 = vmatprep.subr.bf16.mxu1 %v7634_v0 }
 0xe3d   :  { %v1795_v16 = vpop.permute.xlu1 %1794 }
 0xe3e   :  { %6506 = vmatmul.mubr.msk.f32.vlgmr.msra.gmra.mrb[18].mxu0 %vm280_vm3, %v1795_v16  ;;  %6529 = vmatmul.mubr.msk.f32.vlgmr.msra.gmra.mrb[20].mxu1 %vm280_vm3, %v1795_v16 }
 0xe3f   :  { %6516 = vmatpush3.msk.msra.mxu0 %vm206_vm1, %v7884_v4  ;;  %6517 = vmatprep.mubr.msk.f32.mxu0 %vm7636_vm0, %v7635_v1 }
 0xe40   :  { %7001 = vmatpush3.bf16.msra.mxu1 %v7927_v31  ;;  %6546 = vmatprep.mubr.msk.f32.mxu1 %vm7636_vm0, %v7635_v1 }
 0xe41   :  { %6993 = vmatprep.subr.bf16.mxu0 %v7634_v0  ;;  %7002 = vmatprep.subr.bf16.mxu1 %v7634_v0 }
 0xe42   :  { %6518 = vmatmul.mubr.msk.f32.vlgmr.msra.gmra.mrb[20].mxu0 %vm202_vm2, %v1971_v18 }
 0xe43   :  { %6995 = vmatpush3.bf16.msra.mxu0 %v7938_v35  ;;  %6539 = vmatprep.mubr.msk.f32.mxu0 %vm7636_vm0, %v7635_v1 }
 0xe44   :  { %6996 = vmatprep.subr.bf16.mxu0 %v7634_v0 }
 0xe47   :  { %6998 = vmatpush3.bf16.msra.mxu0 %v7943_v36 }
 0xe48   :  { %6549 = vmatprep.subr.mxu0 %v7635_v1 }
 0xeba   :  { %v1939_v19 = vpop.f32.mrb[18].mxu1 }
 0xebb   :  { %v1950_v20 = vadd.f32 %v1939_v19, %v7971_v48  ;;  %v6514_v21 = vpop.f32.mrb[19].mxu1 }
 0xebd   :  { %1952 = vrot.lane.b32.xlu1 %v1950_v20, %s7638_s5 }
 0xf11   :  { %v1864_v22 = vpop.f32.mrb[18].mxu0  ;;  %v2110_v23 = vpop.f32.mrb[20].mxu1 }
 0xf12   :  { %v1865_v24 = vadd.f32 %v7984_v50, %v1864_v22  ;;  %v2121_v25 = vadd.f32 %v2110_v23, %v7916_v13  ;;  %v6507_v26 = vpop.f32.mrb[19].mxu0  ;;  %v6530_v27 = vpop.f32.mrb[21].mxu1 }
 0xf14   :  { %v1943_v28 = vadd.f32 %v1939_v19, %v1865_v24  ;;  %2123 = vrot.lane.b32.xlu0 %v2121_v25, %s7637_s25 }
 0xf15   :  { %v2040_v29 = vpop.f32.mrb[20].mxu0 }
 0xf16   :  { %v6012_v30 = vmul.f32 -1.442695, %v1943_v28  ;;  %v6519_v32 = vpop.f32.mrb[21].mxu0  ;;  %v2041_v40 = vadd.f32 %v7920_v17, %v2040_v29 }
 0xf18   :  { %7262 = vpow2.f32 %v6012_v30  ;;  %v2114_v41 = vadd.f32 %v2110_v23, %v2041_v40 }
 0xf1a   :  { %v6016_v42 = vmul.f32 -1.442695, %v2114_v41 }
 0xf22   :  { %v7263_v33 = vpop.eup %7262 }
 0xf23   :  { %v1947_v34 = vadd.f32 1.0, %v7263_v33 }
 0xf25   :  { %7264 = vrcp.f32 %v1947_v34 }
 0xf26   :  { %7266 = vpow2.f32 %v6016_v42 }
 0xf2f   :  { %v7265_v37 = vpop.eup %7264  ;;  %v1953_v38 = vpop.permute.xlu1 %1952 }
 0xf30   :  { %v1955_v39 = vmul.f32 %v7265_v37, %v1953_v38  ;;  %v7267_v43 = vpop.eup %7266  ;;  %v1962_v56 = vsub.f32 1.0, %v7265_v37  ;;  %v1968_v58 = vmul.f32 %v7265_v37, %v8133_v6 }
 0xf31   :  { %v2118_v44 = vadd.f32 1.0, %v7267_v43 }
 0xf32   :  { %1957 = vrot.lane.b32.xlu1 %v1955_v39, %s7640_s30 }
 0xf33   :  { %7268 = vrcp.f32 %v2118_v44 }
 0xf3d   :  { %v7269_v45 = vpop.eup %7268 }
 0xf3e   :  { %v2133_v61 = vsub.f32 1.0, %v7269_v45  ;;  %v2139_v63 = vmul.f32 %v7269_v45, %v8139_v14 }
 0xf86   :  { %v2124_v46 = vpop.permute.xlu0 %2123 }
 0xf87   :  { %v2126_v47 = vmul.f32 %v7269_v45, %v2124_v46 }
 0xf89   :  { %2128 = vrot.lane.b32.xlu0 %v2126_v47, %s7637_s25 }
 0xfa4   :  { %v1958_v49 = vpop.permute.xlu1 %1957 }
 0xfa5   :  { %v1960_v51 = vadd.f32 %v1958_v49, %v1865_v24 }
 0xfa7   :  { %7270 = vtanh.f32 %v1960_v51 }
 0xfb1   :  { %v7271_v52 = vpop.eup %7270 }
 0xfb2   :  { %1964 = vrot.lane.b32.xlu1 %v7271_v52, %s7641_s26  ;;  %v7432_v52 = vld [vmem:[%s8786_s23] sm:$0x3] }
 0xffb   :  { %v2129_v53 = vpop.permute.xlu0 %2128 }
 0xffc   :  { %v2131_v54 = vadd.f32 %v2129_v53, %v2041_v40 }
 0xffe   :  { %7272 = vtanh.f32 %v2131_v54 }
0x1008   :  { %v7273_v55 = vpop.eup %7272 }
0x1009   :  { %2135 = vrot.lane.b32.xlu0 %v7273_v55, %s7638_s5 }
0x1024   :  { %v1965_v57 = vpop.permute.xlu1 %1964 }
0x1025   :  { %v1967_v59 = vmul.f32 %v1965_v57, %v1962_v56 }
0x1027   :  { %v8179_v60 = vadd.f32 %v1968_v58, %v1967_v59 }
0x1029   :  { %2217 = vrot.lane.b32.xlu1 %v8179_v60, %s7641_s26 }
0x102d   :  { %2318 = vrot.lane.b32.xlu1 %v7899_v8, %s7645_s20 }
0x107b   :  { %v2136_v62 = vpop.permute.xlu0 %2135 }
0x107c   :  { %v2138_v2 = vmul.f32 %v2136_v62, %v2133_v61  ;;  %v7433_v61 = vld [vmem:[#allocation2] sm:$0xf] }
0x107e   :  { %v8185_v3 = vadd.f32 %v2139_v63, %v2138_v2 }
0x1080   :  { %2142 = vrot.lane.b32.xlu0 %v8185_v3, %s7638_s5 }
0x109b   :  { %v2218_v6 = vpop.permute.xlu1 %2217 }
0x109c   :  { %6547 = vmatmul.mubr.msk.f32.vlgmr.msra.gmra.mrb[22].mxu1 %vm470_vm4, %v2218_v6 }
0x109d   :  { %7004 = vmatpush3.bf16.msra.mxu1 %v7886_v5  ;;  %6562 = vmatprep.mubr.msk.f32.mxu1 %vm7636_vm0, %v7635_v1 }
0x109e   :  { %7005 = vmatprep.subr.bf16.mxu1 %v7634_v0 }
0x109f   :  { %v2319_v7 = vpop.permute.xlu1 %2318 }
0x10a1   :  { %7007 = vmatpush3.bf16.msra.mxu1 %v7905_v10 }
0x10a2   :  { %7014 = vmatprep.subr.bf16.mxu1 %v7634_v0 }
0x10f2   :  { %v2143_v8 = vpop.permute.xlu0 %2142 }
0x10f3   :  { %6540 = vmatmul.mubr.msk.f32.vlgmr.msra.gmra.mrb[22].mxu0 %vm280_vm3, %v2143_v8  ;;  %6563 = vmatmul.mubr.msk.f32.vlgmr.msra.gmra.mrb[24].mxu1 %vm280_vm3, %v2143_v8 }
0x10f4   :  { %6550 = vmatpush3.msk.msra.mxu0 %vm206_vm1, %v7884_v4  ;;  %6551 = vmatprep.mubr.msk.f32.mxu0 %vm7636_vm0, %v7635_v1 }
0x10f5   :  { %7016 = vmatpush3.bf16.msra.mxu1 %v7927_v31  ;;  %6580 = vmatprep.mubr.msk.f32.mxu1 %vm7636_vm0, %v7635_v1 }
0x10f6   :  { %7008 = vmatprep.subr.bf16.mxu0 %v7634_v0  ;;  %7017 = vmatprep.subr.bf16.mxu1 %v7634_v0 }
0x10f7   :  { %6552 = vmatmul.mubr.msk.f32.vlgmr.msra.gmra.mrb[24].mxu0 %vm202_vm2, %v2319_v7 }
0x10f8   :  { %7010 = vmatpush3.bf16.msra.mxu0 %v7938_v35  ;;  %6573 = vmatprep.mubr.msk.f32.mxu0 %vm7636_vm0, %v7635_v1 }
0x10f9   :  { %7011 = vmatprep.subr.bf16.mxu0 %v7634_v0 }
0x10fc   :  { %7013 = vmatpush3.bf16.msra.mxu0 %v7943_v36 }
0x10fd   :  { %6583 = vmatprep.subr.mxu0 %v7635_v1 }
0x116f   :  { %v2287_v4 = vpop.f32.mrb[22].mxu1 }
0x1170   :  { %v2298_v9 = vadd.f32 %v2287_v4, %v7971_v48  ;;  %v6548_v11 = vpop.f32.mrb[23].mxu1 }
0x1172   :  { %2300 = vrot.lane.b32.xlu0 %v2298_v9, %s7638_s5 }
0x11c6   :  { %v2212_v12 = vpop.f32.mrb[22].mxu0  ;;  %v2458_v14 = vpop.f32.mrb[24].mxu1 }
0x11c7   :  { %v2213_v15 = vadd.f32 %v7984_v50, %v2212_v12  ;;  %v2469_v16 = vadd.f32 %v2458_v14, %v7916_v13  ;;  %v6541_v18 = vpop.f32.mrb[23].mxu0  ;;  %v6564_v19 = vpop.f32.mrb[25].mxu1 }
0x11c9   :  { %v2291_v20 = vadd.f32 %v2287_v4, %v2213_v15  ;;  %2471 = vrot.lane.b32.xlu1 %v2469_v16, %s7637_s25 }
0x11ca   :  { %v2388_v21 = vpop.f32.mrb[24].mxu0 }
0x11cb   :  { %v6019_v22 = vmul.f32 -1.442695, %v2291_v20  ;;  %v6553_v23 = vpop.f32.mrb[25].mxu0  ;;  %v2389_v29 = vadd.f32 %v7920_v17, %v2388_v21 }
0x11cd   :  { %7274 = vpow2.f32 %v6019_v22  ;;  %v2462_v30 = vadd.f32 %v2458_v14, %v2389_v29 }
0x11cf   :  { %v6023_v32 = vmul.f32 -1.442695, %v2462_v30 }
0x11d7   :  { %v7275_v24 = vpop.eup %7274 }
0x11d8   :  { %v2295_v25 = vadd.f32 1.0, %v7275_v24 }
0x11da   :  { %7276 = vrcp.f32 %v2295_v25 }
0x11db   :  { %7278 = vpow2.f32 %v6023_v32 }
0x11e4   :  { %v7277_v26 = vpop.eup %7276  ;;  %v2301_v27 = vpop.permute.xlu0 %2300 }
0x11e5   :  { %v2303_v28 = vmul.f32 %v7277_v26, %v2301_v27  ;;  %v7279_v33 = vpop.eup %7278  ;;  %v2310_v45 = vsub.f32 1.0, %v7277_v26  ;;  %v2316_v47 = vmul.f32 %v7277_v26, %v8179_v60 }
0x11e6   :  { %v2466_v34 = vadd.f32 1.0, %v7279_v33 }
0x11e7   :  { %2305 = vrot.lane.b32.xlu0 %v2303_v28, %s7640_s30 }
0x11e8   :  { %7280 = vrcp.f32 %v2466_v34 }
0x11f2   :  { %v7281_v37 = vpop.eup %7280 }
0x11f3   :  { %v2481_v53 = vsub.f32 1.0, %v7281_v37  ;;  %v2487_v55 = vmul.f32 %v7281_v37, %v8185_v3 }
0x123b   :  { %v2472_v38 = vpop.permute.xlu1 %2471 }
0x123c   :  { %v2474_v39 = vmul.f32 %v7281_v37, %v2472_v38 }
0x123e   :  { %2476 = vrot.lane.b32.xlu1 %v2474_v39, %s7637_s25 }
0x1259   :  { %v2306_v40 = vpop.permute.xlu0 %2305 }
0x125a   :  { %v2308_v41 = vadd.f32 %v2306_v40, %v2213_v15 }
0x125c   :  { %7282 = vtanh.f32 %v2308_v41 }
0x1266   :  { %v7283_v42 = vpop.eup %7282 }
0x1267   :  { %2312 = vrot.lane.b32.xlu0 %v7283_v42, %s7641_s26 }
0x12b0   :  { %v2477_v43 = vpop.permute.xlu1 %2476 }
0x12b1   :  { %v2479_v44 = vadd.f32 %v2477_v43, %v2389_v29 }
0x12b3   :  { %7284 = vtanh.f32 %v2479_v44 }
0x12bd   :  { %v7285_v17 = vpop.eup %7284 }
0x12be   :  { %2483 = vrot.lane.b32.xlu1 %v7285_v17, %s7638_s5 }
0x12d9   :  { %v2313_v46 = vpop.permute.xlu0 %2312 }
0x12da   :  { %v2315_v49 = vmul.f32 %v2313_v46, %v2310_v45 }
0x12dc   :  { %v8225_v51 = vadd.f32 %v2316_v47, %v2315_v49  ;;  %v7435_v49 = vld [vmem:[#allocation9] ss:$0 sm:$0xff] }
0x12de   :  { %2565 = vrot.lane.b32.xlu0 %v8225_v51, %s7641_s26 }
0x12e2   :  { %2666 = vrot.lane.b32.xlu0 %v7432_v52, %s7646_s28 }
0x1330   :  { %v2484_v54 = vpop.permute.xlu1 %2483 }
0x1331   :  { %v2486_v56 = vmul.f32 %v2484_v54, %v2481_v53 }
0x1333   :  { %v8233_v57 = vadd.f32 %v2487_v55, %v2486_v56 }
0x1335   :  { %2490 = vrot.lane.b32.xlu1 %v8233_v57, %s7638_s5 }
0x1350   :  { %v2566_v58 = vpop.permute.xlu0 %2565 }
0x1351   :  { %6581 = vmatmul.mubr.msk.f32.vlgmr.msra.gmra.mrb[26].mxu1 %vm470_vm4, %v2566_v58 }
0x1352   :  { %7019 = vmatpush3.bf16.msra.mxu1 %v7886_v5  ;;  %6596 = vmatprep.mubr.msk.f32.mxu1 %vm7636_vm0, %v7635_v1 }
0x1353   :  { %7020 = vmatprep.subr.bf16.mxu1 %v7634_v0 }
0x1354   :  { %v2667_v60 = vpop.permute.xlu0 %2666 }
0x1356   :  { %7022 = vmatpush3.bf16.msra.mxu1 %v7905_v10 }
0x1357   :  { %7029 = vmatprep.subr.bf16.mxu1 %v7634_v0 }
0x13a7   :  { %v2491_v59 = vpop.permute.xlu1 %2490 }
0x13a8   :  { %6574 = vmatmul.mubr.msk.f32.vlgmr.msra.gmra.mrb[26].mxu0 %vm280_vm3, %v2491_v59  ;;  %6597 = vmatmul.mubr.msk.f32.vlgmr.msra.gmra.mrb[28].mxu1 %vm280_vm3, %v2491_v59 }
0x13a9   :  { %6584 = vmatpush3.msk.msra.mxu0 %vm206_vm1, %v7433_v61  ;;  %6585 = vmatprep.mubr.msk.f32.mxu0 %vm7636_vm0, %v7635_v1  ;;  %v178_v61 = vld [vmem:[%s8763_s10] sm:$0xff] }
0x13aa   :  { %7031 = vmatpush3.bf16.msra.mxu1 %v7927_v31  ;;  %6614 = vmatprep.mubr.msk.f32.mxu1 %vm7636_vm0, %v7635_v1 }
0x13ab   :  { %7023 = vmatprep.subr.bf16.mxu0 %v7634_v0  ;;  %7035 = vmatprep.subr.bf16.mxu1 %v7634_v0 }
0x13ac   :  { %6586 = vmatmul.mubr.msk.f32.vlgmr.msra.gmra.mrb[28].mxu0 %vm202_vm2, %v2667_v60 }
0x13ad   :  { %7025 = vmatpush3.bf16.msra.mxu0 %v7938_v35  ;;  %6607 = vmatprep.mubr.msk.f32.mxu0 %vm7636_vm0, %v7635_v1 }
0x13ae   :  { %7026 = vmatprep.subr.bf16.mxu0 %v7634_v0 }
0x13b1   :  { %7028 = vmatpush3.bf16.msra.mxu0 %v7943_v36 }
0x13b2   :  { %7032 = vmatprep.subr.bf16.mxu0 %v7634_v0 }
0x1424   :  { %v2635_v5 = vpop.f32.mrb[26].mxu1 }
0x1425   :  { %v2646_v10 = vadd.f32 %v2635_v5, %v7971_v48  ;;  %v6582_v31 = vpop.f32.mrb[27].mxu1 }
0x1427   :  { %2648 = vrot.lane.b32.xlu1 %v2646_v10, %s7638_s5  ;;  %v176_v10 = vld [vmem:[#allocation12] sm:$0xff] }
0x147b   :  { %v2560_v62 = vpop.f32.mrb[26].mxu0  ;;  %v2806_v63 = vpop.f32.mrb[28].mxu1 }
0x147c   :  { %v2561_v2 = vadd.f32 %v7984_v50, %v2560_v62  ;;  %v2817_v35 = vadd.f32 %v2806_v63, %v7916_v13  ;;  %v6575_v3 = vpop.f32.mrb[27].mxu0  ;;  %v6598_v6 = vpop.f32.mrb[29].mxu1  ;;  %v7434_v50 = vld [vmem:[#allocation4] ss:$0 sm:$0xff] }
0x147d   :  { %v177_v62 = vld [vmem:[#allocation12 + $0x8] sm:$0xff] }
0x147e   :  { %v2639_v8 = vadd.f32 %v2635_v5, %v2561_v2  ;;  %2819 = vrot.lane.b32.xlu0 %v2817_v35, %s7637_s25  ;;  %v179_v5 = vld [vmem:[%s8763_s10 + $0x8] sm:$0xff]  ;;  %v6037_v35 = vld [vmem:[%s8765_s12] ss:$0 sm:$0xff] }
0x147f   :  { %v2736_v36 = vpop.f32.mrb[28].mxu0  ;;  %v8289_v31 = vpack.c.bf16 %v179_v5, %v178_v61 }
0x1480   :  { %v6026_v7 = vmul.f32 -1.442695, %v2639_v8  ;;  %v6587_v4 = vpop.f32.mrb[29].mxu0  ;;  %v2737_v16 = vadd.f32 %v7434_v50, %v2736_v36 }
0x1482   :  { %7286 = vpow2.f32 %v6026_v7  ;;  %v2810_v13 = vadd.f32 %v2806_v63, %v2737_v16  ;;  %v7033_v63 = vpack.c.bf16 %v177_v62, %v176_v10 }
0x1484   :  { %v6030_v18 = vmul.f32 -1.442695, %v2810_v13 }
0x148c   :  { %v7287_v9 = vpop.eup %7286 }
0x148d   :  { %v2643_v11 = vadd.f32 1.0, %v7287_v9 }
0x148f   :  { %7288 = vrcp.f32 %v2643_v11 }
0x1490   :  { %7290 = vpow2.f32 %v6030_v18 }
0x1499   :  { %v7289_v12 = vpop.eup %7288  ;;  %v2649_v14 = vpop.permute.xlu1 %2648 }
0x149a   :  { %v2651_v15 = vmul.f32 %v7289_v12, %v2649_v14  ;;  %v7291_v19 = vpop.eup %7290  ;;  %v2658_v30 = vsub.f32 1.0, %v7289_v12  ;;  %v2664_v33 = vmul.f32 %v7289_v12, %v8225_v51 }
0x149b   :  { %v2814_v20 = vadd.f32 1.0, %v7291_v19 }
0x149c   :  { %2653 = vrot.lane.b32.xlu1 %v2651_v15, %s7640_s30  ;;  %v6034_v15 = vld [vmem:[%s8764_s11] ss:$0 sm:$0xff]  ;;  %s8787_s11 = sld [smem:[#allocation24_spill]] }
0x149d   :  { %7292 = vrcp.f32 %v2814_v20 }
0x14a7   :  { %v7293_v21 = vpop.eup %7292 }
0x14a8   :  { %v2829_v38 = vsub.f32 1.0, %v7293_v21  ;;  %v2835_v40 = vmul.f32 %v7293_v21, %v8233_v57 }
0x14f0   :  { %v2820_v22 = vpop.permute.xlu0 %2819 }
0x14f1   :  { %v2822_v23 = vmul.f32 %v7293_v21, %v2820_v22 }
0x14f3   :  { %2824 = vrot.lane.b32.xlu0 %v2822_v23, %s7637_s25 }
0x150e   :  { %v2654_v24 = vpop.permute.xlu1 %2653 }
0x150f   :  { %v2656_v25 = vadd.f32 %v2654_v24, %v2561_v2 }
0x1511   :  { %7294 = vtanh.f32 %v2656_v25 }
0x151b   :  { %v7295_v26 = vpop.eup %7294 }
0x151c   :  { %2660 = vrot.lane.b32.xlu1 %v7295_v26, %s7641_s26 }
0x1565   :  { %v2825_v27 = vpop.permute.xlu0 %2824 }
0x1566   :  { %v2827_v28 = vadd.f32 %v2825_v27, %v2737_v16  ;;  %v184_v27 = vld [vmem:[%s8767_s14] sm:$0xff] }
0x1568   :  { %7296 = vtanh.f32 %v2827_v28  ;;  %v185_v28 = vld [vmem:[%s8767_s14 + $0x8] sm:$0xff] }
0x1572   :  { %v7297_v29 = vpop.eup %7296 }
0x1573   :  { %2831 = vrot.lane.b32.xlu0 %v7297_v29, %s7638_s5  ;;  %v186_v29 = vld [vmem:[%s8767_s14 + $0x10] sm:$0xff] }
0x158e   :  { %v2661_v32 = vpop.permute.xlu1 %2660 }
0x158f   :  { %v2663_v34 = vmul.f32 %v2661_v32, %v2658_v30  ;;  %v8327_v30 = vpack.c.bf16 %v185_v28, %v184_v27  ;;  %v187_v32 = vld [vmem:[%s8767_s14 + $0x18] sm:$0xff] }
0x1591   :  { %v2665_v37 = vadd.f32 %v2664_v33, %v2663_v34  ;;  %v182_v33 = vld [vmem:[#allocation13] sm:$0xff]  ;;  %v183_v34 = vld [vmem:[#allocation13 + $0x8] sm:$0xff] }
0x1593   :  { %2913 = vrot.lane.b32.xlu1 %v2665_v37, %s7641_s26 }
0x15e5   :  { %v2832_v39 = vpop.permute.xlu0 %2831 }
0x15e6   :  { %v2834_v41 = vmul.f32 %v2832_v39, %v2829_v38  ;;  %v8335_v38 = vpack.c.bf16 %v187_v32, %v186_v29 }
0x15e8   :  { %v2836_v42 = vadd.f32 %v2835_v40, %v2834_v41  ;;  %v6041_v40 = vld [vmem:[%s8769_s16] ss:$0 sm:$0xff] }
0x15ea   :  { %2838 = vrot.lane.b32.xlu0 %v2836_v42, %s7638_s5 }
0x1605   :  { %v2914_v43 = vpop.permute.xlu1 %2913 }
0x1606   :  { %6615 = vmatmul.mubr.msk.f32.vlgmr.msra.gmra.mrb[30].mxu1 %vm470_vm4, %v2914_v43 }
0x1607   :  { %6628 = vmatprep.mubr.msk.f32.mxu1 %vm7636_vm0, %v7635_v1  ;;  %7037 = vmatpush3.bf16.msra.mxu1 %v8289_v31 }
0x1608   :  { %7041 = vmatprep.subr.bf16.mxu1 %v7634_v0 }
0x160a   :  { %6629 = vmatmul.mubr.f32.vlgmr.msra.gmra.mrb[32].mxu1 %v7635_v1 }
0x160b   :  { %6646 = vmatprep.mubr.msk.f32.mxu1 %vm7636_vm0, %v7635_v1  ;;  %7043 = vmatpush3.bf16.msra.mxu1 %v8327_v30 }
0x160c   :  { %7044 = vmatprep.subr.bf16.mxu1 %v7634_v0 }
0x160f   :  { %7046 = vmatpush3.bf16.msra.mxu1 %v8335_v38 }
0x1610   :  { %7053 = vmatprep.subr.bf16.mxu1 %v7634_v0 }
0x1612   :  { %6647 = vmatmul.mubr.f32.vlgmr.msra.gmra.mrb[34].mxu1 %v7635_v1 }
0x1613   :  { %7055 = vmatpush3.bf16.msra.mxu1 %v8289_v31  ;;  %6664 = vmatprep.mubr.msk.f32.mxu1 %vm7636_vm0, %v7635_v1 }
0x1614   :  { %7059 = vmatprep.subr.bf16.mxu1 %v7634_v0 }
0x165c   :  { %v2839_v44 = vpop.permute.xlu0 %2838 }
0x165d   :  { %6608 = vmatmul.mubr.msk.f32.vlgmr.msra.gmra.mrb[30].mxu0 %vm280_vm3, %v2839_v44 }
0x165e   :  { %6621 = vmatprep.mubr.msk.f32.mxu0 %vm7636_vm0, %v7635_v1  ;;  %7034 = vmatpush3.bf16.msra.mxu0 %v7033_v63 }
0x165f   :  { %7038 = vmatprep.subr.bf16.mxu0 %v7634_v0 }
0x16d9   :  { %v2983_v17 = vpop.f32.mrb[30].mxu1 }
0x16da   :  { %v2994_v45 = vadd.f32 %v2983_v17, %v7971_v48  ;;  %v6616_v46 = vpop.f32.mrb[31].mxu1 }
0x16dc   :  { %2996 = vrot.lane.b32.xlu1 %v2994_v45, %s7638_s5 }
0x16dd   :  { %v3161_v4 = vpop.f32.mrb[32].mxu1 }
0x16de   :  { %v6630_v9 = vpop.f32.mrb[33].mxu1 }
0x16e5   :  { %v3347_v45 = vpop.f32.mrb[34].mxu1 }
0x16e6   :  { %v6648_v46 = vpop.f32.mrb[35].mxu1 }
0x1730   :  { %v2908_v47 = vpop.f32.mrb[30].mxu0 }
0x1731   :  { %v2909_v51 = vadd.f32 %v7435_v49, %v2908_v47  ;;  %v6609_v52 = vpop.f32.mrb[31].mxu0 }
0x1732   :  { %v8373_v52 = vld [vmem:[%s8768_s15] ss:$0 sm:$0xff] }
0x1733   :  { %v2987_v53 = vadd.f32 %v2983_v17, %v2909_v51 }
0x1735   :  { %v6033_v54 = vmul.f32 -1.442695, %v2987_v53 }
0x1737   :  { %7298 = vpow2.f32 %v6033_v54 }
0x1741   :  { %v7299_v55 = vpop.eup %7298 }
0x1742   :  { %v2991_v56 = vadd.f32 1.0, %v7299_v55 }
0x1744   :  { %7300 = vrcp.f32 %v2991_v56 }
0x174e   :  { %v7301_v57 = vpop.eup %7300  ;;  %v2997_v58 = vpop.permute.xlu1 %2996 }
0x174f   :  { %v2999_v59 = vmul.f32 %v7301_v57, %v2997_v58  ;;  %v3006_v3 = vsub.f32 1.0, %v7301_v57  ;;  %v3012_v8 = vmul.f32 %v7301_v57, %v2665_v37  ;;  %v8332_v37 = vpack.c.bf16 %v183_v34, %v182_v33 }
0x1751   :  { %3001 = vrot.lane.b32.xlu0 %v2999_v59, %s7640_s30 }
0x17c3   :  { %v3002_v60 = vpop.permute.xlu0 %3001 }
0x17c4   :  { %v3004_v48 = vadd.f32 %v3002_v60, %v2909_v51 }
0x17c6   :  { %7302 = vtanh.f32 %v3004_v48 }
0x17d0   :  { %v7303_v2 = vpop.eup %7302 }
0x17d1   :  { %3008 = vrot.lane.b32.xlu1 %v7303_v2, %s7641_s26 }
0x17d5   :  { %3177 = vrot.lane.b32.xlu1 %v6037_v35, %s7640_s30 }
0x1843   :  { %v3009_v6 = vpop.permute.xlu1 %3008 }
0x1844   :  { %v3011_v36 = vmul.f32 %v3009_v6, %v3006_v3 }
0x1846   :  { %v3013_v7 = vadd.f32 %v3012_v8, %v3011_v36 }
0x1847   :  { %v8303_v11 = vpop.permute.xlu1 %3177 }
0x1848   :  { %3021 = vrot.lane.b32.xlu0 %v3013_v7, %s7641_s26  ;;  %v3180_v12 = vadd.f32 %v8303_v11, %v3161_v4 }
0x184c   :  { %3182 = vrot.lane.b32.xlu0 %v3180_v12, %s7638_s5 }
0x18ba   :  { %v3022_v14 = vpop.permute.xlu0 %3021 }
0x18bb   :  { %6622 = vmatmul.mubr.msk.f32.vlgmr.msra.gmra.mrb[32].mxu0 %vm470_vm4, %v3022_v14 }
0x18bc   :  { %6635 = vmatprep.mubr.msk.f32.mxu0 %vm7636_vm0, %v7635_v1  ;;  %7040 = vmatpush3.bf16.msra.mxu0 %v8332_v37 }
0x18bd   :  { %7047 = vmatprep.subr.bf16.mxu0 %v7634_v0 }
0x18be   :  { %v3183_v22 = vpop.permute.xlu0 %3182 }
0x198e   :  { %v3091_v50 = vpop.f32.mrb[32].mxu0 }
0x198f   :  { %v8313_v16 = vadd.f32 %v6034_v15, %v3091_v50  ;;  %v6623_v13 = vpop.f32.mrb[33].mxu0  ;;  %v190_v15 = vld [vmem:[%s8770_s17] sm:$0xff]  ;;  %v191_v50 = vld [vmem:[%s8770_s17 + $0x8] sm:$0xff] }
0x1990   :  { %v192_v13 = vld [vmem:[%s8770_s17 + $0x10] sm:$0xff] }
0x1991   :  { %v3165_v18 = vadd.f32 %v3161_v4, %v8313_v16 }
0x1993   :  { %v6036_v19 = vmul.f32 -1.442695, %v3165_v18  ;;  %v8392_v18 = vpack.c.bf16 %v191_v50, %v190_v15 }
0x1995   :  { %7304 = vpow2.f32 %v6036_v19  ;;  %v193_v19 = vld [vmem:[%s8770_s17 + $0x18] sm:$0xff] }
0x199f   :  { %v7305_v20 = vpop.eup %7304 }
0x19a0   :  { %v3169_v21 = vadd.f32 1.0, %v7305_v20  ;;  %v8398_v20 = vpack.c.bf16 %v193_v19, %v192_v13 }
0x19a2   :  { %7306 = vrcp.f32 %v3169_v21 }
0x19ac   :  { %v7307_v23 = vpop.eup %7306 }
0x19ad   :  { %v3185_v24 = vmul.f32 %v7307_v23, %v3183_v22  ;;  %v3192_v41 = vsub.f32 1.0, %v7307_v23  ;;  %v3198_v43 = vmul.f32 0.0, %v7307_v23 }
0x19af   :  { %3187 = vrot.lane.b32.xlu1 %v3185_v24, %s7640_s30 }
0x1a21   :  { %v3188_v25 = vpop.permute.xlu1 %3187 }
0x1a22   :  { %v3190_v26 = vadd.f32 %v3188_v25, %v8313_v16 }
0x1a24   :  { %7308 = vtanh.f32 %v3190_v26 }
0x1a2e   :  { %v7309_v39 = vpop.eup %7308 }
0x1a2f   :  { %3194 = vrot.lane.b32.xlu0 %v7309_v39, %s7641_s26 }
0x1a33   :  { %3363 = vrot.lane.b32.xlu0 %v6041_v40, %s7637_s25  ;;  %v8440_v40 = vld [vmem:[%s8771_s18] ss:$0 sm:$0xff] }
0x1aa1   :  { %v3195_v42 = vpop.permute.xlu0 %3194 }
0x1aa2   :  { %v3197_v44 = vmul.f32 %v3195_v42, %v3192_v41 }
0x1aa4   :  { %v8352_v17 = vadd.f32 %v3198_v43, %v3197_v44 }
0x1aa5   :  { %v8356_v47 = vpop.permute.xlu0 %3363 }
0x1aa6   :  { %3207 = vrot.lane.b32.xlu1 %v8352_v17, %s7641_s26  ;;  %v3366_v49 = vadd.f32 %v8356_v47, %v3347_v45 }
0x1aaa   :  { %3368 = vrot.lane.b32.xlu1 %v3366_v49, %s7637_s25 }
0x1b18   :  { %v3208_v51 = vpop.permute.xlu1 %3207 }
0x1b19   :  { %6636 = vmatmul.mubr.msk.f32.vlgmr.msra.gmra.mrb[34].mxu0 %vm470_vm4, %v3208_v51  ;;  %6665 = vmatmul.mubr.msk.f32.vlgmr.msra.gmra.mrb[36].mxu1 %vm470_vm4, %v3208_v51 }
0x1b1a   :  { %7061 = vmatpush3.bf16.msra.mxu1 %v8327_v30  ;;  %6657 = vmatprep.mubr.msk.f32.mxu0 %vm7636_vm0, %v7635_v1 }
0x1b1b   :  { %7062 = vmatprep.subr.bf16.mxu1 %v7634_v0  ;;  %6682 = vmatprep.mubr.msk.f32.mxu1 %vm7636_vm0, %v7635_v1 }
0x1b1c   :  { %v3369_v5 = vpop.permute.xlu1 %3368  ;;  %7049 = vmatpush3.bf16.msra.mxu0 %v8392_v18 }
0x1b1d   :  { %7050 = vmatprep.subr.bf16.mxu0 %v7634_v0 }
0x1b1e   :  { %7064 = vmatpush3.bf16.msra.mxu1 %v8335_v38 }
0x1b1f   :  { %7071 = vmatprep.subr.bf16.mxu1 %v7634_v0 }
0x1b20   :  { %7052 = vmatpush3.bf16.msra.mxu0 %v8398_v20 }
0x1b21   :  { %7056 = vmatprep.subr.bf16.mxu0 %v7634_v0 }
0x1bec   :  { %v3277_v53 = vpop.f32.mrb[34].mxu0  ;;  %v3541_v54 = vpop.f32.mrb[36].mxu1 }
0x1bed   :  { %v3278_v55 = vadd.f32 %v8373_v52, %v3277_v53  ;;  %v3552_v56 = vadd.f32 %v3541_v54, %v8303_v11  ;;  %v6637_v57 = vpop.f32.mrb[35].mxu0  ;;  %v6666_v58 = vpop.f32.mrb[37].mxu1  ;;  %v3545_v63 = vadd.f32 %v3541_v54, %v8313_v16 }
0x1bef   :  { %v3351_v59 = vadd.f32 %v3347_v45, %v3278_v55  ;;  %3554 = vrot.lane.b32.xlu0 %v3552_v56, %s7638_s5  ;;  %v6046_v2 = vmul.f32 -1.442695, %v3545_v63 }
0x1bf1   :  { %v6040_v60 = vmul.f32 -1.442695, %v3351_v59 }
0x1bf3   :  { %7310 = vpow2.f32 %v6040_v60 }
0x1bfd   :  { %v7311_v48 = vpop.eup %7310 }
0x1bfe   :  { %v3355_v61 = vadd.f32 1.0, %v7311_v48 }
0x1c00   :  { %7312 = vrcp.f32 %v3355_v61 }
0x1c01   :  { %7314 = vpow2.f32 %v6046_v2 }
0x1c0a   :  { %v7313_v10 = vpop.eup %7312 }
0x1c0b   :  { %v3371_v62 = vmul.f32 %v7313_v10, %v3369_v5  ;;  %v7315_v35 = vpop.eup %7314  ;;  %v3378_v22 = vsub.f32 1.0, %v7313_v10  ;;  %v3384_v24 = vmul.f32 0.0, %v7313_v10 }
0x1c0c   :  { %v3549_v3 = vadd.f32 1.0, %v7315_v35 }
0x1c0d   :  { %3373 = vrot.lane.b32.xlu1 %v3371_v62, %s7637_s25 }
0x1c0e   :  { %7316 = vrcp.f32 %v3549_v3 }
0x1c18   :  { %v7317_v6 = vpop.eup %7316 }
0x1c19   :  { %v3564_v27 = vsub.f32 1.0, %v7317_v6  ;;  %v3570_v29 = vmul.f32 %v7317_v6, %v8352_v17 }
0x1c61   :  { %v3555_v8 = vpop.permute.xlu0 %3554 }
0x1c62   :  { %v3557_v36 = vmul.f32 %v7317_v6, %v3555_v8 }
0x1c64   :  { %3559 = vrot.lane.b32.xlu0 %v3557_v36, %s7640_s30 }
0x1c7f   :  { %v3374_v7 = vpop.permute.xlu1 %3373 }
0x1c80   :  { %v3376_v4 = vadd.f32 %v3374_v7, %v3278_v55 }
0x1c82   :  { %7318 = vtanh.f32 %v3376_v4 }
0x1c8c   :  { %v7319_v9 = vpop.eup %7318 }
0x1c8d   :  { %3380 = vrot.lane.b32.xlu1 %v7319_v9, %s7638_s5 }
0x1cd6   :  { %v3560_v12 = vpop.permute.xlu0 %3559 }
0x1cd7   :  { %v3562_v14 = vadd.f32 %v3560_v12, %v8313_v16 }
0x1cd9   :  { %7320 = vtanh.f32 %v3562_v14 }
0x1ce3   :  { %v7321_v21 = vpop.eup %7320 }
0x1ce4   :  { %3566 = vrot.lane.b32.xlu0 %v7321_v21, %s7641_s26 }
0x1cff   :  { %v3381_v23 = vpop.permute.xlu1 %3380 }
0x1d00   :  { %v3383_v25 = vmul.f32 %v3381_v23, %v3378_v22 }
0x1d02   :  { %v8404_v26 = vadd.f32 %v3384_v24, %v3383_v25 }
0x1d04   :  { %3393 = vrot.lane.b32.xlu1 %v8404_v26, %s7638_s5 }
0x1d56   :  { %v3567_v28 = vpop.permute.xlu0 %3566 }
0x1d57   :  { %v3569_v32 = vmul.f32 %v3567_v28, %v3564_v27 }
0x1d59   :  { %v8409_v33 = vadd.f32 %v3570_v29, %v3569_v32 }
0x1d5b   :  { %3573 = vrot.lane.b32.xlu0 %v8409_v33, %s7641_s26 }
0x1d76   :  { %v3394_v34 = vpop.permute.xlu1 %3393 }
0x1d77   :  { %6658 = vmatmul.mubr.msk.f32.vlgmr.msra.gmra.mrb[36].mxu0 %vm280_vm3, %v3394_v34  ;;  %6683 = vmatmul.mubr.msk.f32.vlgmr.msra.gmra.mrb[38].mxu1 %vm280_vm3, %v3394_v34 }
0x1d78   :  { %7058 = vmatpush3.bf16.msra.mxu0 %v8332_v37  ;;  %7073 = vmatpush3.bf16.msra.mxu1 %v8289_v31 }
0x1d79   :  { %6671 = vmatprep.mubr.msk.f32.mxu0 %vm7636_vm0, %v7635_v1  ;;  %6700 = vmatprep.mubr.msk.f32.mxu1 %vm7636_vm0, %v7635_v1 }
0x1d7a   :  { %7065 = vmatprep.subr.bf16.mxu0 %v7634_v0  ;;  %7077 = vmatprep.subr.bf16.mxu1 %v7634_v0 }
0x1dcd   :  { %v3574_v39 = vpop.permute.xlu0 %3573 }
0x1dce   :  { %6672 = vmatmul.mubr.msk.f32.vlgmr.msra.gmra.mrb[38].mxu0 %vm470_vm4, %v3574_v39  ;;  %6701 = vmatmul.mubr.msk.f32.vlgmr.msra.gmra.mrb[40].mxu1 %vm470_vm4, %v3574_v39 }
0x1dcf   :  { %7067 = vmatpush3.bf16.msra.mxu0 %v8392_v18  ;;  %7079 = vmatpush3.bf16.msra.mxu1 %v8327_v30 }
0x1dd0   :  { %7068 = vmatprep.subr.bf16.mxu0 %v7634_v0  ;;  %7080 = vmatprep.subr.bf16.mxu1 %v7634_v0 }
0x1dd1   :  { %6693 = vmatprep.mubr.msk.f32.mxu0 %vm7636_vm0, %v7635_v1  ;;  %6718 = vmatprep.mubr.msk.f32.mxu1 %vm7636_vm0, %v7635_v1 }
0x1dd3   :  { %7070 = vmatpush3.bf16.msra.mxu0 %v8398_v20  ;;  %7082 = vmatpush3.bf16.msra.mxu1 %v8335_v38 }
0x1dd4   :  { %7074 = vmatprep.subr.bf16.mxu0 %v7634_v0  ;;  %7089 = vmatprep.subr.bf16.mxu1 %v7634_v0 }
0x1e4a   :  { %v3463_v41 = vpop.f32.mrb[36].mxu0  ;;  %v3713_v42 = vpop.f32.mrb[38].mxu1 }
0x1e4b   :  { %v3464_v43 = vadd.f32 %v8440_v40, %v3463_v41  ;;  %v3724_v44 = vadd.f32 %v3713_v42, %v8356_v47  ;;  %v6659_v17 = vpop.f32.mrb[37].mxu0  ;;  %v6684_v45 = vpop.f32.mrb[39].mxu1 }
0x1e4d   :  { %v6044_v46 = vmul.f32 -1.442695, %v3464_v43  ;;  %3726 = vrot.lane.b32.xlu1 %v3724_v44, %s7637_s25 }
0x1e4f   :  { %7322 = vpow2.f32 %v6044_v46 }
0x1e59   :  { %v7323_v49 = vpop.eup %7322 }
0x1e5a   :  { %v3470_v51 = vadd.f32 1.0, %v7323_v49 }
0x1e5c   :  { %7324 = vrcp.f32 %v3470_v51 }
0x1e66   :  { %v7325_v53 = vpop.eup %7324 }
0x1e67   :  { %3474 = vst.msk [vmem:[%s8787_s11] sm:$0x3] %vm3473_vm5, %v7325_v53 }
0x1ea1   :  { %v3643_v54 = vpop.f32.mrb[38].mxu0  ;;  %v3897_v55 = vpop.f32.mrb[40].mxu1 }
0x1ea2   :  { %v3644_v56 = vadd.f32 %v8373_v52, %v3643_v54  ;;  %v3908_v57 = vadd.f32 %v3897_v55, %v8303_v11  ;;  %v6673_v58 = vpop.f32.mrb[39].mxu0  ;;  %v6702_v59 = vpop.f32.mrb[41].mxu1  ;;  %v3901_v2 = vadd.f32 %v3897_v55, %v8313_v16 }
0x1ea4   :  { %v3717_v60 = vadd.f32 %v3713_v42, %v3644_v56  ;;  %3910 = vrot.lane.b32.xlu0 %v3908_v57, %s7638_s5  ;;  %v6053_v35 = vmul.f32 -1.442695, %v3901_v2 }
0x1ea6   :  { %v6049_v48 = vmul.f32 -1.442695, %v3717_v60 }
0x1ea8   :  { %7326 = vpow2.f32 %v6049_v48 }
0x1eb2   :  { %v7327_v61 = vpop.eup %7326 }
0x1eb3   :  { %v3721_v5 = vadd.f32 1.0, %v7327_v61 }
0x1eb5   :  { %7328 = vrcp.f32 %v3721_v5 }
0x1eb6   :  { %7330 = vpow2.f32 %v6053_v35 }
0x1ebf   :  { %v7329_v10 = vpop.eup %7328  ;;  %v3727_v62 = vpop.permute.xlu1 %3726 }
0x1ec0   :  { %v3729_v63 = vmul.f32 %v7329_v10, %v3727_v62  ;;  %v7331_v3 = vpop.eup %7330  ;;  %v3736_v13 = vsub.f32 1.0, %v7329_v10  ;;  %v3742_v21 = vmul.f32 %v7329_v10, %v8404_v26 }
0x1ec1   :  { %v3905_v6 = vadd.f32 1.0, %v7331_v3 }
0x1ec2   :  { %3731 = vrot.lane.b32.xlu1 %v3729_v63, %s7637_s25 }
0x1ec3   :  { %7332 = vrcp.f32 %v3905_v6 }
0x1ecd   :  { %v7333_v8 = vpop.eup %7332 }
0x1ece   :  { %v3920_v24 = vsub.f32 1.0, %v7333_v8  ;;  %v3926_v27 = vmul.f32 %v7333_v8, %v8409_v33 }
0x1f16   :  { %v3911_v36 = vpop.permute.xlu0 %3910 }
0x1f17   :  { %v3913_v7 = vmul.f32 %v7333_v8, %v3911_v36 }
0x1f19   :  { %3915 = vrot.lane.b32.xlu0 %v3913_v7, %s7640_s30 }
0x1f34   :  { %v3732_v4 = vpop.permute.xlu1 %3731 }
0x1f35   :  { %v3734_v9 = vadd.f32 %v3732_v4, %v3644_v56 }
0x1f37   :  { %7334 = vtanh.f32 %v3734_v9 }
0x1f41   :  { %v7335_v12 = vpop.eup %7334 }
0x1f42   :  { %3738 = vrot.lane.b32.xlu1 %v7335_v12, %s7638_s5 }
0x1f8b   :  { %v3916_v14 = vpop.permute.xlu0 %3915 }
0x1f8c   :  { %v3918_v15 = vadd.f32 %v3916_v14, %v8313_v16 }
0x1f8e   :  { %7336 = vtanh.f32 %v3918_v15 }
0x1f98   :  { %v7337_v50 = vpop.eup %7336 }
0x1f99   :  { %3922 = vrot.lane.b32.xlu0 %v7337_v50, %s7641_s26 }
0x1fb4   :  { %v3739_v19 = vpop.permute.xlu1 %3738 }
0x1fb5   :  { %v3741_v22 = vmul.f32 %v3739_v19, %v3736_v13 }
0x1fb7   :  { %v8458_v23 = vadd.f32 %v3742_v21, %v3741_v22 }
0x1fb9   :  { %3745 = vrot.lane.b32.xlu1 %v8458_v23, %s7638_s5 }
0x200b   :  { %v3923_v25 = vpop.permute.xlu0 %3922 }
0x200c   :  { %v3925_v28 = vmul.f32 %v3923_v25, %v3920_v24 }
0x200e   :  { %v8463_v29 = vadd.f32 %v3926_v27, %v3925_v28 }
0x2010   :  { %3929 = vrot.lane.b32.xlu0 %v8463_v29, %s7641_s26 }
0x202b   :  { %v3746_v32 = vpop.permute.xlu1 %3745 }
0x202c   :  { %6694 = vmatmul.mubr.msk.f32.vlgmr.msra.gmra.mrb[40].mxu0 %vm280_vm3, %v3746_v32  ;;  %6719 = vmatmul.mubr.msk.f32.vlgmr.msra.gmra.mrb[42].mxu1 %vm280_vm3, %v3746_v32 }
0x202d   :  { %7076 = vmatpush3.bf16.msra.mxu0 %v8332_v37  ;;  %7091 = vmatpush3.bf16.msra.mxu1 %v8289_v31 }
0x202e   :  { %6707 = vmatprep.mubr.msk.f32.mxu0 %vm7636_vm0, %v7635_v1  ;;  %6736 = vmatprep.mubr.msk.f32.mxu1 %vm7636_vm0, %v7635_v1 }
0x202f   :  { %7083 = vmatprep.subr.bf16.mxu0 %v7634_v0  ;;  %7095 = vmatprep.subr.bf16.mxu1 %v7634_v0 }
0x2082   :  { %v3930_v26 = vpop.permute.xlu0 %3929 }
0x2083   :  { %6708 = vmatmul.mubr.msk.f32.vlgmr.msra.gmra.mrb[42].mxu0 %vm470_vm4, %v3930_v26  ;;  %6737 = vmatmul.mubr.msk.f32.vlgmr.msra.gmra.mrb[44].mxu1 %vm470_vm4, %v3930_v26 }
0x2084   :  { %7085 = vmatpush3.bf16.msra.mxu0 %v8392_v18  ;;  %7097 = vmatpush3.bf16.msra.mxu1 %v8327_v30 }
0x2085   :  { %7086 = vmatprep.subr.bf16.mxu0 %v7634_v0  ;;  %7098 = vmatprep.subr.bf16.mxu1 %v7634_v0 }
0x2086   :  { %6729 = vmatprep.mubr.msk.f32.mxu0 %vm7636_vm0, %v7635_v1  ;;  %6754 = vmatprep.mubr.msk.f32.mxu1 %vm7636_vm0, %v7635_v1 }
0x2088   :  { %7088 = vmatpush3.bf16.msra.mxu0 %v8398_v20  ;;  %7100 = vmatpush3.bf16.msra.mxu1 %v8335_v38 }
0x2089   :  { %7092 = vmatprep.subr.bf16.mxu0 %v7634_v0  ;;  %7107 = vmatprep.subr.bf16.mxu1 %v7634_v0 }
0x20ff   :  { %v8491_v33 = vpop.f32.mrb[40].mxu0  ;;  %v4069_v34 = vpop.f32.mrb[42].mxu1 }
0x2100   :  { %v4080_v39 = vadd.f32 %v4069_v34, %v8356_v47  ;;  %v6695_v41 = vpop.f32.mrb[41].mxu0  ;;  %v6720_v42 = vpop.f32.mrb[43].mxu1 }
0x2102   :  { %4082 = vrot.lane.b32.xlu1 %v4080_v39, %s7637_s25 }
0x2156   :  { %v3999_v43 = vpop.f32.mrb[42].mxu0  ;;  %v4253_v44 = vpop.f32.mrb[44].mxu1 }
0x2157   :  { %v4000_v17 = vadd.f32 %v8373_v52, %v3999_v43  ;;  %v4264_v45 = vadd.f32 %v4253_v44, %v8303_v11  ;;  %v6709_v46 = vpop.f32.mrb[43].mxu0  ;;  %v6738_v49 = vpop.f32.mrb[45].mxu1  ;;  %v4257_v59 = vadd.f32 %v4253_v44, %v8313_v16 }
0x2159   :  { %v4073_v51 = vadd.f32 %v4069_v34, %v4000_v17  ;;  %4266 = vrot.lane.b32.xlu0 %v4264_v45, %s7638_s5  ;;  %v6060_v60 = vmul.f32 -1.442695, %v4257_v59 }
0x215b   :  { %v6056_v53 = vmul.f32 -1.442695, %v4073_v51 }
0x215d   :  { %7338 = vpow2.f32 %v6056_v53 }
0x2167   :  { %v7339_v54 = vpop.eup %7338 }
0x2168   :  { %v4077_v55 = vadd.f32 1.0, %v7339_v54 }
0x216a   :  { %7340 = vrcp.f32 %v4077_v55 }
0x216b   :  { %7342 = vpow2.f32 %v6060_v60 }
0x2174   :  { %v7341_v56 = vpop.eup %7340  ;;  %v4083_v57 = vpop.permute.xlu1 %4082 }
0x2175   :  { %v4085_v58 = vmul.f32 %v7341_v56, %v4083_v57  ;;  %v7343_v48 = vpop.eup %7342  ;;  %v4092_v36 = vsub.f32 1.0, %v7341_v56  ;;  %v4098_v4 = vmul.f32 %v7341_v56, %v8458_v23 }
0x2176   :  { %v4261_v61 = vadd.f32 1.0, %v7343_v48 }
0x2177   :  { %4087 = vrot.lane.b32.xlu1 %v4085_v58, %s7637_s25 }
0x2178   :  { %7344 = vrcp.f32 %v4261_v61 }
0x2182   :  { %v7345_v5 = vpop.eup %7344 }
0x2183   :  { %v4276_v14 = vsub.f32 1.0, %v7345_v5  ;;  %v4282_v50 = vmul.f32 %v7345_v5, %v8463_v29 }
0x21cb   :  { %v4267_v10 = vpop.permute.xlu0 %4266 }
0x21cc   :  { %v4269_v62 = vmul.f32 %v7345_v5, %v4267_v10 }
0x21ce   :  { %4271 = vrot.lane.b32.xlu0 %v4269_v62, %s7640_s30 }
0x21e9   :  { %v4088_v63 = vpop.permute.xlu1 %4087 }
0x21ea   :  { %v4090_v2 = vadd.f32 %v4088_v63, %v4000_v17 }
0x21ec   :  { %7346 = vtanh.f32 %v4090_v2 }
0x21f6   :  { %v7347_v35 = vpop.eup %7346 }
0x21f7   :  { %4094 = vrot.lane.b32.xlu1 %v7347_v35, %s7638_s5 }
0x2240   :  { %v4272_v3 = vpop.permute.xlu0 %4271 }
0x2241   :  { %v4274_v6 = vadd.f32 %v4272_v3, %v8313_v16 }
0x2243   :  { %7348 = vtanh.f32 %v4274_v6 }
0x224d   :  { %v7349_v8 = vpop.eup %7348 }
0x224e   :  { %4278 = vrot.lane.b32.xlu0 %v7349_v8, %s7641_s26 }
0x2269   :  { %v4095_v7 = vpop.permute.xlu1 %4094 }
0x226a   :  { %v4097_v9 = vmul.f32 %v4095_v7, %v4092_v36 }
0x226c   :  { %v8505_v12 = vadd.f32 %v4098_v4, %v4097_v9 }
0x226e   :  { %4101 = vrot.lane.b32.xlu1 %v8505_v12, %s7638_s5 }
0x22c0   :  { %v4279_v15 = vpop.permute.xlu0 %4278 }
0x22c1   :  { %v4281_v13 = vmul.f32 %v4279_v15, %v4276_v14 }
0x22c3   :  { %v8510_v19 = vadd.f32 %v4282_v50, %v4281_v13 }
0x22c5   :  { %4285 = vrot.lane.b32.xlu0 %v8510_v19, %s7641_s26 }
0x22e0   :  { %v4102_v21 = vpop.permute.xlu1 %4101 }
0x22e1   :  { %6730 = vmatmul.mubr.msk.f32.vlgmr.msra.gmra.mrb[44].mxu0 %vm280_vm3, %v4102_v21  ;;  %6755 = vmatmul.mubr.msk.f32.vlgmr.msra.gmra.mrb[46].mxu1 %vm280_vm3, %v4102_v21 }
0x22e2   :  { %7094 = vmatpush3.bf16.msra.mxu0 %v8332_v37  ;;  %7109 = vmatpush3.bf16.msra.mxu1 %v8289_v31 }
0x22e3   :  { %6743 = vmatprep.mubr.msk.f32.mxu0 %vm7636_vm0, %v7635_v1  ;;  %6772 = vmatprep.mubr.msk.f32.mxu1 %vm7636_vm0, %v7635_v1 }
0x22e4   :  { %7101 = vmatprep.subr.bf16.mxu0 %v7634_v0  ;;  %7113 = vmatprep.subr.bf16.mxu1 %v7634_v0 }
0x2337   :  { %v4286_v22 = vpop.permute.xlu0 %4285 }
0x2338   :  { %6744 = vmatmul.mubr.msk.f32.vlgmr.msra.gmra.mrb[46].mxu0 %vm470_vm4, %v4286_v22  ;;  %6773 = vmatmul.mubr.msk.f32.vlgmr.msra.gmra.mrb[48].mxu1 %vm470_vm4, %v4286_v22 }
0x2339   :  { %7103 = vmatpush3.bf16.msra.mxu0 %v8392_v18  ;;  %7115 = vmatpush3.bf16.msra.mxu1 %v8327_v30 }
0x233a   :  { %7104 = vmatprep.subr.bf16.mxu0 %v7634_v0  ;;  %7116 = vmatprep.subr.bf16.mxu1 %v7634_v0 }
0x233b   :  { %6765 = vmatprep.mubr.msk.f32.mxu0 %vm7636_vm0, %v7635_v1  ;;  %6790 = vmatprep.mubr.msk.f32.mxu1 %vm7636_vm0, %v7635_v1 }
0x233d   :  { %7106 = vmatpush3.bf16.msra.mxu0 %v8398_v20  ;;  %7118 = vmatpush3.bf16.msra.mxu1 %v8335_v38 }
0x233e   :  { %7110 = vmatprep.subr.bf16.mxu0 %v7634_v0  ;;  %7125 = vmatprep.subr.bf16.mxu1 %v7634_v0 }
0x23b4   :  { %v8538_v23 = vpop.f32.mrb[44].mxu0  ;;  %v4425_v24 = vpop.f32.mrb[46].mxu1 }
0x23b5   :  { %v4436_v25 = vadd.f32 %v4425_v24, %v8356_v47  ;;  %v6731_v27 = vpop.f32.mrb[45].mxu0  ;;  %v6756_v28 = vpop.f32.mrb[47].mxu1 }
0x23b7   :  { %4438 = vrot.lane.b32.xlu1 %v4436_v25, %s7637_s25 }
0x240b   :  { %v4355_v29 = vpop.f32.mrb[46].mxu0  ;;  %v4609_v32 = vpop.f32.mrb[48].mxu1 }
0x240c   :  { %v4356_v26 = vadd.f32 %v8373_v52, %v4355_v29  ;;  %v4620_v34 = vadd.f32 %v4609_v32, %v8303_v11  ;;  %v6745_v39 = vpop.f32.mrb[47].mxu0  ;;  %v6774_v41 = vpop.f32.mrb[49].mxu1  ;;  %v4613_v51 = vadd.f32 %v4609_v32, %v8313_v16 }
0x240e   :  { %v4429_v42 = vadd.f32 %v4425_v24, %v4356_v26  ;;  %4622 = vrot.lane.b32.xlu0 %v4620_v34, %s7638_s5  ;;  %v6067_v53 = vmul.f32 -1.442695, %v4613_v51 }
0x2410   :  { %v6063_v43 = vmul.f32 -1.442695, %v4429_v42 }
0x2412   :  { %7350 = vpow2.f32 %v6063_v43 }
0x241c   :  { %v7351_v44 = vpop.eup %7350 }
0x241d   :  { %v4433_v17 = vadd.f32 1.0, %v7351_v44 }
0x241f   :  { %7352 = vrcp.f32 %v4433_v17 }
0x2420   :  { %7354 = vpow2.f32 %v6067_v53 }
0x2429   :  { %v7353_v45 = vpop.eup %7352  ;;  %v4439_v46 = vpop.permute.xlu1 %4438 }
0x242a   :  { %v4441_v49 = vmul.f32 %v7353_v45, %v4439_v46  ;;  %v7355_v54 = vpop.eup %7354  ;;  %v4448_v62 = vsub.f32 1.0, %v7353_v45  ;;  %v4454_v2 = vmul.f32 %v7353_v45, %v8505_v12 }
0x242b   :  { %v4617_v55 = vadd.f32 1.0, %v7355_v54 }
0x242c   :  { %4443 = vrot.lane.b32.xlu1 %v4441_v49, %s7637_s25 }
0x242d   :  { %7356 = vrcp.f32 %v4617_v55 }
0x2437   :  { %v7357_v56 = vpop.eup %7356 }
0x2438   :  { %v4632_v6 = vsub.f32 1.0, %v7357_v56  ;;  %v4638_v36 = vmul.f32 %v7357_v56, %v8510_v19 }
0x2480   :  { %v4623_v57 = vpop.permute.xlu0 %4622 }
0x2481   :  { %v4625_v58 = vmul.f32 %v7357_v56, %v4623_v57 }
0x2483   :  { %4627 = vrot.lane.b32.xlu0 %v4625_v58, %s7640_s30 }
0x249e   :  { %v4444_v59 = vpop.permute.xlu1 %4443 }
0x249f   :  { %v4446_v60 = vadd.f32 %v4444_v59, %v4356_v26 }
0x24a1   :  { %7358 = vtanh.f32 %v4446_v60 }
0x24ab   :  { %v7359_v48 = vpop.eup %7358 }
0x24ac   :  { %4450 = vrot.lane.b32.xlu1 %v7359_v48, %s7638_s5 }
0x24f5   :  { %v4628_v61 = vpop.permute.xlu0 %4627 }
0x24f6   :  { %v4630_v5 = vadd.f32 %v4628_v61, %v8313_v16 }
0x24f8   :  { %7360 = vtanh.f32 %v4630_v5 }
0x2502   :  { %v7361_v10 = vpop.eup %7360 }
0x2503   :  { %4634 = vrot.lane.b32.xlu0 %v7361_v10, %s7641_s26 }
0x251e   :  { %v4451_v63 = vpop.permute.xlu1 %4450 }
0x251f   :  { %v4453_v35 = vmul.f32 %v4451_v63, %v4448_v62 }
0x2521   :  { %v8552_v3 = vadd.f32 %v4454_v2, %v4453_v35 }
0x2523   :  { %4457 = vrot.lane.b32.xlu1 %v8552_v3, %s7638_s5 }
0x2575   :  { %v4635_v8 = vpop.permute.xlu0 %4634 }
0x2576   :  { %v4637_v7 = vmul.f32 %v4635_v8, %v4632_v6 }
0x2578   :  { %v8557_v4 = vadd.f32 %v4638_v36, %v4637_v7 }
0x257a   :  { %4641 = vrot.lane.b32.xlu0 %v8557_v4, %s7641_s26 }
0x2595   :  { %v4458_v9 = vpop.permute.xlu1 %4457 }
0x2596   :  { %6766 = vmatmul.mubr.msk.f32.vlgmr.msra.gmra.mrb[48].mxu0 %vm280_vm3, %v4458_v9  ;;  %6791 = vmatmul.mubr.msk.f32.vlgmr.msra.gmra.mrb[50].mxu1 %vm280_vm3, %v4458_v9 }
0x2597   :  { %7112 = vmatpush3.bf16.msra.mxu0 %v8332_v37  ;;  %7127 = vmatpush3.bf16.msra.mxu1 %v8289_v31 }
0x2598   :  { %6779 = vmatprep.mubr.msk.f32.mxu0 %vm7636_vm0, %v7635_v1  ;;  %6808 = vmatprep.mubr.msk.f32.mxu1 %vm7636_vm0, %v7635_v1 }
0x2599   :  { %7119 = vmatprep.subr.bf16.mxu0 %v7634_v0  ;;  %7131 = vmatprep.subr.bf16.mxu1 %v7634_v0 }
0x25ec   :  { %v4642_v12 = vpop.permute.xlu0 %4641 }
0x25ed   :  { %6780 = vmatmul.mubr.msk.f32.vlgmr.msra.gmra.mrb[50].mxu0 %vm470_vm4, %v4642_v12  ;;  %6809 = vmatmul.mubr.msk.f32.vlgmr.msra.gmra.mrb[52].mxu1 %vm470_vm4, %v4642_v12 }
0x25ee   :  { %7121 = vmatpush3.bf16.msra.mxu0 %v8392_v18  ;;  %7133 = vmatpush3.bf16.msra.mxu1 %v8327_v30 }
0x25ef   :  { %7122 = vmatprep.subr.bf16.mxu0 %v7634_v0  ;;  %7134 = vmatprep.subr.bf16.mxu1 %v7634_v0 }
0x25f0   :  { %6801 = vmatprep.mubr.msk.f32.mxu0 %vm7636_vm0, %v7635_v1  ;;  %6826 = vmatprep.mubr.msk.f32.mxu1 %vm7636_vm0, %v7635_v1 }
0x25f2   :  { %7124 = vmatpush3.bf16.msra.mxu0 %v8398_v20  ;;  %7136 = vmatpush3.bf16.msra.mxu1 %v8335_v38 }
0x25f3   :  { %7128 = vmatprep.subr.bf16.mxu0 %v7634_v0  ;;  %7143 = vmatprep.subr.bf16.mxu1 %v7634_v0 }
0x2669   :  { %v8585_v14 = vpop.f32.mrb[48].mxu0  ;;  %v4781_v15 = vpop.f32.mrb[50].mxu1 }
0x266a   :  { %v4792_v50 = vadd.f32 %v4781_v15, %v8356_v47  ;;  %v6767_v13 = vpop.f32.mrb[49].mxu0  ;;  %v6792_v19 = vpop.f32.mrb[51].mxu1 }
0x266c   :  { %4794 = vrot.lane.b32.xlu1 %v4792_v50, %s7637_s25 }
0x26c0   :  { %v4711_v21 = vpop.f32.mrb[50].mxu0  ;;  %v4965_v22 = vpop.f32.mrb[52].mxu1 }
0x26c1   :  { %v4712_v24 = vadd.f32 %v8373_v52, %v4711_v21  ;;  %v4976_v25 = vadd.f32 %v4965_v22, %v8303_v11  ;;  %v6781_v27 = vpop.f32.mrb[51].mxu0  ;;  %v6810_v28 = vpop.f32.mrb[53].mxu1  ;;  %v4969_v43 = vadd.f32 %v4965_v22, %v8313_v16 }
0x26c3   :  { %v4785_v29 = vadd.f32 %v4781_v15, %v4712_v24  ;;  %4978 = vrot.lane.b32.xlu0 %v4976_v25, %s7638_s5  ;;  %v6074_v44 = vmul.f32 -1.442695, %v4969_v43 }
0x26c5   :  { %v6070_v32 = vmul.f32 -1.442695, %v4785_v29 }
0x26c7   :  { %7362 = vpow2.f32 %v6070_v32 }
0x26d1   :  { %v7363_v26 = vpop.eup %7362 }
0x26d2   :  { %v4789_v34 = vadd.f32 1.0, %v7363_v26 }
0x26d4   :  { %7364 = vrcp.f32 %v4789_v34 }
0x26d5   :  { %7366 = vpow2.f32 %v6074_v44 }
0x26de   :  { %v7365_v39 = vpop.eup %7364  ;;  %v4795_v41 = vpop.permute.xlu1 %4794 }
0x26df   :  { %v4797_v42 = vmul.f32 %v7365_v39, %v4795_v41  ;;  %v7367_v17 = vpop.eup %7366  ;;  %v4804_v59 = vsub.f32 1.0, %v7365_v39  ;;  %v4810_v48 = vmul.f32 %v7365_v39, %v8552_v3 }
0x26e0   :  { %v4973_v45 = vadd.f32 1.0, %v7367_v17 }
0x26e1   :  { %4799 = vrot.lane.b32.xlu1 %v4797_v42, %s7637_s25 }
0x26e2   :  { %7368 = vrcp.f32 %v4973_v45 }
0x26ec   :  { %v7369_v46 = vpop.eup %7368 }
0x26ed   :  { %v4988_v10 = vsub.f32 1.0, %v7369_v46  ;;  %v4994_v63 = vmul.f32 %v7369_v46, %v8557_v4 }
0x2735   :  { %v4979_v49 = vpop.permute.xlu0 %4978 }
0x2736   :  { %v4981_v51 = vmul.f32 %v7369_v46, %v4979_v49 }
0x2738   :  { %4983 = vrot.lane.b32.xlu0 %v4981_v51, %s7640_s30 }
0x2753   :  { %v4800_v53 = vpop.permute.xlu1 %4799 }
0x2754   :  { %v4802_v54 = vadd.f32 %v4800_v53, %v4712_v24 }
0x2756   :  { %7370 = vtanh.f32 %v4802_v54 }
0x2760   :  { %v7371_v55 = vpop.eup %7370 }
0x2761   :  { %4806 = vrot.lane.b32.xlu1 %v7371_v55, %s7638_s5 }
0x27aa   :  { %v4984_v56 = vpop.permute.xlu0 %4983 }
0x27ab   :  { %v4986_v57 = vadd.f32 %v4984_v56, %v8313_v16 }
0x27ad   :  { %7372 = vtanh.f32 %v4986_v57 }
0x27b7   :  { %v7373_v58 = vpop.eup %7372 }
0x27b8   :  { %4990 = vrot.lane.b32.xlu0 %v7373_v58, %s7641_s26 }
0x27d3   :  { %v4807_v60 = vpop.permute.xlu1 %4806 }
0x27d4   :  { %v4809_v61 = vmul.f32 %v4807_v60, %v4804_v59 }
0x27d6   :  { %v8599_v5 = vadd.f32 %v4810_v48, %v4809_v61 }
0x27d8   :  { %4813 = vrot.lane.b32.xlu1 %v8599_v5, %s7638_s5 }
0x282a   :  { %v4991_v62 = vpop.permute.xlu0 %4990 }
0x282b   :  { %v4993_v2 = vmul.f32 %v4991_v62, %v4988_v10 }
0x282d   :  { %v8604_v35 = vadd.f32 %v4994_v63, %v4993_v2 }
0x282f   :  { %4997 = vrot.lane.b32.xlu0 %v8604_v35, %s7641_s26 }
0x284a   :  { %v4814_v6 = vpop.permute.xlu1 %4813 }
0x284b   :  { %6802 = vmatmul.mubr.msk.f32.vlgmr.msra.gmra.mrb[52].mxu0 %vm280_vm3, %v4814_v6  ;;  %6827 = vmatmul.mubr.msk.f32.vlgmr.msra.gmra.mrb[54].mxu1 %vm280_vm3, %v4814_v6 }
0x284c   :  { %7130 = vmatpush3.bf16.msra.mxu0 %v8332_v37  ;;  %7145 = vmatpush3.bf16.msra.mxu1 %v8289_v31 }
0x284d   :  { %6815 = vmatprep.mubr.msk.f32.mxu0 %vm7636_vm0, %v7635_v1  ;;  %6844 = vmatprep.mubr.msk.f32.mxu1 %vm7636_vm0, %v7635_v1 }
0x284e   :  { %7137 = vmatprep.subr.bf16.mxu0 %v7634_v0  ;;  %7149 = vmatprep.subr.bf16.mxu1 %v7634_v0 }
0x28a1   :  { %v4998_v3 = vpop.permute.xlu0 %4997 }
0x28a2   :  { %6816 = vmatmul.mubr.msk.f32.vlgmr.msra.gmra.mrb[54].mxu0 %vm470_vm4, %v4998_v3  ;;  %6845 = vmatmul.mubr.msk.f32.vlgmr.msra.gmra.mrb[56].mxu1 %vm470_vm4, %v4998_v3 }
0x28a3   :  { %7139 = vmatpush3.bf16.msra.mxu0 %v8392_v18  ;;  %7151 = vmatpush3.bf16.msra.mxu1 %v8327_v30 }
0x28a4   :  { %7140 = vmatprep.subr.bf16.mxu0 %v7634_v0  ;;  %7152 = vmatprep.subr.bf16.mxu1 %v7634_v0 }
0x28a5   :  { %6837 = vmatprep.mubr.msk.f32.mxu0 %vm7636_vm0, %v7635_v1  ;;  %6862 = vmatprep.mubr.msk.f32.mxu1 %vm7636_vm0, %v7635_v1 }
0x28a7   :  { %7142 = vmatpush3.bf16.msra.mxu0 %v8398_v20  ;;  %7154 = vmatpush3.bf16.msra.mxu1 %v8335_v38 }
0x28a8   :  { %7146 = vmatprep.subr.bf16.mxu0 %v7634_v0  ;;  %7161 = vmatprep.subr.bf16.mxu1 %v7634_v0 }
0x291e   :  { %v8632_v8 = vpop.f32.mrb[52].mxu0  ;;  %v5137_v36 = vpop.f32.mrb[54].mxu1 }
0x291f   :  { %v5148_v7 = vadd.f32 %v5137_v36, %v8356_v47  ;;  %v6803_v4 = vpop.f32.mrb[53].mxu0  ;;  %v6828_v9 = vpop.f32.mrb[55].mxu1 }
0x2921   :  { %5150 = vrot.lane.b32.xlu1 %v5148_v7, %s7637_s25 }
0x2975   :  { %v5067_v12 = vpop.f32.mrb[54].mxu0  ;;  %v5321_v15 = vpop.f32.mrb[56].mxu1 }
0x2976   :  { %v5068_v50 = vadd.f32 %v8373_v52, %v5067_v12  ;;  %v5332_v13 = vadd.f32 %v5321_v15, %v8303_v11  ;;  %v6817_v19 = vpop.f32.mrb[55].mxu0  ;;  %v6846_v21 = vpop.f32.mrb[57].mxu1  ;;  %v5325_v26 = vadd.f32 %v5321_v15, %v8313_v16 }
0x2978   :  { %v5141_v22 = vadd.f32 %v5137_v36, %v5068_v50  ;;  %5334 = vrot.lane.b32.xlu0 %v5332_v13, %s7638_s5  ;;  %v6081_v34 = vmul.f32 -1.442695, %v5325_v26 }
0x297a   :  { %v6077_v24 = vmul.f32 -1.442695, %v5141_v22 }
0x297c   :  { %7374 = vpow2.f32 %v6077_v24 }
0x2986   :  { %v7375_v25 = vpop.eup %7374 }
0x2987   :  { %v5145_v27 = vadd.f32 1.0, %v7375_v25 }
0x2989   :  { %7376 = vrcp.f32 %v5145_v27 }
0x298a   :  { %7378 = vpow2.f32 %v6081_v34 }
0x2993   :  { %v7377_v28 = vpop.eup %7376  ;;  %v5151_v29 = vpop.permute.xlu1 %5150 }
0x2994   :  { %v5153_v32 = vmul.f32 %v7377_v28, %v5151_v29  ;;  %v7379_v39 = vpop.eup %7378  ;;  %v5160_v54 = vsub.f32 1.0, %v7377_v28  ;;  %v5166_v56 = vmul.f32 %v7377_v28, %v8599_v5 }
0x2995   :  { %v5329_v41 = vadd.f32 1.0, %v7379_v39 }
0x2996   :  { %5155 = vrot.lane.b32.xlu1 %v5153_v32, %s7637_s25 }
0x2997   :  { %7380 = vrcp.f32 %v5329_v41 }
0x29a1   :  { %v7381_v42 = vpop.eup %7380 }
0x29a2   :  { %v5344_v59 = vsub.f32 1.0, %v7381_v42  ;;  %v5350_v48 = vmul.f32 %v7381_v42, %v8604_v35 }
0x29ea   :  { %v5335_v43 = vpop.permute.xlu0 %5334 }
0x29eb   :  { %v5337_v44 = vmul.f32 %v7381_v42, %v5335_v43 }
0x29ed   :  { %5339 = vrot.lane.b32.xlu0 %v5337_v44, %s7640_s30 }
0x2a08   :  { %v5156_v17 = vpop.permute.xlu1 %5155 }
0x2a09   :  { %v5158_v45 = vadd.f32 %v5156_v17, %v5068_v50 }
0x2a0b   :  { %7382 = vtanh.f32 %v5158_v45 }
0x2a15   :  { %v7383_v46 = vpop.eup %7382 }
0x2a16   :  { %5162 = vrot.lane.b32.xlu1 %v7383_v46, %s7638_s5 }
0x2a5f   :  { %v5340_v49 = vpop.permute.xlu0 %5339 }
0x2a60   :  { %v5342_v51 = vadd.f32 %v5340_v49, %v8313_v16 }
0x2a62   :  { %7384 = vtanh.f32 %v5342_v51 }
0x2a6c   :  { %v7385_v53 = vpop.eup %7384 }
0x2a6d   :  { %5346 = vrot.lane.b32.xlu0 %v7385_v53, %s7641_s26 }
0x2a88   :  { %v5163_v55 = vpop.permute.xlu1 %5162 }
0x2a89   :  { %v5165_v57 = vmul.f32 %v5163_v55, %v5160_v54 }
0x2a8b   :  { %v8646_v58 = vadd.f32 %v5166_v56, %v5165_v57 }
0x2a8d   :  { %5169 = vrot.lane.b32.xlu1 %v8646_v58, %s7638_s5 }
0x2adf   :  { %v5347_v60 = vpop.permute.xlu0 %5346 }
0x2ae0   :  { %v5349_v61 = vmul.f32 %v5347_v60, %v5344_v59 }
0x2ae2   :  { %v8651_v10 = vadd.f32 %v5350_v48, %v5349_v61 }
0x2ae4   :  { %5353 = vrot.lane.b32.xlu0 %v8651_v10, %s7641_s26 }
0x2aff   :  { %v5170_v62 = vpop.permute.xlu1 %5169 }
0x2b00   :  { %6838 = vmatmul.mubr.msk.f32.vlgmr.msra.gmra.mrb[56].mxu0 %vm280_vm3, %v5170_v62  ;;  %6863 = vmatmul.mubr.msk.f32.vlgmr.msra.gmra.mrb[58].mxu1 %vm280_vm3, %v5170_v62 }
0x2b01   :  { %7148 = vmatpush3.bf16.msra.mxu0 %v8332_v37  ;;  %7163 = vmatpush3.bf16.msra.mxu1 %v8289_v31 }
0x2b02   :  { %6851 = vmatprep.mubr.msk.f32.mxu0 %vm7636_vm0, %v7635_v1  ;;  %6880 = vmatprep.mubr.msk.f32.mxu1 %vm7636_vm0, %v7635_v1 }
0x2b03   :  { %7155 = vmatprep.subr.bf16.mxu0 %v7634_v0  ;;  %7167 = vmatprep.subr.bf16.mxu1 %v7634_v0 }
0x2b56   :  { %v5354_v5 = vpop.permute.xlu0 %5353 }
0x2b57   :  { %6852 = vmatmul.mubr.msk.f32.vlgmr.msra.gmra.mrb[58].mxu0 %vm470_vm4, %v5354_v5  ;;  %6881 = vmatmul.mubr.msk.f32.vlgmr.msra.gmra.mrb[60].mxu1 %vm470_vm4, %v5354_v5 }
0x2b58   :  { %7157 = vmatpush3.bf16.msra.mxu0 %v8392_v18  ;;  %7169 = vmatpush3.bf16.msra.mxu1 %v8327_v30 }
0x2b59   :  { %7158 = vmatprep.subr.bf16.mxu0 %v7634_v0  ;;  %7170 = vmatprep.subr.bf16.mxu1 %v7634_v0 }
0x2b5a   :  { %6873 = vmatprep.mubr.msk.f32.mxu0 %vm7636_vm0, %v7635_v1  ;;  %6898 = vmatprep.mubr.msk.f32.mxu1 %vm7636_vm0, %v7635_v1 }
0x2b5c   :  { %7160 = vmatpush3.bf16.msra.mxu0 %v8398_v20  ;;  %7172 = vmatpush3.bf16.msra.mxu1 %v8335_v38 }
0x2b5d   :  { %7164 = vmatprep.subr.bf16.mxu0 %v7634_v0 }
0x2bd3   :  { %v8678_v31 = vpop.f32.mrb[56].mxu0  ;;  %v5493_v63 = vpop.f32.mrb[58].mxu1 }
0x2bd4   :  { %v5504_v30 = vadd.f32 %v5493_v63, %v8356_v47  ;;  %v6839_v2 = vpop.f32.mrb[57].mxu0  ;;  %v6864_v35 = vpop.f32.mrb[59].mxu1 }
0x2bd5   :  { %v4528_v2 = vadd.f32 %v8440_v40, %v8585_v14 }
0x2bd6   :  { %5506 = vrot.lane.b32.xlu1 %v5504_v30, %s7637_s25 }
0x2bd7   :  { %v6065_v35 = vmul.f32 -1.442695, %v4528_v2 }
0x2c2a   :  { %v5423_v6 = vpop.f32.mrb[58].mxu0  ;;  %v5677_v3 = vpop.f32.mrb[60].mxu1 }
0x2c2b   :  { %v5424_v36 = vadd.f32 %v8373_v52, %v5423_v6  ;;  %v5688_v7 = vadd.f32 %v5677_v3, %v8303_v11  ;;  %v6853_v4 = vpop.f32.mrb[59].mxu0  ;;  %v6882_v9 = vpop.f32.mrb[61].mxu1  ;;  %v5681_v22 = vadd.f32 %v5677_v3, %v8313_v16  ;;  %v5240_v6 = vadd.f32 %v8440_v40, %v8678_v31 }
0x2c2d   :  { %v5497_v38 = vadd.f32 %v5493_v63, %v5424_v36  ;;  %5690 = vrot.lane.b32.xlu0 %v5688_v7, %s7638_s5  ;;  %v6088_v52 = vmul.f32 -1.442695, %v5681_v22  ;;  %v3816_v63 = vadd.f32 %v8440_v40, %v8491_v33  ;;  %v6079_v3 = vmul.f32 -1.442695, %v5240_v6 }
0x2c2f   :  { %v6084_v12 = vmul.f32 -1.442695, %v5497_v38  ;;  %v6051_v30 = vmul.f32 -1.442695, %v3816_v63 }
0x2c31   :  { %7386 = vpow2.f32 %v6084_v12 }
0x2c3b   :  { %v7387_v15 = vpop.eup %7386 }
0x2c3c   :  { %v5501_v50 = vadd.f32 1.0, %v7387_v15 }
0x2c3e   :  { %7388 = vrcp.f32 %v5501_v50 }
0x2c3f   :  { %7390 = vpow2.f32 %v6088_v52 }
0x2c48   :  { %v7389_v13 = vpop.eup %7388  ;;  %v5507_v19 = vpop.permute.xlu1 %5506 }
0x2c49   :  { %v5509_v21 = vmul.f32 %v7389_v13, %v5507_v19  ;;  %v7391_v11 = vpop.eup %7390  ;;  %v5516_v42 = vsub.f32 1.0, %v7389_v13  ;;  %v5522_v44 = vmul.f32 %v7389_v13, %v8646_v58  ;;  %v7437_v13 = vld [vmem:[%s8771_s18] ss:$0 sm:$0xff] }
0x2c4a   :  { %v5685_v24 = vadd.f32 1.0, %v7391_v11  ;;  %v4172_v19 = vadd.f32 %v7437_v13, %v8538_v23  ;;  %v4884_v22 = vadd.f32 %v7437_v13, %v8632_v8 }
0x2c4b   :  { %5511 = vrot.lane.b32.xlu1 %v5509_v21, %s7637_s25 }
0x2c4c   :  { %7392 = vrcp.f32 %v5685_v24  ;;  %v6058_v21 = vmul.f32 -1.442695, %v4172_v19  ;;  %v6072_v52 = vmul.f32 -1.442695, %v4884_v22 }
0x2c56   :  { %v7393_v25 = vpop.eup %7392 }
0x2c57   :  { %v5700_v46 = vsub.f32 1.0, %v7393_v25  ;;  %v5706_v51 = vmul.f32 %v7393_v25, %v8651_v10 }
0x2c9f   :  { %v5691_v27 = vpop.permute.xlu0 %5690 }
0x2ca0   :  { %v5693_v28 = vmul.f32 %v7393_v25, %v5691_v27 }
0x2ca2   :  { %5695 = vrot.lane.b32.xlu0 %v5693_v28, %s7640_s30 }
0x2cbd   :  { %v5512_v29 = vpop.permute.xlu1 %5511 }
0x2cbe   :  { %v5514_v32 = vadd.f32 %v5512_v29, %v5424_v36 }
0x2cc0   :  { %7394 = vtanh.f32 %v5514_v32 }
0x2cca   :  { %v7395_v26 = vpop.eup %7394 }
0x2ccb   :  { %5518 = vrot.lane.b32.xlu1 %v7395_v26, %s7638_s5 }
0x2d14   :  { %v5696_v34 = vpop.permute.xlu0 %5695 }
0x2d15   :  { %v5698_v39 = vadd.f32 %v5696_v34, %v8313_v16 }
0x2d17   :  { %7396 = vtanh.f32 %v5698_v39 }
0x2d21   :  { %v7397_v41 = vpop.eup %7396 }
0x2d22   :  { %5702 = vrot.lane.b32.xlu0 %v7397_v41, %s7641_s26 }
0x2d3d   :  { %v5519_v43 = vpop.permute.xlu1 %5518 }
0x2d3e   :  { %v5521_v17 = vmul.f32 %v5519_v43, %v5516_v42 }
0x2d40   :  { %v8692_v45 = vadd.f32 %v5522_v44, %v5521_v17 }
0x2d42   :  { %5525 = vrot.lane.b32.xlu1 %v8692_v45, %s7638_s5 }
0x2d94   :  { %v5703_v49 = vpop.permute.xlu0 %5702 }
0x2d95   :  { %v5705_v53 = vmul.f32 %v5703_v49, %v5700_v46 }
0x2d97   :  { %v5707_v16 = vadd.f32 %v5706_v51, %v5705_v53 }
0x2d99   :  { %5709 = vrot.lane.b32.xlu0 %v5707_v16, %s7641_s26 }
0x2db4   :  { %v5526_v54 = vpop.permute.xlu1 %5525 }
0x2db5   :  { %6874 = vmatmul.mubr.msk.f32.vlgmr.msra.gmra.mrb[60].mxu0 %vm280_vm3, %v5526_v54  ;;  %6899 = vmatmul.mubr.msk.f32.vlgmr.msra.gmra.mrb[62].mxu1 %vm280_vm3, %v5526_v54 }
0x2db6   :  { %7166 = vmatpush3.bf16.msra.mxu0 %v8332_v37  ;;  %6887 = vmatprep.mubr.msk.f32.mxu0 %vm7636_vm0, %v7635_v1 }
0x2db7   :  { %7173 = vmatprep.subr.bf16.mxu0 %v7634_v0 }
0x2e0b   :  { %v5710_v55 = vpop.permute.xlu0 %5709 }
0x2e0c   :  { %6888 = vmatmul.mubr.msk.f32.vlgmr.msra.gmra.mrb[62].mxu0 %vm470_vm4, %v5710_v55 }
0x2e0d   :  { %7175 = vmatpush3.bf16.msra.mxu0 %v8392_v18  ;;  %6909 = vmatprep.mubr.msk.f32.mxu0 %vm7636_vm0, %v7635_v1  ;;  %v7436_v18 = vld [vmem:[%s8768_s15] ss:$0 sm:$0xff]  ;;  %s7647_s15 = smov 4  }
0x2e0e   :  { %7176 = vmatprep.subr.bf16.mxu0 %v7634_v0 }
0x2e11   :  { %7178 = vmatpush3.bf16.msra.mxu0 %v8398_v20 }
0x2e88   :  { %v5595_v56 = vpop.f32.mrb[60].mxu0  ;;  %v5849_v57 = vpop.f32.mrb[62].mxu1 }
0x2e89   :  { %v5860_v37 = vadd.f32 %v5849_v57, %v8356_v47  ;;  %v6875_v58 = vpop.f32.mrb[61].mxu0  ;;  %v6900_v59 = vpop.f32.mrb[63].mxu1  ;;  %v5596_v11 = vadd.f32 %v7437_v13, %v5595_v56 }
0x2e8b   :  { %5862 = vrot.lane.b32.xlu1 %v5860_v37, %s7637_s25  ;;  %v6086_v24 = vmul.f32 -1.442695, %v5596_v11 }
0x2edf   :  { %v5779_v60 = vpop.f32.mrb[62].mxu0 }
0x2ee0   :  { %v5780_v48 = vadd.f32 %v7436_v18, %v5779_v60  ;;  %v6889_v61 = vpop.f32.mrb[63].mxu0 }
0x2ee2   :  { %v5853_v1 = vadd.f32 %v5849_v57, %v5780_v48 }
0x2ee4   :  { %v6091_v10 = vmul.f32 -1.442695, %v5853_v1 }
0x2ee6   :  { %7398 = vpow2.f32 %v6091_v10 }
0x2ef0   :  { %v7399_v0 = vpop.eup %7398 }
0x2ef1   :  { %v5857_v20 = vadd.f32 1.0, %v7399_v0 }
0x2ef3   :  { %7400 = vrcp.f32 %v5857_v20 }
0x2ef4   :  { %7402 = vpow2.f32 %v6051_v30 }
0x2ef5   :  { %7404 = vpow2.f32 %v6065_v35 }
0x2ef6   :  { %7406 = vpow2.f32 %v6079_v3 }
0x2efd   :  { %v7401_v62 = vpop.eup %7400  ;;  %v5863_v5 = vpop.permute.xlu1 %5862 }
0x2efe   :  { %v5865_v47 = vmul.f32 %v7401_v62, %v5863_v5  ;;  %v7403_v36 = vpop.eup %7402  ;;  %v5872_v26 = vsub.f32 1.0, %v7401_v62  ;;  %v5878_v39 = vmul.f32 %v7401_v62, %v8692_v45 }
0x2eff   :  { %v3822_v9 = vadd.f32 1.0, %v7403_v36  ;;  %v7405_v38 = vpop.eup %7404 }
0x2f00   :  { %5867 = vrot.lane.b32.xlu0 %v5865_v47, %s7637_s25  ;;  %v4534_v33 = vadd.f32 1.0, %v7405_v38  ;;  %v7407_v12 = vpop.eup %7406  ;;  %s7648_s25 = smov 12  }
0x2f01   :  { %v5246_v15 = vadd.f32 1.0, %v7407_v12 }
0x2f72   :  { %v5868_v7 = vpop.permute.xlu0 %5867 }
0x2f73   :  { %v5870_v4 = vadd.f32 %v5868_v7, %v5780_v48 }
0x2f75   :  { %7408 = vtanh.f32 %v5870_v4 }
0x2f76   :  { %7410 = vrcp.f32 %v3822_v9 }
0x2f77   :  { %7412 = vrcp.f32 %v4534_v33 }
0x2f78   :  { %7414 = vrcp.f32 %v5246_v15 }
0x2f79   :  { %7416 = vpow2.f32 %v6058_v21 }
0x2f7a   :  { %7418 = vpow2.f32 %v6072_v52 }
0x2f7b   :  { %7420 = vpow2.f32 %v6086_v24 }
0x2f7f   :  { %v7409_v14 = vpop.eup %7408 }
0x2f80   :  { %5874 = vrot.lane.b32.xlu1 %v7409_v14, %s7638_s5  ;;  %v7411_v50 = vpop.eup %7410 }
0x2f81   :  { %v7413_v40 = vpop.eup %7412 }
0x2f82   :  { %v7415_v31 = vpop.eup %7414 }
0x2f83   :  { %v7417_v25 = vpop.eup %7416 }
0x2f84   :  { %3826 = vrot.lane.b32.xlu1 %v7411_v50, %s7647_s15  ;;  %v4178_v27 = vadd.f32 1.0, %v7417_v25  ;;  %v7419_v28 = vpop.eup %7418 }
0x2f85   :  { %v4890_v29 = vadd.f32 1.0, %v7419_v28  ;;  %v7421_v32 = vpop.eup %7420 }
0x2f86   :  { %7422 = vrcp.f32 %v4178_v27  ;;  %v5602_v41 = vadd.f32 1.0, %v7421_v32 }
0x2f87   :  { %7424 = vrcp.f32 %v4890_v29 }
0x2f88   :  { %4538 = vrot.lane.b32.xlu1 %v7413_v40, %s7648_s25  ;;  %7426 = vrcp.f32 %v5602_v41 }
0x2f8c   :  { %5250 = vrot.lane.b32.xlu1 %v7415_v31, %s7649_s8 }
0x2f90   :  { %v7423_v43 = vpop.eup %7422 }
0x2f91   :  { %v7425_v44 = vpop.eup %7424 }
0x2f92   :  { %v7427_v17 = vpop.eup %7426 }
0x2ff2   :  { %v5875_v34 = vpop.permute.xlu1 %5874 }
0x2ff3   :  { %v5877_v23 = vmul.f32 %v5875_v34, %v5872_v26 }
0x2ff5   :  { %v5879_v8 = vadd.f32 %v5878_v39, %v5877_v23 }
0x2ff6   :  { %v3827_v42 = vpop.permute.xlu1 %3826 }
0x2ff7   :  { %3830 = vst.msk [vmem:[%s8787_s11] sm:$0x3] %vm3829_vm6, %v3827_v42  ;;  %5881 = vrot.lane.b32.xlu0 %v5879_v8, %s7638_s5 }
0x2ffa   :  { %v4539_v46 = vpop.permute.xlu1 %4538 }
0x2ffb   :  { %4182 = vrot.lane.b32.xlu0 %v7423_v43, %s7627_s2 }
0x2ffe   :  { %v5251_v53 = vpop.permute.xlu1 %5250 }
0x2fff   :  { %4894 = vrot.lane.b32.xlu0 %v7425_v44, %s7650_s13 }
0x3003   :  { %5606 = vrot.lane.b32.xlu0 %v7427_v17, %s7651_s6 }
0x3069   :  { %v5882_v45 = vpop.permute.xlu0 %5881 }
0x306a   :  { %6910 = vmatmul.mubr.msk.f32.vlgmr.msra.gmra.mrb[64].mxu0 %vm280_vm3, %v5882_v45 }
0x306d   :  { %v4183_v49 = vpop.permute.xlu0 %4182 }
0x306e   :  { %4186 = vst.msk [vmem:[%s8787_s11] sm:$0x3] %vm4185_vm7, %v4183_v49 }
0x306f   :  { %4542 = vst.msk [vmem:[%s8787_s11] sm:$0x3] %vm4541_vm8, %v4539_v46 }
0x3071   :  { %v4895_v51 = vpop.permute.xlu0 %4894 }
0x3072   :  { %4898 = vst.msk [vmem:[%s8787_s11] sm:$0x3] %vm4897_vm9, %v4895_v51 }
0x3073   :  { %5254 = vst.msk [vmem:[%s8787_s11] sm:$0x3] %vm5253_vm10, %v5251_v53 }
0x3075   :  { %v5607_v16 = vpop.permute.xlu0 %5606 }
0x3076   :  { %5610 = vst.msk [vmem:[%s8787_s11] sm:$0x3] %vm5609_vm11, %v5607_v16 }
0x313d   :  { %v5951_v54 = vpop.f32.mrb[64].mxu0 }
0x313e   :  { %v5952_v55 = vadd.f32 %v7437_v13, %v5951_v54  ;;  %v6911_v56 = vpop.f32.mrb[65].mxu0 }
0x3140   :  { %v6093_v57 = vmul.f32 -1.442695, %v5952_v55 }
0x3142   :  { %7428 = vpow2.f32 %v6093_v57 }
0x314c   :  { %v7429_v37 = vpop.eup %7428 }
0x314d   :  { %v5958_v58 = vadd.f32 1.0, %v7429_v37 }
0x314f   :  { %7430 = vrcp.f32 %v5958_v58 }
0x3159   :  { %v7431_v59 = vpop.eup %7430 }
0x315a   :  { %5962 = vrot.lane.b32.xlu1 %v7431_v59, %s7652_s19 }
0x31cc   :  { %v5963_v60 = vpop.permute.xlu1 %5962 }
0x31cd   :  { %5966 = vst.msk [vmem:[%s8787_s11] sm:$0x3] %vm5965_vm12, %v5963_v60 }
0x31ce   :  { %5971 = vsyncpa [#allocation3], 1 }
0x31cf   :  { %5972 = vsyncpa [#allocation5], 1 }
0x31d0   :  { %5973 = vsyncpa [#allocation8], 1 }
0x31d1   :  { %5974 = vsyncpa [#allocation11], 1 }
0x31d2   :  { %5975 = vsyncpa [#allocation14], 1 }

</bundles_post_ra>
